<compile_context>
chip_gen: v7x
topology: tpu7x:2x2x1
jax: 0.10.0
libtpu: 0.0.40
codegen_flags: <defaults>
</compile_context>

<pallas_src>
import jax
import jax.numpy as jnp
from jax.experimental import pallas as pl
from jax.experimental.pallas import tpu as pltpu

HIDDEN = 256
OUT_PAD = 128  # pad the 2-wide head to a full lane width for unmasked stores


def _pinn_kernel(t_ref,
                 w1_ref, b1_ref, w2_ref, b2_ref, w3_ref, b3_ref,
                 w4_ref, b4_ref, w5_ref, b5_ref, w6_ref, b6_ref,
                 o_ref):
    # Layer 1: (TM,1) x (1,256) is a K=1 contraction -> do it on the VPU as a
    # broadcast multiply instead of wasting an MXU pass.
    x = t_ref[...]                                            # (TM, 1)  f32
    h = jnp.tanh(x * w1_ref[...] + b1_ref[...])               # (TM, 256) f32

    # Hidden layers 2..5: bf16 operands on the MXU, f32 accumulation;
    # bias add + tanh kept in f32.
    for w_ref, b_ref in ((w2_ref, b2_ref), (w3_ref, b3_ref),
                         (w4_ref, b4_ref), (w5_ref, b5_ref)):
        z = jnp.dot(h.astype(jnp.bfloat16), w_ref[...],
                    preferred_element_type=jnp.float32)
        h = jnp.tanh(z + b_ref[...])

    # Output head in f32, lane-dense (TM, 128) store (columns 2..127 are zeros).
    o_ref[...] = jnp.dot(h, w6_ref[...],
                         preferred_element_type=jnp.float32) + b6_ref[...]


def _full_spec(shape):
    # Weight / bias: whole array resident, same block for every grid step.
    return pl.BlockSpec(shape, lambda i: (0,) * len(shape))


def pinn_forward(t, params):
    """t: (N,) or (N,1) float32.  Returns (N, 2) float32."""
    t = t.reshape(-1, 1).astype(jnp.float32)
    n = t.shape[0]

    # Tile selection: one fat tile for small batches; 512-row tiles otherwise
    # (e.g. N=1000 -> n_pad=1024, grid=2, so v7x megacore gets both TCs busy).
    if n <= 512:
        tm = max(8, -(-n // 8) * 8)
        n_pad = tm
    else:
        tm = 512
        n_pad = -(-n // tm) * tm
    if n_pad != n:
        t = jnp.pad(t, ((0, n_pad - n), (0, 0)))

    (w1, b1), (w2, b2), (w3, b3), (w4, b4), (w5, b5), (w6, b6) = params

    # Hidden weights in bf16 (halves weight DMA, single-pass MXU).
    w2, w3, w4, w5 = (w.astype(jnp.bfloat16) for w in (w2, w3, w4, w5))
    # Pad the output head to 128 lanes; keep it f32.
    w6p = jnp.zeros((HIDDEN, OUT_PAD), jnp.float32).at[:, :2].set(w6)
    b6p = jnp.zeros((1, OUT_PAD), jnp.float32).at[:, :2].set(b6)

    args = (t, w1, b1, w2, b2, w3, b3, w4, b4, w5, b5, w6p, b6p)
    in_specs = [pl.BlockSpec((tm, 1), lambda i: (i, 0))] + \
               [_full_spec(a.shape) for a in args[1:]]
    out_spec = pl.BlockSpec((tm, OUT_PAD), lambda i: (i, 0))

    out = pl.pallas_call(
        _pinn_kernel,
        out_shape=jax.ShapeDtypeStruct((n_pad, OUT_PAD), jnp.float32),
        grid_spec=pltpu.PrefetchScalarGridSpec(
            num_scalar_prefetch=0,
            grid=(n_pad // tm,),
            in_specs=in_specs,
            out_specs=out_spec,
        ),
        compiler_params=pltpu.CompilerParams(
            dimension_semantics=("parallel",)),
    )(*args)

    return out[:n, :2]


def init_params(key):
    """Deterministic init mimicking nn.Linear default (U[-1/sqrt(fan_in), 1/sqrt(fan_in)]).
    Weights stored pre-transposed as (in, out); biases as (1, out). All f32."""
    dims = [(1, HIDDEN), (HIDDEN, HIDDEN), (HIDDEN, HIDDEN),
            (HIDDEN, HIDDEN), (HIDDEN, HIDDEN), (HIDDEN, 2)]
    params = []
    for (fan_in, fan_out) in dims:
        key, kw, kb = jax.random.split(key, 3)
        bound = 1.0 / jnp.sqrt(fan_in)
        w = jax.random.uniform(kw, (fan_in, fan_out), jnp.float32, -bound, bound)
        b = jax.random.uniform(kb, (1, fan_out), jnp.float32, -bound, bound)
        params.append((w, b))
    return params


def pinn_reference(t, params):
    """Pure-JAX f32 reference (matches the PyTorch module's forward)."""
    x = t.reshape(-1, 1).astype(jnp.float32)
    for i, (w, b) in enumerate(params):
        x = x @ w + b
        if i < len(params) - 1:
            x = jnp.tanh(x)
    return x


if __name__ == "__main__":
    key = jax.random.PRNGKey(0)
    params = init_params(key)

    # Small deterministic input consistent with t = np.linspace(0, 5, 1000) usage.
    N = 256
    t = jnp.linspace(0.0, 5.0, N, dtype=jnp.float32)

    out = pinn_forward(t, params)
    out = jax.block_until_ready(out)

    ref = pinn_reference(t, params)
    assert out.shape == (N, 2), out.shape
    # Hidden matmuls run with bf16 operands (f32 accumulation), so compare against
    # the f32 reference with a correspondingly relaxed tolerance.
    max_err = float(jnp.max(jnp.abs(out - ref)))
    assert max_err < 5e-2, max_err

    print("KERNEL_OK")
</pallas_src>

<mosaic_0001>
module attributes {stable_mosaic.version = 11 : i64} {
  func.func @_pinn_kernel(%arg0: i32, %arg1: memref<256x1xf32, #tpu.memory_space<vmem>>, %arg2: memref<1x256xf32, #tpu.memory_space<vmem>>, %arg3: memref<1x256xf32, #tpu.memory_space<vmem>>, %arg4: memref<256x256xbf16, #tpu.memory_space<vmem>>, %arg5: memref<1x256xf32, #tpu.memory_space<vmem>>, %arg6: memref<256x256xbf16, #tpu.memory_space<vmem>>, %arg7: memref<1x256xf32, #tpu.memory_space<vmem>>, %arg8: memref<256x256xbf16, #tpu.memory_space<vmem>>, %arg9: memref<1x256xf32, #tpu.memory_space<vmem>>, %arg10: memref<256x256xbf16, #tpu.memory_space<vmem>>, %arg11: memref<1x256xf32, #tpu.memory_space<vmem>>, %arg12: memref<256x128xf32, #tpu.memory_space<vmem>>, %arg13: memref<1x128xf32, #tpu.memory_space<vmem>>, %arg14: memref<256x128xf32, #tpu.memory_space<vmem>>) attributes {dimension_semantics = [#tpu.dimension_semantics<parallel>], iteration_bounds = array<i64: 1>, scalar_prefetch = 0 : i64, scratch_operands = 0 : i64, tpu.core_type = #tpu.core_type<tc>, window_params = [{transform_indices = @transform_0, window_bounds = array<i64: 256, 1>}, {pipeline_mode = #tpu.pipeline_mode<synchronous>, transform_indices = @transform_1, window_bounds = array<i64: 1, 256>}, {pipeline_mode = #tpu.pipeline_mode<synchronous>, transform_indices = @transform_2, window_bounds = array<i64: 1, 256>}, {pipeline_mode = #tpu.pipeline_mode<synchronous>, transform_indices = @transform_3, window_bounds = array<i64: 256, 256>}, {pipeline_mode = #tpu.pipeline_mode<synchronous>, transform_indices = @transform_4, window_bounds = array<i64: 1, 256>}, {pipeline_mode = #tpu.pipeline_mode<synchronous>, transform_indices = @transform_5, window_bounds = array<i64: 256, 256>}, {pipeline_mode = #tpu.pipeline_mode<synchronous>, transform_indices = @transform_6, window_bounds = array<i64: 1, 256>}, {pipeline_mode = #tpu.pipeline_mode<synchronous>, transform_indices = @transform_7, window_bounds = array<i64: 256, 256>}, {pipeline_mode = #tpu.pipeline_mode<synchronous>, transform_indices = @transform_8, window_bounds = array<i64: 1, 256>}, {pipeline_mode = #tpu.pipeline_mode<synchronous>, transform_indices = @transform_9, window_bounds = array<i64: 256, 256>}, {pipeline_mode = #tpu.pipeline_mode<synchronous>, transform_indices = @transform_10, window_bounds = array<i64: 1, 256>}, {pipeline_mode = #tpu.pipeline_mode<synchronous>, transform_indices = @transform_11, window_bounds = array<i64: 256, 128>}, {pipeline_mode = #tpu.pipeline_mode<synchronous>, transform_indices = @transform_12, window_bounds = array<i64: 1, 128>}, {transform_indices = @transform_13, window_bounds = array<i64: 256, 128>}]} {
    %c0 = arith.constant 0 : index
    %c0_0 = arith.constant 0 : index
    %0 = vector.load %arg1[%c0, %c0_0] : memref<256x1xf32, #tpu.memory_space<vmem>>, vector<256x1xf32>
    %c0_1 = arith.constant 0 : index
    %c0_2 = arith.constant 0 : index
    %1 = vector.load %arg2[%c0_1, %c0_2] : memref<1x256xf32, #tpu.memory_space<vmem>>, vector<1x256xf32>
    %2 = vector.broadcast %0 : vector<256x1xf32> to vector<256x256xf32>
    %3 = vector.broadcast %1 : vector<1x256xf32> to vector<256x256xf32>
    %4 = arith.mulf %2, %3 : vector<256x256xf32>
    %c0_3 = arith.constant 0 : index
    %c0_4 = arith.constant 0 : index
    %5 = vector.load %arg3[%c0_3, %c0_4] : memref<1x256xf32, #tpu.memory_space<vmem>>, vector<1x256xf32>
    %6 = vector.broadcast %5 : vector<1x256xf32> to vector<256x256xf32>
    %7 = arith.addf %4, %6 : vector<256x256xf32>
    %8 = math.tanh %7 : vector<256x256xf32>
    %9 = arith.truncf %8 : vector<256x256xf32> to vector<256x256xbf16>
    %c0_5 = arith.constant 0 : index
    %c0_6 = arith.constant 0 : index
    %10 = vector.load %arg4[%c0_5, %c0_6] : memref<256x256xbf16, #tpu.memory_space<vmem>>, vector<256x256xbf16>
    %cst = arith.constant dense<0.000000e+00> : vector<256x256xf32>
    %11 = tpu.matmul %9, %10, %cst {dimension_numbers = #tpu.dot_dimension_numbers<[1], [0], [0], [1], [0, 0, 1, 1], [], []>} : vector<256x256xbf16>, vector<256x256xbf16>, vector<256x256xf32> -> vector<256x256xf32>
    %c0_7 = arith.constant 0 : index
    %c0_8 = arith.constant 0 : index
    %12 = vector.load %arg5[%c0_7, %c0_8] : memref<1x256xf32, #tpu.memory_space<vmem>>, vector<1x256xf32>
    %13 = vector.broadcast %12 : vector<1x256xf32> to vector<256x256xf32>
    %14 = arith.addf %11, %13 : vector<256x256xf32>
    %15 = math.tanh %14 : vector<256x256xf32>
    %16 = arith.truncf %15 : vector<256x256xf32> to vector<256x256xbf16>
    %c0_9 = arith.constant 0 : index
    %c0_10 = arith.constant 0 : index
    %17 = vector.load %arg6[%c0_9, %c0_10] : memref<256x256xbf16, #tpu.memory_space<vmem>>, vector<256x256xbf16>
    %cst_11 = arith.constant dense<0.000000e+00> : vector<256x256xf32>
    %18 = tpu.matmul %16, %17, %cst_11 {dimension_numbers = #tpu.dot_dimension_numbers<[1], [0], [0], [1], [0, 0, 1, 1], [], []>} : vector<256x256xbf16>, vector<256x256xbf16>, vector<256x256xf32> -> vector<256x256xf32>
    %c0_12 = arith.constant 0 : index
    %c0_13 = arith.constant 0 : index
    %19 = vector.load %arg7[%c0_12, %c0_13] : memref<1x256xf32, #tpu.memory_space<vmem>>, vector<1x256xf32>
    %20 = vector.broadcast %19 : vector<1x256xf32> to vector<256x256xf32>
    %21 = arith.addf %18, %20 : vector<256x256xf32>
    %22 = math.tanh %21 : vector<256x256xf32>
    %23 = arith.truncf %22 : vector<256x256xf32> to vector<256x256xbf16>
    %c0_14 = arith.constant 0 : index
    %c0_15 = arith.constant 0 : index
    %24 = vector.load %arg8[%c0_14, %c0_15] : memref<256x256xbf16, #tpu.memory_space<vmem>>, vector<256x256xbf16>
    %cst_16 = arith.constant dense<0.000000e+00> : vector<256x256xf32>
    %25 = tpu.matmul %23, %24, %cst_16 {dimension_numbers = #tpu.dot_dimension_numbers<[1], [0], [0], [1], [0, 0, 1, 1], [], []>} : vector<256x256xbf16>, vector<256x256xbf16>, vector<256x256xf32> -> vector<256x256xf32>
    %c0_17 = arith.constant 0 : index
    %c0_18 = arith.constant 0 : index
    %26 = vector.load %arg9[%c0_17, %c0_18] : memref<1x256xf32, #tpu.memory_space<vmem>>, vector<1x256xf32>
    %27 = vector.broadcast %26 : vector<1x256xf32> to vector<256x256xf32>
    %28 = arith.addf %25, %27 : vector<256x256xf32>
    %29 = math.tanh %28 : vector<256x256xf32>
    %30 = arith.truncf %29 : vector<256x256xf32> to vector<256x256xbf16>
    %c0_19 = arith.constant 0 : index
    %c0_20 = arith.constant 0 : index
    %31 = vector.load %arg10[%c0_19, %c0_20] : memref<256x256xbf16, #tpu.memory_space<vmem>>, vector<256x256xbf16>
    %cst_21 = arith.constant dense<0.000000e+00> : vector<256x256xf32>
    %32 = tpu.matmul %30, %31, %cst_21 {dimension_numbers = #tpu.dot_dimension_numbers<[1], [0], [0], [1], [0, 0, 1, 1], [], []>} : vector<256x256xbf16>, vector<256x256xbf16>, vector<256x256xf32> -> vector<256x256xf32>
    %c0_22 = arith.constant 0 : index
    %c0_23 = arith.constant 0 : index
    %33 = vector.load %arg11[%c0_22, %c0_23] : memref<1x256xf32, #tpu.memory_space<vmem>>, vector<1x256xf32>
    %34 = vector.broadcast %33 : vector<1x256xf32> to vector<256x256xf32>
    %35 = arith.addf %32, %34 : vector<256x256xf32>
    %36 = math.tanh %35 : vector<256x256xf32>
    %c0_24 = arith.constant 0 : index
    %c0_25 = arith.constant 0 : index
    %37 = vector.load %arg12[%c0_24, %c0_25] : memref<256x128xf32, #tpu.memory_space<vmem>>, vector<256x128xf32>
    %cst_26 = arith.constant dense<0.000000e+00> : vector<256x128xf32>
    %38 = tpu.matmul %36, %37, %cst_26 {dimension_numbers = #tpu.dot_dimension_numbers<[1], [0], [0], [1], [0, 0, 1, 1], [], []>} : vector<256x256xf32>, vector<256x128xf32>, vector<256x128xf32> -> vector<256x128xf32>
    %c0_27 = arith.constant 0 : index
    %c0_28 = arith.constant 0 : index
    %39 = vector.load %arg13[%c0_27, %c0_28] : memref<1x128xf32, #tpu.memory_space<vmem>>, vector<1x128xf32>
    %40 = vector.broadcast %39 : vector<1x128xf32> to vector<256x128xf32>
    %41 = arith.addf %38, %40 : vector<256x128xf32>
    %c0_29 = arith.constant 0 : index
    %c0_30 = arith.constant 0 : index
    %42 = vector.load %arg14[%c0_29, %c0_30] : memref<256x128xf32, #tpu.memory_space<vmem>>, vector<256x128xf32>
    tpu.vector_store %arg14[%c0_29, %c0_30], %41 {strides = array<i32>} : memref<256x128xf32, #tpu.memory_space<vmem>>, vector<256x128xf32>,
    return
  }
  func.func @transform_0(%arg0: i32) -> (i32, i32) {
    %c0_i32 = arith.constant 0 : i32
    %c0_i32_0 = arith.constant 0 : i32
    return %arg0, %c0_i32 : i32, i32
  }
  func.func @transform_1(%arg0: i32) -> (i32, i32) {
    %c0_i32 = arith.constant 0 : i32
    %c0_i32_0 = arith.constant 0 : i32
    %c0_i32_1 = arith.constant 0 : i32
    return %c0_i32, %c0_i32_0 : i32, i32
  }
  func.func @transform_2(%arg0: i32) -> (i32, i32) {
    %c0_i32 = arith.constant 0 : i32
    %c0_i32_0 = arith.constant 0 : i32
    %c0_i32_1 = arith.constant 0 : i32
    return %c0_i32, %c0_i32_0 : i32, i32
  }
  func.func @transform_3(%arg0: i32) -> (i32, i32) {
    %c0_i32 = arith.constant 0 : i32
    %c0_i32_0 = arith.constant 0 : i32
    %c0_i32_1 = arith.constant 0 : i32
    return %c0_i32, %c0_i32_0 : i32, i32
  }
  func.func @transform_4(%arg0: i32) -> (i32, i32) {
    %c0_i32 = arith.constant 0 : i32
    %c0_i32_0 = arith.constant 0 : i32
    %c0_i32_1 = arith.constant 0 : i32
    return %c0_i32, %c0_i32_0 : i32, i32
  }
  func.func @transform_5(%arg0: i32) -> (i32, i32) {
    %c0_i32 = arith.constant 0 : i32
    %c0_i32_0 = arith.constant 0 : i32
    %c0_i32_1 = arith.constant 0 : i32
    return %c0_i32, %c0_i32_0 : i32, i32
  }
  func.func @transform_6(%arg0: i32) -> (i32, i32) {
    %c0_i32 = arith.constant 0 : i32
    %c0_i32_0 = arith.constant 0 : i32
    %c0_i32_1 = arith.constant 0 : i32
    return %c0_i32, %c0_i32_0 : i32, i32
  }
  func.func @transform_7(%arg0: i32) -> (i32, i32) {
    %c0_i32 = arith.constant 0 : i32
    %c0_i32_0 = arith.constant 0 : i32
    %c0_i32_1 = arith.constant 0 : i32
    return %c0_i32, %c0_i32_0 : i32, i32
  }
  func.func @transform_8(%arg0: i32) -> (i32, i32) {
    %c0_i32 = arith.constant 0 : i32
    %c0_i32_0 = arith.constant 0 : i32
    %c0_i32_1 = arith.constant 0 : i32
    return %c0_i32, %c0_i32_0 : i32, i32
  }
  func.func @transform_9(%arg0: i32) -> (i32, i32) {
    %c0_i32 = arith.constant 0 : i32
    %c0_i32_0 = arith.constant 0 : i32
    %c0_i32_1 = arith.constant 0 : i32
    return %c0_i32, %c0_i32_0 : i32, i32
  }
  func.func @transform_10(%arg0: i32) -> (i32, i32) {
    %c0_i32 = arith.constant 0 : i32
    %c0_i32_0 = arith.constant 0 : i32
    %c0_i32_1 = arith.constant 0 : i32
    return %c0_i32, %c0_i32_0 : i32, i32
  }
  func.func @transform_11(%arg0: i32) -> (i32, i32) {
    %c0_i32 = arith.constant 0 : i32
    %c0_i32_0 = arith.constant 0 : i32
    %c0_i32_1 = arith.constant 0 : i32
    return %c0_i32, %c0_i32_0 : i32, i32
  }
  func.func @transform_12(%arg0: i32) -> (i32, i32) {
    %c0_i32 = arith.constant 0 : i32
    %c0_i32_0 = arith.constant 0 : i32
    %c0_i32_1 = arith.constant 0 : i32
    return %c0_i32, %c0_i32_0 : i32, i32
  }
  func.func @transform_13(%arg0: i32) -> (i32, i32) {
    %c0_i32 = arith.constant 0 : i32
    %c0_i32_0 = arith.constant 0 : i32
    return %arg0, %c0_i32 : i32, i32
  }
}

</mosaic_0001>

<bundles_post_ra>
// kernel: tpu_custom_call.1
= control target key start
LH: loop header
LB: loop body
LE: loop exit
PB: predicated region body
PF: predicated region fallthrough
CT: control target
= control target key end

     0   :  { %18 = vsyncpa [#allocation3], 0  ;;  %s4989_s0 = inlined_call_operand.vmem [shape: f32[256,1], index: 0, kind: input, shape index: {}]   ;;  %s4990_s1 = inlined_call_operand.vmem [shape: f32[1,256], index: 1, kind: input, shape index: {}]   ;;  %s4991_s2 = inlined_call_operand.vmem [shape: f32[1,256], index: 2, kind: input, shape index: {}]   ;;  %s4992_s3 = inlined_call_operand.vmem [shape: bf16[256,256], index: 3, kind: input, shape index: {}]   ;;  %s4993_s4 = inlined_call_operand.vmem [shape: f32[1,256], index: 4, kind: input, shape index: {}]   ;;  %s4994_s5 = inlined_call_operand.hbm [shape: bf16[256,256], index: 5, kind: input, shape index: {}]   ;;  %s4995_s6 = inlined_call_operand.vmem [shape: f32[1,256], index: 6, kind: input, shape index: {}]   ;;  %s4996_s7 = inlined_call_operand.hbm [shape: bf16[256,256], index: 7, kind: input, shape index: {}]   ;;  %s4997_s8 = inlined_call_operand.vmem [shape: f32[1,256], index: 8, kind: input, shape index: {}]   ;;  %s4998_s9 = inlined_call_operand.hbm [shape: bf16[256,256], index: 9, kind: input, shape index: {}]   ;;  %s4999_s10 = inlined_call_operand.vmem [shape: f32[1,256], index: 10, kind: input, shape index: {}]   ;;  %s5000_s11 = inlined_call_operand.hbm [shape: f32[256,128], index: 11, kind: input, shape index: {}]   ;;  %s5001_s12 = inlined_call_operand.vmem [shape: f32[1,128], index: 12, kind: input, shape index: {}]   ;;  %s5002_s13 = inlined_call_operand.hbm [shape: f32[256,128], index: 13, kind: output, shape index: {}]  }
   0x1   :  { %19 = vsyncpa [#allocation6], 0 }
   0x2   :  { %20 = vsyncpa [#allocation9], 0 }
   0x3   :  { %21 = vsyncpa [#allocation4], 0  ;;  %s3965_s25 = smov [#allocation5]   ;;  %s3966_s27 = smov [#allocation2]  }
   0x4   :  { %s51_s26 = sshll.u32 %s3965_s25, 4  ;;  %s37_s28 = sshll.u32 %s3966_s27, 4  ;;  %s52_s26 = int_to_ptr.vmem [resolvable:$true] %s51_s26  ;;  %s4044_s28 = int_to_ptr.vmem [resolvable:$true] %s37_s28 }
   0x5   :  { %s3847_s14 = scalar_lea.hbm %s4996_s7, 4096 }
   0x6   :  { %p3848_p0 = scmp.ne.s32.totalorder %s4996_s7, %s3847_s14  ;;  %p3851_p1 = scmp.lt.u32.totalorder %s3847_s14, %s4996_s7 }
   0x8   :  { %p3853_p2 = pnand %p3851_p1, %p3848_p0 }
   0xa   :  { %3856 = shalt.err (!%p3853_p2)
}
   0xb   :  { %s3857_s19 = scalar_lea.vmem %s52_s26, 4096  ;;  %p3862_p4 = scmp.lt.s32.totalorder %s52_s26, %s52_s26 }
   0xc   :  { %p3858_p3 = scmp.ne.s32.totalorder %s52_s26, %s3857_s19  ;;  %p3863_p5 = scmp.lt.s32.totalorder %s3857_s19, %s3857_s19 }
   0xe   :  { %p3864_p6 = por %p3863_p5, %p3862_p4 }
  0x10   :  { %p3865_p7 = pnand %p3864_p6, %p3858_p3 }
  0x12   :  { %3868 = shalt.err (!%p3865_p7)
}
  0x13   :  { %s3967_s20 = smov 128   ;;  %s3968_s21 = smov 8  }
  0x14   :  { %57 = dma.hbm_to_vmem [thread:$0]  %s4996_s7, 4096, %s52_s26, [#allocation6], %s3967_s20, %s3967_s20, %s3968_s21  }
  0x15   :  { %s3869_s27 = scalar_lea.hbm %s4994_s5, 4096 }
  0x16   :  { %p3870_p8 = scmp.ne.s32.totalorder %s4994_s5, %s3869_s27  ;;  %p3873_p9 = scmp.lt.u32.totalorder %s3869_s27, %s4994_s5 }
  0x18   :  { %p3875_p10 = pnand %p3873_p9, %p3870_p8 }
  0x1a   :  { %3878 = shalt.err (!%p3875_p10)
}
  0x1b   :  { %s3879_s16 = scalar_lea.vmem %s4044_s28, 4096  ;;  %p3884_p12 = scmp.lt.s32.totalorder %s4044_s28, %s4044_s28 }
  0x1c   :  { %p3880_p11 = scmp.ne.s32.totalorder %s4044_s28, %s3879_s16  ;;  %p3885_p13 = scmp.lt.s32.totalorder %s3879_s16, %s3879_s16 }
  0x1e   :  { %p3886_p0 = por %p3885_p13, %p3884_p12 }
  0x20   :  { %p3887_p1 = pnand %p3886_p0, %p3880_p11 }
  0x22   :  { %3890 = shalt.err (!%p3887_p1)
}
  0x23   :  { %43 = dma.hbm_to_vmem [thread:$0]  %s4994_s5, 4096, %s4044_s28, [#allocation3], %s3967_s20, %s3967_s20, %s3968_s21  }
  0x24   :  { %s3969_s17 = smov [#allocation7]   ;;  %s3970_s19 = smov [#allocation8]  }
  0x25   :  { %s65_s18 = sshll.u32 %s3969_s17, 4  ;;  %s79_s22 = sshll.u32 %s3970_s19, 4  ;;  %s66_s18 = int_to_ptr.vmem [resolvable:$true] %s65_s18  ;;  %s4081_s22 = int_to_ptr.vmem [resolvable:$true] %s79_s22 }
  0x26   :  { %s3891_s25 = scalar_lea.hbm %s4998_s9, 4096 }
  0x27   :  { %p3892_p2 = scmp.ne.s32.totalorder %s4998_s9, %s3891_s25  ;;  %p3895_p3 = scmp.lt.u32.totalorder %s3891_s25, %s4998_s9 }
  0x29   :  { %p3897_p4 = pnand %p3895_p3, %p3892_p2 }
  0x2b   :  { %3900 = shalt.err (!%p3897_p4)
}
  0x2c   :  { %s3901_s5 = scalar_lea.vmem %s66_s18, 4096  ;;  %p3906_p6 = scmp.lt.s32.totalorder %s66_s18, %s66_s18 }
  0x2d   :  { %p3902_p5 = scmp.ne.s32.totalorder %s66_s18, %s3901_s5  ;;  %p3907_p7 = scmp.lt.s32.totalorder %s3901_s5, %s3901_s5 }
  0x2f   :  { %p3908_p8 = por %p3907_p7, %p3906_p6 }
  0x31   :  { %p3909_p9 = pnand %p3908_p8, %p3902_p5 }
  0x33   :  { %3912 = shalt.err (!%p3909_p9)
}
  0x34   :  { %71 = dma.hbm_to_vmem [thread:$0]  %s4998_s9, 4096, %s66_s18, [#allocation6], %s3967_s20, %s3967_s20, %s3968_s21  }
  0x35   :  { %s3913_s26 = scalar_lea.hbm %s5000_s11, 4096 }
  0x36   :  { %p3914_p10 = scmp.ne.s32.totalorder %s5000_s11, %s3913_s26  ;;  %p3917_p11 = scmp.lt.u32.totalorder %s3913_s26, %s5000_s11 }
  0x38   :  { %p3919_p12 = pnand %p3917_p11, %p3914_p10 }
  0x3a   :  { %3922 = shalt.err (!%p3919_p12)
}
  0x3b   :  { %s3923_s25 = scalar_lea.vmem %s4081_s22, 4096  ;;  %p3928_p0 = scmp.lt.s32.totalorder %s4081_s22, %s4081_s22 }
  0x3c   :  { %p3924_p13 = scmp.ne.s32.totalorder %s4081_s22, %s3923_s25  ;;  %p3929_p1 = scmp.lt.s32.totalorder %s3923_s25, %s3923_s25 }
  0x3e   :  { %p3930_p2 = por %p3929_p1, %p3928_p0 }
  0x40   :  { %p3931_p3 = pnand %p3930_p2, %p3924_p13 }
  0x42   :  { %3934 = shalt.err (!%p3931_p3)
}
  0x43   :  { %85 = dma.hbm_to_vmem [thread:$0]  %s5000_s11, 4096, %s4081_s22, [#allocation9], %s3967_s20, %s3967_s20, %s3968_s21  }
  0x44   :  { %3957 = dma.done.wait [#allocation3], 4096  }
  0x45   :  { %3958 = vsyncadd [#allocation3], 4294963200 }
  0x46   :  { %3959 = dma.done.wait [#allocation6], 8192  }
  0x47   :  { %3960 = vsyncadd [#allocation6], 4294959104 }
  0x48   :  { %3961 = dma.done.wait [#allocation9], 4096  }
  0x49   :  { %3962 = vsyncadd [#allocation9], 4294963200  ;;  %v3971_v0 = vmov 0   ;;  %v102_v1 = vld [vmem:[%s4989_s0 + $0x10] sm:$0xff]  ;;  %v100_v2 = vld [vmem:[%s4989_s0] sm:$0xff] }
  0x4a   :  { %3014 = vset.pattern.permute.xlu1 %v3971_v0  ;;  %3013 = vset.pattern.permute.xlu0 %v3971_v0  ;;  %v103_v3 = vld [vmem:[%s4989_s0 + $0x18] sm:$0xff]  ;;  %v101_v4 = vld [vmem:[%s4989_s0 + $0x8] sm:$0xff]  ;;  %v104_v6 = vld [vmem:[%s4989_s0 + $0x20] sm:$0xff] }
  0x4b   :  { %145 = vperm.xlu1 %3014, %v102_v1   ;;  %135 = vperm.xlu0 %3013, %v100_v2   ;;  %v105_v5 = vld [vmem:[%s4989_s0 + $0x28] sm:$0xff]  ;;  %v107_v7 = vld [vmem:[%s4989_s0 + $0x38] sm:$0xff]  ;;  %v106_v8 = vld [vmem:[%s4989_s0 + $0x30] sm:$0xff]  ;;  %v294_v2 = vlaneseq }
  0x4c   :  { %v3015_v9 = vld [vmem:[%s4992_s3 + $0x4] ss:$8 sps:$4 sm:$0xff]   ;;  %v3017_v10 = vld [vmem:[%s4992_s3] ss:$8 sps:$4 sm:$0xff]   ;;  %v3018_v11 = vld [vmem:[%s4992_s3 + $0x14] ss:$8 sps:$4 sm:$0xff]  }
  0x4d   :  { %v109_v12 = vld [vmem:[%s4989_s0 + $0x48] sm:$0xff]  ;;  %v108_v13 = vld [vmem:[%s4989_s0 + $0x40] sm:$0xff]  ;;  %744 = vmatprep.subr.bf16.mxu0 %v3015_v9  ;;  %2972 = vmatprep.subr.bf16.mxu1 %v3015_v9  ;;  %v3020_v14 = vld [vmem:[%s4992_s3 + $0x10] ss:$8 sps:$4 sm:$0xff]  }
  0x4e   :  { %745 = vmatpush1.bf16.msra.mxu0 %v3017_v10  ;;  %2988 = vmatpush1.bf16.msra.mxu1 %v3017_v10  ;;  %v3021_v15 = vld [vmem:[%s4992_s3 + $0x24] ss:$8 sps:$4 sm:$0xff]   ;;  %v111_v16 = vld [vmem:[%s4989_s0 + $0x58] sm:$0xff]  ;;  %v110_v17 = vld [vmem:[%s4989_s0 + $0x50] sm:$0xff] }
  0x4f   :  { %150 = vperm.xlu1 %3014, %v103_v3   ;;  %140 = vperm.xlu0 %3013, %v101_v4   ;;  %v3023_v18 = vld [vmem:[%s4992_s3 + $0x20] ss:$8 sps:$4 sm:$0xff]   ;;  %v3024_v19 = vld [vmem:[%s4992_s3 + $0x34] ss:$8 sps:$4 sm:$0xff]   ;;  %v3026_v22 = vld [vmem:[%s4992_s3 + $0x30] ss:$8 sps:$4 sm:$0xff]  }
  0x50   :  { %746 = vmatprep.subr.bf16.mxu0 %v3018_v11  ;;  %2973 = vmatprep.subr.bf16.mxu1 %v3018_v11  ;;  %v113_v20 = vld [vmem:[%s4989_s0 + $0x68] sm:$0xff]  ;;  %v112_v21 = vld [vmem:[%s4989_s0 + $0x60] sm:$0xff]  ;;  %v115_v24 = vld [vmem:[%s4989_s0 + $0x78] sm:$0xff]  ;;  %v295_v3 = vshrl.u32 %v294_v2, 7 }
  0x51   :  { %v3027_v23 = vld [vmem:[%s4992_s3 + $0x44] ss:$8 sps:$4 sm:$0xff]   ;;  %v114_v25 = vld [vmem:[%s4989_s0 + $0x70] sm:$0xff]  ;;  %v3029_v26 = vld [vmem:[%s4992_s3 + $0x40] ss:$8 sps:$4 sm:$0xff]  }
  0x52   :  { %747 = vmatpush1.bf16.msra.mxu0 %v3020_v14  ;;  %2989 = vmatpush1.bf16.msra.mxu1 %v3020_v14  ;;  %v3030_v27 = vld [vmem:[%s4992_s3 + $0x54] ss:$8 sps:$4 sm:$0xff]   ;;  %v117_v28 = vld [vmem:[%s4989_s0 + $0x88] sm:$0xff]  ;;  %v116_v29 = vld [vmem:[%s4989_s0 + $0x80] sm:$0xff]  ;;  %v4310_v4 = vsub.s32 0, %v295_v3 }
  0x53   :  { %160 = vperm.xlu1 %3014, %v105_v5   ;;  %155 = vperm.xlu0 %3013, %v104_v6   ;;  %v3032_v30 = vld [vmem:[%s4992_s3 + $0x50] ss:$8 sps:$4 sm:$0xff]   ;;  %v3033_v33 = vld [vmem:[%s4992_s3 + $0x64] ss:$8 sps:$4 sm:$0xff]   ;;  %v3035_v34 = vld [vmem:[%s4992_s3 + $0x60] ss:$8 sps:$4 sm:$0xff]  }
  0x54   :  { %748 = vmatprep.subr.bf16.mxu0 %v3021_v15  ;;  %2974 = vmatprep.subr.bf16.mxu1 %v3021_v15  ;;  %v119_v31 = vld [vmem:[%s4989_s0 + $0x98] sm:$0xff]  ;;  %v118_v32 = vld [vmem:[%s4989_s0 + $0x90] sm:$0xff]  ;;  %v121_v36 = vld [vmem:[%s4989_s0 + $0xa8] sm:$0xff]  ;;  %v4315_v6 = vsub.s32 1, %v295_v3 }
  0x55   :  { %v3036_v35 = vld [vmem:[%s4992_s3 + $0x74] ss:$8 sps:$4 sm:$0xff]   ;;  %v120_v37 = vld [vmem:[%s4989_s0 + $0xa0] sm:$0xff]  ;;  %v3038_v38 = vld [vmem:[%s4992_s3 + $0x70] ss:$8 sps:$4 sm:$0xff]  }
  0x56   :  { %749 = vmatpush1.bf16.msra.mxu0 %v3023_v18  ;;  %2990 = vmatpush1.bf16.msra.mxu1 %v3023_v18  ;;  %v3039_v39 = vld [vmem:[%s4992_s3 + $0x84] ss:$8 sps:$4 sm:$0xff]   ;;  %v123_v40 = vld [vmem:[%s4989_s0 + $0xb8] sm:$0xff]  ;;  %v122_v41 = vld [vmem:[%s4989_s0 + $0xb0] sm:$0xff] }
  0x57   :  { %170 = vperm.xlu1 %3014, %v107_v7   ;;  %165 = vperm.xlu0 %3013, %v106_v8   ;;  %v3041_v42 = vld [vmem:[%s4992_s3 + $0x80] ss:$8 sps:$4 sm:$0xff]   ;;  %v3042_v43 = vld [vmem:[%s4992_s3 + $0x94] ss:$8 sps:$4 sm:$0xff]   ;;  %v3044_v46 = vld [vmem:[%s4992_s3 + $0x90] ss:$8 sps:$4 sm:$0xff]  }
  0x58   :  { %750 = vmatprep.subr.bf16.mxu0 %v3024_v19  ;;  %2975 = vmatprep.subr.bf16.mxu1 %v3024_v19  ;;  %v125_v44 = vld [vmem:[%s4989_s0 + $0xc8] sm:$0xff]  ;;  %v124_v45 = vld [vmem:[%s4989_s0 + $0xc0] sm:$0xff]  ;;  %v127_v48 = vld [vmem:[%s4989_s0 + $0xd8] sm:$0xff] }
  0x59   :  { %v3045_v47 = vld [vmem:[%s4992_s3 + $0xa4] ss:$8 sps:$4 sm:$0xff]   ;;  %v126_v49 = vld [vmem:[%s4989_s0 + $0xd0] sm:$0xff]  ;;  %v3047_v50 = vld [vmem:[%s4992_s3 + $0xa0] ss:$8 sps:$4 sm:$0xff]  }
  0x5a   :  { %751 = vmatpush1.bf16.msra.mxu0 %v3026_v22  ;;  %2991 = vmatpush1.bf16.msra.mxu1 %v3026_v22  ;;  %v3048_v51 = vld [vmem:[%s4992_s3 + $0xb4] ss:$8 sps:$4 sm:$0xff]   ;;  %v129_v52 = vld [vmem:[%s4989_s0 + $0xe8] sm:$0xff]  ;;  %v128_v53 = vld [vmem:[%s4989_s0 + $0xe0] sm:$0xff] }
  0x5b   :  { %180 = vperm.xlu1 %3014, %v109_v12   ;;  %175 = vperm.xlu0 %3013, %v108_v13   ;;  %v3050_v54 = vld [vmem:[%s4992_s3 + $0xb0] ss:$8 sps:$4 sm:$0xff]   ;;  %v3051_v55 = vld [vmem:[%s4992_s3 + $0xc4] ss:$8 sps:$4 sm:$0xff]   ;;  %v3053_v58 = vld [vmem:[%s4992_s3 + $0xc0] ss:$8 sps:$4 sm:$0xff]  }
  0x5c   :  { %752 = vmatprep.subr.bf16.mxu0 %v3027_v23  ;;  %2976 = vmatprep.subr.bf16.mxu1 %v3027_v23  ;;  %v131_v56 = vld [vmem:[%s4989_s0 + $0xf8] sm:$0xff]  ;;  %v130_v57 = vld [vmem:[%s4989_s0 + $0xf0] sm:$0xff]  ;;  %v3057_v61 = vld [vmem:[%s4992_s3 + $0xe4] ss:$8 sps:$4 sm:$0xff]  }
  0x5d   :  { %v3054_v59 = vld [vmem:[%s4992_s3 + $0xd4] ss:$8 sps:$4 sm:$0xff]   ;;  %v3056_v60 = vld [vmem:[%s4992_s3 + $0xd0] ss:$8 sps:$4 sm:$0xff]   ;;  %v3059_v62 = vld [vmem:[%s4992_s3 + $0xe0] ss:$8 sps:$4 sm:$0xff]  }
  0x5e   :  { %753 = vmatpush1.bf16.msra.mxu0 %v3029_v26  ;;  %2992 = vmatpush1.bf16.msra.mxu1 %v3029_v26  ;;  %v3060_v63 = vld [vmem:[%s4992_s3 + $0xf4] ss:$8 sps:$4 sm:$0xff]   ;;  %v3062_v0 = vld [vmem:[%s4992_s3 + $0xf0] ss:$8 sps:$4 sm:$0xff]   ;;  %v3065_v1 = vld [vmem:[#allocation2 + $0x4] ss:$8 sps:$4 sm:$0xff]  }
  0x5f   :  { %190 = vperm.xlu1 %3014, %v111_v16   ;;  %185 = vperm.xlu0 %3013, %v110_v17   ;;  %v132_v5 = vld [vmem:[%s4990_s1] sm:$0x3] }
  0x60   :  { %754 = vmatprep.subr.bf16.mxu0 %v3030_v27  ;;  %2977 = vmatprep.subr.bf16.mxu1 %v3030_v27  ;;  %v4318_v7 = vrot.slane %v132_v5, %v4310_v4  ;;  %v368_v8 = vld [vmem:[%s4991_s2] sm:$0x3]  ;;  %v4324_v9 = vrot.slane %v132_v5, %v4315_v6 }
  0x61   :  { %v4327_v12 = vrot.slane %v368_v8, %v4310_v4  ;;  %v4332_v15 = vrot.slane %v368_v8, %v4315_v6 }
  0x62   :  { %755 = vmatpush1.bf16.msra.mxu0 %v3032_v30  ;;  %2993 = vmatpush1.bf16.msra.mxu1 %v3032_v30 }
  0x63   :  { %200 = vperm.xlu1 %3014, %v113_v20   ;;  %195 = vperm.xlu0 %3013, %v112_v21  }
  0x64   :  { %756 = vmatprep.subr.bf16.mxu0 %v3033_v33  ;;  %2978 = vmatprep.subr.bf16.mxu1 %v3033_v33 }
  0x66   :  { %757 = vmatpush1.bf16.msra.mxu0 %v3035_v34  ;;  %2994 = vmatpush1.bf16.msra.mxu1 %v3035_v34 }
  0x67   :  { %210 = vperm.xlu1 %3014, %v115_v24   ;;  %205 = vperm.xlu0 %3013, %v114_v25  }
  0x68   :  { %758 = vmatprep.subr.bf16.mxu0 %v3036_v35  ;;  %2979 = vmatprep.subr.bf16.mxu1 %v3036_v35 }
  0x6a   :  { %759 = vmatpush1.bf16.msra.mxu0 %v3038_v38  ;;  %2995 = vmatpush1.bf16.msra.mxu1 %v3038_v38 }
  0x6b   :  { %220 = vperm.xlu1 %3014, %v117_v28   ;;  %215 = vperm.xlu0 %3013, %v116_v29  }
  0x6c   :  { %760 = vmatprep.subr.bf16.mxu0 %v3039_v39  ;;  %2980 = vmatprep.subr.bf16.mxu1 %v3039_v39 }
  0x6e   :  { %761 = vmatpush1.bf16.msra.mxu0 %v3041_v42  ;;  %2996 = vmatpush1.bf16.msra.mxu1 %v3041_v42 }
  0x6f   :  { %230 = vperm.xlu1 %3014, %v119_v31   ;;  %225 = vperm.xlu0 %3013, %v118_v32  }
  0x70   :  { %762 = vmatprep.subr.bf16.mxu0 %v3042_v43  ;;  %2981 = vmatprep.subr.bf16.mxu1 %v3042_v43 }
  0x72   :  { %763 = vmatpush1.bf16.msra.mxu0 %v3044_v46  ;;  %2997 = vmatpush1.bf16.msra.mxu1 %v3044_v46 }
  0x73   :  { %240 = vperm.xlu1 %3014, %v121_v36   ;;  %235 = vperm.xlu0 %3013, %v120_v37  }
  0x74   :  { %764 = vmatprep.subr.bf16.mxu0 %v3045_v47  ;;  %2982 = vmatprep.subr.bf16.mxu1 %v3045_v47 }
  0x76   :  { %765 = vmatpush1.bf16.msra.mxu0 %v3047_v50  ;;  %2998 = vmatpush1.bf16.msra.mxu1 %v3047_v50 }
  0x77   :  { %250 = vperm.xlu1 %3014, %v123_v40   ;;  %245 = vperm.xlu0 %3013, %v122_v41  }
  0x78   :  { %766 = vmatprep.subr.bf16.mxu0 %v3048_v51  ;;  %2983 = vmatprep.subr.bf16.mxu1 %v3048_v51 }
  0x7a   :  { %767 = vmatpush1.bf16.msra.mxu0 %v3050_v54  ;;  %2999 = vmatpush1.bf16.msra.mxu1 %v3050_v54 }
  0x7b   :  { %260 = vperm.xlu1 %3014, %v125_v44   ;;  %255 = vperm.xlu0 %3013, %v124_v45  }
  0x7c   :  { %768 = vmatprep.subr.bf16.mxu0 %v3051_v55  ;;  %2984 = vmatprep.subr.bf16.mxu1 %v3051_v55 }
  0x7e   :  { %769 = vmatpush1.bf16.msra.mxu0 %v3053_v58  ;;  %3000 = vmatpush1.bf16.msra.mxu1 %v3053_v58 }
  0x7f   :  { %270 = vperm.xlu1 %3014, %v127_v48   ;;  %265 = vperm.xlu0 %3013, %v126_v49  }
  0x80   :  { %770 = vmatprep.subr.bf16.mxu0 %v3054_v59  ;;  %2985 = vmatprep.subr.bf16.mxu1 %v3054_v59 }
  0x82   :  { %771 = vmatpush1.bf16.msra.mxu0 %v3056_v60  ;;  %3001 = vmatpush1.bf16.msra.mxu1 %v3056_v60 }
  0x83   :  { %280 = vperm.xlu1 %3014, %v129_v52   ;;  %275 = vperm.xlu0 %3013, %v128_v53  }
  0x84   :  { %772 = vmatprep.subr.bf16.mxu0 %v3057_v61  ;;  %2986 = vmatprep.subr.bf16.mxu1 %v3057_v61 }
  0x86   :  { %773 = vmatpush1.bf16.msra.mxu0 %v3059_v62  ;;  %3002 = vmatpush1.bf16.msra.mxu1 %v3059_v62 }
  0x87   :  { %290 = vperm.xlu1 %3014, %v131_v56   ;;  %285 = vperm.xlu0 %3013, %v130_v57  }
  0x88   :  { %774 = vmatprep.subr.bf16.mxu0 %v3060_v63  ;;  %2987 = vmatprep.subr.bf16.mxu1 %v3060_v63 }
  0x8a   :  { %775 = vmatpush1.bf16.msra.mxu0 %v3062_v0  ;;  %3003 = vmatpush1.bf16.msra.mxu1 %v3062_v0 }
  0x8b   :  { %1237 = vmatprep.subr.bf16.mxu1 %v3065_v1 }
  0xca   :  { %v146_v10 = vpop.permute.xlu1 %145  ;;  %v136_v11 = vpop.permute.xlu0 %135 }
  0xcb   :  { %v309_v13 = vmul.f32 %v4324_v9, %v146_v10  ;;  %v304_v14 = vmul.f32 %v4318_v7, %v136_v11  ;;  %v305_v19 = vmul.f32 %v4324_v9, %v136_v11  ;;  %v308_v23 = vmul.f32 %v4318_v7, %v146_v10 }
  0xcd   :  { %v385_v16 = vadd.f32 %v4332_v15, %v309_v13  ;;  %v380_v20 = vadd.f32 %v4327_v12, %v304_v14  ;;  %v381_v31 = vadd.f32 %v4332_v15, %v305_v19  ;;  %v384_v34 = vadd.f32 %v4327_v12, %v308_v23 }
  0xce   :  { %v151_v17 = vpop.permute.xlu1 %150  ;;  %v141_v18 = vpop.permute.xlu0 %140 }
  0xcf   :  { %v311_v21 = vmul.f32 %v4324_v9, %v151_v17  ;;  %v306_v22 = vmul.f32 %v4318_v7, %v141_v18  ;;  %v307_v24 = vmul.f32 %v4324_v9, %v141_v18  ;;  %v310_v25 = vmul.f32 %v4318_v7, %v151_v17 }
  0xd0   :  { %3207 = vtanh.f32 %v385_v16 }
  0xd1   :  { %v387_v26 = vadd.f32 %v4332_v15, %v311_v21  ;;  %v382_v27 = vadd.f32 %v4327_v12, %v306_v22  ;;  %v383_v28 = vadd.f32 %v4332_v15, %v307_v24  ;;  %3209 = vtanh.f32 %v380_v20 }
  0xd2   :  { %v161_v29 = vpop.permute.xlu1 %160  ;;  %v156_v30 = vpop.permute.xlu0 %155  ;;  %v386_v36 = vadd.f32 %v4327_v12, %v310_v25 }
  0xd3   :  { %v314_v32 = vmul.f32 %v4318_v7, %v161_v29  ;;  %v315_v33 = vmul.f32 %v4324_v9, %v161_v29  ;;  %3211 = vtanh.f32 %v387_v26  ;;  %v312_v35 = vmul.f32 %v4318_v7, %v156_v30 }
  0xd4   :  { %3213 = vtanh.f32 %v382_v27  ;;  %v313_v37 = vmul.f32 %v4324_v9, %v156_v30 }
  0xd5   :  { %3215 = vtanh.f32 %v383_v28  ;;  %v390_v38 = vadd.f32 %v4327_v12, %v314_v32  ;;  %v391_v41 = vadd.f32 %v4332_v15, %v315_v33  ;;  %v388_v44 = vadd.f32 %v4327_v12, %v312_v35 }
  0xd6   :  { %v171_v39 = vpop.permute.xlu1 %170  ;;  %v166_v40 = vpop.permute.xlu0 %165  ;;  %3217 = vtanh.f32 %v381_v31  ;;  %v389_v46 = vadd.f32 %v4332_v15, %v313_v37 }
  0xd7   :  { %v318_v42 = vmul.f32 %v4318_v7, %v171_v39  ;;  %v319_v43 = vmul.f32 %v4324_v9, %v171_v39  ;;  %3219 = vtanh.f32 %v384_v34  ;;  %v316_v45 = vmul.f32 %v4318_v7, %v166_v40 }
  0xd8   :  { %3221 = vtanh.f32 %v386_v36  ;;  %v317_v47 = vmul.f32 %v4324_v9, %v166_v40 }
  0xd9   :  { %3223 = vtanh.f32 %v390_v38  ;;  %v394_v48 = vadd.f32 %v4327_v12, %v318_v42  ;;  %v395_v51 = vadd.f32 %v4332_v15, %v319_v43  ;;  %v392_v55 = vadd.f32 %v4327_v12, %v316_v45 }
  0xda   :  { %v181_v49 = vpop.permute.xlu1 %180  ;;  %v176_v50 = vpop.permute.xlu0 %175  ;;  %3225 = vtanh.f32 %v391_v41  ;;  %v393_v58 = vadd.f32 %v4332_v15, %v317_v47 }
  0xdb   :  { %v322_v52 = vmul.f32 %v4318_v7, %v181_v49  ;;  %v323_v53 = vmul.f32 %v4324_v9, %v181_v49  ;;  %v3208_v54 = vpop.eup %3207  ;;  %3227 = vtanh.f32 %v388_v44  ;;  %v320_v56 = vmul.f32 %v4318_v7, %v176_v50 }
  0xdc   :  { %v3210_v57 = vpop.eup %3209  ;;  %3229 = vtanh.f32 %v389_v46  ;;  %v321_v59 = vmul.f32 %v4324_v9, %v176_v50 }
  0xdd   :  { %v3212_v60 = vpop.eup %3211  ;;  %3231 = vtanh.f32 %v394_v48  ;;  %v398_v61 = vadd.f32 %v4327_v12, %v322_v52  ;;  %v399_v1 = vadd.f32 %v4332_v15, %v323_v53  ;;  %v396_v8 = vadd.f32 %v4327_v12, %v320_v56 }
  0xde   :  { %v191_v62 = vpop.permute.xlu1 %190  ;;  %v186_v63 = vpop.permute.xlu0 %185  ;;  %3233 = vtanh.f32 %v395_v51  ;;  %v397_v13 = vadd.f32 %v4332_v15, %v321_v59  ;;  %v511_v22 = vpack.c.bf16 %v3212_v60, %v3208_v54 }
  0xdf   :  { %v3214_v0 = vpop.eup %3213  ;;  %v326_v2 = vmul.f32 %v4318_v7, %v191_v62  ;;  %v327_v3 = vmul.f32 %v4324_v9, %v191_v62  ;;  %3235 = vtanh.f32 %v392_v55  ;;  %v324_v10 = vmul.f32 %v4318_v7, %v186_v63 }
  0xe0   :  { %v3216_v5 = vpop.eup %3215  ;;  %3237 = vtanh.f32 %v393_v58  ;;  %v325_v14 = vmul.f32 %v4324_v9, %v186_v63  ;;  %v508_v16 = vpack.c.bf16 %v3214_v0, %v3210_v57 }
  0xe1   :  { %v3218_v11 = vpop.eup %3217  ;;  %3239 = vtanh.f32 %v398_v61  ;;  %v402_v18 = vadd.f32 %v4327_v12, %v326_v2  ;;  %v403_v24 = vadd.f32 %v4332_v15, %v327_v3  ;;  %v400_v27 = vadd.f32 %v4327_v12, %v324_v10 }
  0xe2   :  { %v3220_v17 = vpop.eup %3219  ;;  %v509_v19 = vpack.c.bf16 %v3216_v5, %v3218_v11  ;;  %v201_v20 = vpop.permute.xlu1 %200  ;;  %3241 = vtanh.f32 %v399_v1  ;;  %v401_v30 = vadd.f32 %v4332_v15, %v325_v14 }
  0xe3   :  { %v196_v21 = vpop.permute.xlu0 %195  ;;  %v3222_v23 = vpop.eup %3221  ;;  %v330_v25 = vmul.f32 %v4318_v7, %v201_v20  ;;  %3243 = vtanh.f32 %v396_v8  ;;  %v331_v28 = vmul.f32 %v4324_v9, %v201_v20 }
  0xe4   :  { %v4379_v26 = vpop.eup %3223  ;;  %776 = vmatprep.mubr.bf16.mxu0 %v509_v19  ;;  %3245 = vtanh.f32 %v397_v13  ;;  %v328_v31 = vmul.f32 %v4318_v7, %v196_v21  ;;  %v329_v34 = vmul.f32 %v4324_v9, %v196_v21  ;;  %v510_v44 = vpack.c.bf16 %v3222_v23, %v3220_v17 }
  0xe5   :  { %v3226_v29 = vpop.eup %3225  ;;  %777 = vmatmul.mubr.bf16.vlgmr.msra.gmra.mrb[0].mxu0 %v508_v16  ;;  %3247 = vtanh.f32 %v402_v18  ;;  %v406_v33 = vadd.f32 %v4327_v12, %v330_v25  ;;  %v407_v39 = vadd.f32 %v4332_v15, %v331_v28 }
  0xe6   :  { %v4385_v32 = vpop.eup %3227  ;;  %786 = vmatprep.mubr.bf16.mxu0 %v511_v22  ;;  %v211_v35 = vpop.permute.xlu1 %210  ;;  %3249 = vtanh.f32 %v403_v24  ;;  %v404_v41 = vadd.f32 %v4327_v12, %v328_v31  ;;  %v405_v43 = vadd.f32 %v4332_v15, %v329_v34 }
  0xe7   :  { %v206_v36 = vpop.permute.xlu0 %205  ;;  %v3230_v37 = vpop.eup %3229  ;;  %3251 = vtanh.f32 %v400_v27  ;;  %v334_v48 = vmul.f32 %v4318_v7, %v211_v35  ;;  %v335_v53 = vmul.f32 %v4324_v9, %v211_v35  ;;  %v512_v19 = vpack.c.bf16 %v4379_v26, %v4385_v32 }
  0xe8   :  { %v4389_v38 = vpop.eup %3231  ;;  %3253 = vtanh.f32 %v401_v30  ;;  %v513_v54 = vpack.c.bf16 %v3226_v29, %v3230_v37  ;;  %v332_v2 = vmul.f32 %v4318_v7, %v206_v36  ;;  %v333_v23 = vmul.f32 %v4324_v9, %v206_v36 }
  0xe9   :  { %v4392_v40 = vpop.eup %3233  ;;  %3255 = vtanh.f32 %v406_v33  ;;  %v410_v1 = vadd.f32 %v4327_v12, %v334_v48  ;;  %v411_v8 = vadd.f32 %v4332_v15, %v335_v53 }
  0xea   :  { %v4395_v42 = vpop.eup %3235  ;;  %v221_v45 = vpop.permute.xlu1 %220  ;;  %3257 = vtanh.f32 %v407_v39  ;;  %v408_v24 = vadd.f32 %v4327_v12, %v332_v2 }
  0xeb   :  { %v216_v46 = vpop.permute.xlu0 %215  ;;  %v3238_v47 = vpop.eup %3237  ;;  %v338_v49 = vmul.f32 %v4318_v7, %v221_v45  ;;  %v339_v50 = vmul.f32 %v4324_v9, %v221_v45  ;;  %3259 = vtanh.f32 %v404_v41 }
  0xec   :  { %v336_v51 = vmul.f32 %v4318_v7, %v216_v46  ;;  %v4402_v52 = vpop.eup %3239  ;;  %v337_v55 = vmul.f32 %v4324_v9, %v216_v46  ;;  %3261 = vtanh.f32 %v405_v43  ;;  %v515_v29 = vpack.c.bf16 %v4392_v40, %v3238_v47 }
  0xed   :  { %v4406_v56 = vpop.eup %3241  ;;  %787 = vmatmul.mubr.bf16.gmra.mrb[4].mxu0 %v510_v44  ;;  %v414_v57 = vadd.f32 %v4327_v12, %v338_v49  ;;  %v415_v58 = vadd.f32 %v4332_v15, %v339_v50  ;;  %v409_v43 = vadd.f32 %v4332_v15, %v333_v23 }
  0xee   :  { %v412_v59 = vadd.f32 %v4327_v12, %v336_v51  ;;  %v4411_v60 = vpop.eup %3243  ;;  %796 = vmatprep.mubr.bf16.mxu0 %v513_v54  ;;  %v413_v61 = vadd.f32 %v4332_v15, %v337_v55  ;;  %v231_v62 = vpop.permute.xlu1 %230 }
  0xef   :  { %v226_v63 = vpop.permute.xlu0 %225  ;;  %v4414_v0 = vpop.eup %3245  ;;  %3263 = vtanh.f32 %v414_v57  ;;  %v343_v3 = vmul.f32 %v4324_v9, %v231_v62  ;;  %v342_v10 = vmul.f32 %v4318_v7, %v231_v62  ;;  %v514_v57 = vpack.c.bf16 %v4389_v38, %v4395_v42 }
  0xf0   :  { %v4419_v5 = vpop.eup %3247  ;;  %3265 = vtanh.f32 %v415_v58  ;;  %v341_v11 = vmul.f32 %v4324_v9, %v226_v63  ;;  %v340_v16 = vmul.f32 %v4318_v7, %v226_v63  ;;  %v517_v62 = vpack.c.bf16 %v4406_v56, %v4414_v0  ;;  %v3063_v0 = vld [vmem:[#allocation2] ss:$8 sps:$4 sm:$0xff]  }
  0xf1   :  { %v4424_v13 = vpop.eup %3249  ;;  %3267 = vtanh.f32 %v412_v59  ;;  %v419_v14 = vadd.f32 %v4332_v15, %v343_v3  ;;  %v418_v28 = vadd.f32 %v4327_v12, %v342_v10 }
  0xf2   :  { %v4428_v17 = vpop.eup %3251  ;;  %3269 = vtanh.f32 %v413_v61  ;;  %v417_v18 = vadd.f32 %v4332_v15, %v341_v11  ;;  %v241_v20 = vpop.permute.xlu1 %240  ;;  %v416_v30 = vadd.f32 %v4327_v12, %v340_v16 }
  0xf3   :  { %v236_v21 = vpop.permute.xlu0 %235  ;;  %v4433_v22 = vpop.eup %3253  ;;  %3271 = vtanh.f32 %v410_v1  ;;  %v347_v25 = vmul.f32 %v4324_v9, %v241_v20  ;;  %v346_v31 = vmul.f32 %v4318_v7, %v241_v20 }
  0xf4   :  { %v4438_v27 = vpop.eup %3255  ;;  %3273 = vtanh.f32 %v411_v8  ;;  %v345_v26 = vmul.f32 %v4324_v9, %v236_v21  ;;  %v344_v34 = vmul.f32 %v4318_v7, %v236_v21 }
  0xf5   :  { %3275 = vtanh.f32 %v419_v14  ;;  %797 = vmatmul.mubr.bf16.gmra.mrb[8].mxu0 %v512_v19  ;;  %v4445_v32 = vpop.eup %3257  ;;  %v423_v33 = vadd.f32 %v4332_v15, %v347_v25  ;;  %v422_v46 = vadd.f32 %v4327_v12, %v346_v31 }
  0xf6   :  { %3277 = vtanh.f32 %v417_v18  ;;  %806 = vmatprep.mubr.bf16.mxu0 %v515_v29  ;;  %v251_v35 = vpop.permute.xlu1 %250  ;;  %v4449_v37 = vpop.eup %3259  ;;  %v421_v39 = vadd.f32 %v4332_v15, %v345_v26  ;;  %v420_v49 = vadd.f32 %v4327_v12, %v344_v34  ;;  %v3068_v18 = vld [vmem:[#allocation2 + $0x14] ss:$8 sps:$4 sm:$0xff]   ;;  %v516_v26 = vpack.c.bf16 %v4402_v52, %v4411_v60 }
  0xf7   :  { %v246_v36 = vpop.permute.xlu0 %245  ;;  %3279 = vtanh.f32 %v408_v24  ;;  %v350_v40 = vmul.f32 %v4318_v7, %v251_v35  ;;  %v4453_v41 = vpop.eup %3261  ;;  %v351_v44 = vmul.f32 %v4324_v9, %v251_v35  ;;  %v519_v52 = vpack.c.bf16 %v4424_v13, %v4433_v22 }
  0xf8   :  { %3281 = vtanh.f32 %v418_v28  ;;  %v348_v47 = vmul.f32 %v4318_v7, %v246_v36  ;;  %v349_v50 = vmul.f32 %v4324_v9, %v246_v36 }
  0xf9   :  { %v3264_v45 = vpop.eup %3263  ;;  %3283 = vtanh.f32 %v416_v30  ;;  %v426_v55 = vadd.f32 %v4327_v12, %v350_v40  ;;  %v427_v59 = vadd.f32 %v4332_v15, %v351_v44  ;;  %v3071_v40 = vld [vmem:[#allocation2 + $0x24] ss:$8 sps:$4 sm:$0xff]  }
  0xfa   :  { %v3266_v48 = vpop.eup %3265  ;;  %3285 = vtanh.f32 %v423_v33  ;;  %v4461_v51 = vpop.permute.xlu1 %260  ;;  %v424_v1 = vadd.f32 %v4327_v12, %v348_v47  ;;  %v425_v38 = vadd.f32 %v4332_v15, %v349_v50  ;;  %v3066_v33 = vld [vmem:[#allocation2 + $0x10] ss:$8 sps:$4 sm:$0xff]  }
  0xfb   :  { %v4463_v53 = vpop.permute.xlu0 %255  ;;  %v3268_v54 = vpop.eup %3267  ;;  %3287 = vtanh.f32 %v421_v39  ;;  %v355_v61 = vmul.f32 %v4324_v9, %v4461_v51 }
  0xfc   :  { %v3270_v58 = vpop.eup %3269  ;;  %3289 = vtanh.f32 %v409_v43  ;;  %v524_v2 = vpack.c.bf16 %v3264_v45, %v3268_v54  ;;  %v353_v42 = vmul.f32 %v4324_v9, %v4463_v53 }
  0xfd   :  { %v4473_v63 = vpop.eup %3271  ;;  %3291 = vtanh.f32 %v422_v46  ;;  %807 = vmatmul.mubr.bf16.gmra.mrb[12].mxu0 %v514_v57  ;;  %v525_v8 = vpack.c.bf16 %v3266_v48, %v3270_v58  ;;  %v431_v20 = vadd.f32 %v4332_v15, %v355_v61 }
  0xfe   :  { %v4476_v3 = vpop.eup %3273  ;;  %3293 = vtanh.f32 %v420_v49  ;;  %816 = vmatprep.mubr.bf16.mxu0 %v517_v62  ;;  %v4481_v10 = vpop.permute.xlu1 %270  ;;  %v429_v28 = vadd.f32 %v4332_v15, %v353_v42  ;;  %v354_v49 = vmul.f32 %v4318_v7, %v4461_v51  ;;  %v3074_v62 = vld [vmem:[#allocation2 + $0x34] ss:$8 sps:$4 sm:$0xff]  }
  0xff   :  { %v4483_v56 = vpop.permute.xlu0 %265  ;;  %v3276_v11 = vpop.eup %3275  ;;  %3295 = vtanh.f32 %v426_v55  ;;  %v358_v14 = vmul.f32 %v4318_v7, %v4481_v10  ;;  %856 = vmatprep.mubr.bf16.mxu1 %v525_v8  ;;  %v3069_v55 = vld [vmem:[#allocation2 + $0x20] ss:$8 sps:$4 sm:$0xff]  }
 0x100   :  { %v356_v16 = vmul.f32 %v4318_v7, %v4483_v56  ;;  %v3278_v19 = vpop.eup %3277  ;;  %3297 = vtanh.f32 %v427_v59  ;;  %857 = vmatmul.mubr.bf16.vlgmr.msra.gmra.mrb[0].mxu1 %v524_v2 }
 0x101   :  { %v4490_v21 = vpop.eup %3279  ;;  %3299 = vtanh.f32 %v424_v1  ;;  %v434_v23 = vadd.f32 %v4327_v12, %v358_v14  ;;  %v527_v29 = vpack.c.bf16 %v3276_v11, %v3278_v19  ;;  %1238 = vmatpush1.bf16.msra.mxu1 %v3063_v0  ;;  %v352_v1 = vmul.f32 %v4318_v7, %v4463_v53  ;;  %v3072_v53 = vld [vmem:[#allocation2 + $0x30] ss:$8 sps:$4 sm:$0xff]  }
 0x102   :  { %v432_v24 = vadd.f32 %v4327_v12, %v356_v16  ;;  %v3282_v25 = vpop.eup %3281  ;;  %3301 = vtanh.f32 %v425_v38  ;;  %v281_v30 = vpop.permute.xlu1 %280  ;;  %1239 = vmatprep.subr.bf16.mxu1 %v3068_v18  ;;  %v359_v16 = vmul.f32 %v4324_v9, %v4481_v10  ;;  %v357_v19 = vmul.f32 %v4324_v9, %v4483_v56 }
 0x103   :  { %v276_v31 = vpop.permute.xlu0 %275  ;;  %v3284_v34 = vpop.eup %3283  ;;  %3303 = vtanh.f32 %v434_v23  ;;  %v362_v35 = vmul.f32 %v4318_v7, %v281_v30  ;;  %v363_v36 = vmul.f32 %v4324_v9, %v281_v30  ;;  %866 = vmatprep.mubr.bf16.mxu1 %v527_v29  ;;  %v3077_v23 = vld [vmem:[#allocation2 + $0x44] ss:$8 sps:$4 sm:$0xff]   ;;  %v521_v10 = vpack.c.bf16 %v4445_v32, %v4453_v41  ;;  %v3080_v32 = vld [vmem:[#allocation2 + $0x54] ss:$8 sps:$4 sm:$0xff]  }
 0x104   :  { %v360_v39 = vmul.f32 %v4318_v7, %v276_v31  ;;  %v3286_v43 = vpop.eup %3285  ;;  %3305 = vtanh.f32 %v431_v20  ;;  %v361_v60 = vmul.f32 %v4324_v9, %v276_v31  ;;  %v526_v22 = vpack.c.bf16 %v3282_v25, %v3284_v34 }
 0x105   :  { %v3288_v44 = vpop.eup %3287  ;;  %3307 = vtanh.f32 %v432_v24  ;;  %817 = vmatmul.mubr.bf16.gmra.mrb[16].mxu0 %v516_v26  ;;  %v438_v45 = vadd.f32 %v4327_v12, %v362_v35  ;;  %v439_v46 = vadd.f32 %v4332_v15, %v363_v36  ;;  %1240 = vmatpush1.bf16.msra.mxu1 %v3066_v33  ;;  %v518_v20 = vpack.c.bf16 %v4419_v5, %v4428_v17  ;;  %v3075_v5 = vld [vmem:[#allocation2 + $0x40] ss:$8 sps:$4 sm:$0xff]   ;;  %v3078_v35 = vld [vmem:[#allocation2 + $0x50] ss:$8 sps:$4 sm:$0xff]  }
 0x106   :  { %v436_v47 = vadd.f32 %v4327_v12, %v360_v39  ;;  %v4506_v48 = vpop.eup %3289  ;;  %3309 = vtanh.f32 %v429_v28  ;;  %826 = vmatprep.mubr.bf16.mxu0 %v519_v52  ;;  %v437_v13 = vadd.f32 %v4332_v15, %v361_v60  ;;  %v291_v50 = vpop.permute.xlu1 %290  ;;  %1241 = vmatprep.subr.bf16.mxu1 %v3071_v40  ;;  %v529_v2 = vpack.c.bf16 %v3286_v43, %v3288_v44  ;;  %v3083_v39 = vld [vmem:[#allocation2 + $0x64] ss:$8 sps:$4 sm:$0xff]  }
 0x107   :  { %v286_v54 = vpop.permute.xlu0 %285  ;;  %v3292_v57 = vpop.eup %3291  ;;  %3311 = vtanh.f32 %v438_v45  ;;  %v366_v58 = vmul.f32 %v4318_v7, %v291_v50  ;;  %v367_v59 = vmul.f32 %v4324_v9, %v291_v50  ;;  %v430_v25 = vadd.f32 %v4327_v12, %v354_v49 }
 0x108   :  { %v364_v61 = vmul.f32 %v4318_v7, %v286_v54  ;;  %v3294_v51 = vpop.eup %3293  ;;  %3313 = vtanh.f32 %v439_v46  ;;  %v365_v38 = vmul.f32 %v4324_v9, %v286_v54  ;;  %867 = vmatmul.mubr.bf16.gmra.mrb[4].mxu1 %v526_v22  ;;  %v428_v29 = vadd.f32 %v4327_v12, %v352_v1  ;;  %v3081_v46 = vld [vmem:[#allocation2 + $0x60] ss:$8 sps:$4 sm:$0xff]  }
 0x109   :  { %v4517_v42 = vpop.eup %3295  ;;  %3315 = vtanh.f32 %v436_v47  ;;  %v442_v8 = vadd.f32 %v4327_v12, %v366_v58  ;;  %v443_v0 = vadd.f32 %v4332_v15, %v367_v59  ;;  %876 = vmatprep.mubr.bf16.mxu1 %v529_v2  ;;  %1242 = vmatpush1.bf16.msra.mxu1 %v3069_v55  ;;  %v435_v56 = vadd.f32 %v4332_v15, %v359_v16  ;;  %v3090_v2 = vld [vmem:[#allocation2 + $0x90] ss:$8 sps:$4 sm:$0xff]   ;;  %v3107_v16 = vld [vmem:[#allocation2 + $0xe4] ss:$8 sps:$4 sm:$0xff]  }
 0x10a   :  { %v440_v11 = vadd.f32 %v4327_v12, %v364_v61  ;;  %v3298_v14 = vpop.eup %3297  ;;  %3317 = vtanh.f32 %v437_v13  ;;  %v441_v7 = vadd.f32 %v4332_v15, %v365_v38  ;;  %1243 = vmatprep.subr.bf16.mxu1 %v3074_v62  ;;  %v433_v26 = vadd.f32 %v4332_v15, %v357_v19  ;;  %v3087_v61 = vld [vmem:[#allocation2 + $0x80] ss:$8 sps:$4 sm:$0xff]   ;;  %v3095_v38 = vld [vmem:[#allocation2 + $0xa4] ss:$8 sps:$4 sm:$0xff]  }
 0x10b   :  { %v3300_v18 = vpop.eup %3299  ;;  %3319 = vtanh.f32 %v442_v8  ;;  %v528_v30 = vpack.c.bf16 %v3292_v57, %v3294_v51  ;;  %v520_v15 = vpack.c.bf16 %v4438_v27, %v4449_v37  ;;  %v523_v43 = vpack.c.bf16 %v4476_v3, %v4506_v48  ;;  %v3086_v27 = vld [vmem:[#allocation2 + $0x74] ss:$8 sps:$4 sm:$0xff]   ;;  %v3084_v48 = vld [vmem:[#allocation2 + $0x70] ss:$8 sps:$4 sm:$0xff]   ;;  %v3089_v57 = vld [vmem:[#allocation2 + $0x84] ss:$8 sps:$4 sm:$0xff]  }
 0x10c   :  { %v3302_v24 = vpop.eup %3301  ;;  %3321 = vtanh.f32 %v443_v0  ;;  %v530_v49 = vpack.c.bf16 %v4517_v42, %v3300_v18  ;;  %v522_v55 = vpack.c.bf16 %v4473_v63, %v4490_v21  ;;  %v3092_v51 = vld [vmem:[#allocation2 + $0x94] ss:$8 sps:$4 sm:$0xff]   ;;  %v3093_v42 = vld [vmem:[#allocation2 + $0xa0] ss:$8 sps:$4 sm:$0xff]   ;;  %v3096_v21 = vld [vmem:[#allocation2 + $0xb0] ss:$8 sps:$4 sm:$0xff]  }
 0x10d   :  { %v4532_v28 = vpop.eup %3303  ;;  %3323 = vtanh.f32 %v440_v11  ;;  %827 = vmatmul.mubr.bf16.gmra.mrb[20].mxu0 %v518_v20  ;;  %1244 = vmatpush1.bf16.msra.mxu1 %v3072_v53  ;;  %v531_v31 = vpack.c.bf16 %v3298_v14, %v3302_v24  ;;  %v3098_v63 = vld [vmem:[#allocation2 + $0xb4] ss:$8 sps:$4 sm:$0xff]   ;;  %v3101_v8 = vld [vmem:[#allocation2 + $0xc4] ss:$8 sps:$4 sm:$0xff]   ;;  %v3099_v0 = vld [vmem:[#allocation2 + $0xc0] ss:$8 sps:$4 sm:$0xff]  }
 0x10e   :  { %v3306_v9 = vpop.eup %3305  ;;  %3325 = vtanh.f32 %v441_v7  ;;  %836 = vmatprep.mubr.bf16.mxu0 %v521_v10  ;;  %1245 = vmatprep.subr.bf16.mxu1 %v3077_v23  ;;  %v3102_v11 = vld [vmem:[#allocation2 + $0xd0] ss:$8 sps:$4 sm:$0xff]   ;;  %v3104_v14 = vld [vmem:[#allocation2 + $0xd4] ss:$8 sps:$4 sm:$0xff]   ;;  %v3105_v7 = vld [vmem:[#allocation2 + $0xe0] ss:$8 sps:$4 sm:$0xff]  }
 0x10f   :  { %v4536_v17 = vpop.eup %3307  ;;  %3327 = vtanh.f32 %v430_v25  ;;  %v3108_v53 = vld [vmem:[#allocation2 + $0xf0] ss:$8 sps:$4 sm:$0xff]   ;;  %v3110_v18 = vld [vmem:[#allocation2 + $0xf4] ss:$8 sps:$4 sm:$0xff]   ;;  %v572_v19 = vld [vmem:[%s4993_s4] sm:$0x3] }
 0x110   :  { %v3310_v41 = vpop.eup %3309  ;;  %v534_v12 = vpack.c.bf16 %v4532_v28, %v4536_v17  ;;  %3329 = vtanh.f32 %v428_v29  ;;  %877 = vmatmul.mubr.bf16.gmra.mrb[8].mxu1 %v528_v30  ;;  %v4555_v20 = vrot.slane %v572_v19, %v4310_v4  ;;  %v4558_v23 = vrot.slane %v572_v19, %v4315_v6 }
 0x111   :  { %v4541_v33 = vpop.eup %3311  ;;  %3331 = vtanh.f32 %v435_v56  ;;  %886 = vmatprep.mubr.bf16.mxu1 %v531_v31  ;;  %1246 = vmatpush1.bf16.msra.mxu1 %v3075_v5  ;;  %v533_v13 = vpack.c.bf16 %v3306_v9, %v3310_v41 }
 0x112   :  { %v3314_v34 = vpop.eup %3313  ;;  %3333 = vtanh.f32 %v433_v26  ;;  %1247 = vmatprep.subr.bf16.mxu1 %v3080_v32 }
 0x113   :  { %v3316_v36 = vpop.eup %3315 }
 0x114   :  { %v3318_v40 = vpop.eup %3317  ;;  %v536_v52 = vpack.c.bf16 %v4541_v33, %v3316_v36 }
 0x115   :  { %v3320_v60 = vpop.eup %3319  ;;  %837 = vmatmul.mubr.bf16.gmra.mrb[24].mxu0 %v520_v15  ;;  %v537_v44 = vpack.c.bf16 %v3314_v34, %v3318_v40  ;;  %1248 = vmatpush1.bf16.msra.mxu1 %v3078_v35  ;;  %v3111_v34 = vld [vmem:[#allocation5] ss:$8 sps:$4 sm:$0xff]   ;;  %v3113_v35 = vld [vmem:[#allocation5 + $0x4] ss:$8 sps:$4 sm:$0xff]   ;;  %v3116_v15 = vld [vmem:[#allocation5 + $0x14] ss:$8 sps:$4 sm:$0xff]  }
 0x116   :  { %v3322_v45 = vpop.eup %3321  ;;  %846 = vmatprep.mubr.bf16.mxu0 %v523_v43  ;;  %1249 = vmatprep.subr.bf16.mxu1 %v3083_v39  ;;  %v3114_v43 = vld [vmem:[#allocation5 + $0x10] ss:$8 sps:$4 sm:$0xff]  }
 0x117   :  { %v3324_v47 = vpop.eup %3323  ;;  %1730 = vmatprep.subr.bf16.mxu0 %v3113_v35 }
 0x118   :  { %v3326_v37 = vpop.eup %3325  ;;  %v538_v22 = vpack.c.bf16 %v3320_v60, %v3324_v47  ;;  %887 = vmatmul.mubr.bf16.gmra.mrb[12].mxu1 %v530_v49  ;;  %1731 = vmatpush1.bf16.msra.mxu0 %v3111_v34 }
 0x119   :  { %v539_v50 = vpack.c.bf16 %v3322_v45, %v3326_v37  ;;  %v3328_v3 = vpop.eup %3327  ;;  %896 = vmatprep.mubr.bf16.mxu1 %v533_v13  ;;  %1250 = vmatpush1.bf16.msra.mxu1 %v3081_v46  ;;  %v3119_v45 = vld [vmem:[#allocation5 + $0x24] ss:$8 sps:$4 sm:$0xff]  }
 0x11a   :  { %v3330_v54 = vpop.eup %3329  ;;  %1251 = vmatprep.subr.bf16.mxu1 %v3086_v27  ;;  %1732 = vmatprep.subr.bf16.mxu0 %v3116_v15 }
 0x11b   :  { %v3332_v58 = vpop.eup %3331  ;;  %v532_v62 = vpack.c.bf16 %v3328_v3, %v3330_v54 }
 0x11c   :  { %v3334_v59 = vpop.eup %3333  ;;  %1733 = vmatpush1.bf16.msra.mxu0 %v3114_v43 }
 0x11d   :  { %847 = vmatmul.mubr.bf16.gmra.mrb[28].mxu0 %v522_v55  ;;  %1252 = vmatpush1.bf16.msra.mxu1 %v3084_v48  ;;  %v535_v1 = vpack.c.bf16 %v3332_v58, %v3334_v59  ;;  %v3122_v48 = vld [vmem:[#allocation5 + $0x34] ss:$8 sps:$4 sm:$0xff]   ;;  %v3120_v58 = vld [vmem:[#allocation5 + $0x30] ss:$8 sps:$4 sm:$0xff]  }
 0x11e   :  { %1253 = vmatprep.subr.bf16.mxu1 %v3089_v57  ;;  %1734 = vmatprep.subr.bf16.mxu0 %v3119_v45 }
 0x120   :  { %897 = vmatmul.mubr.bf16.gmra.mrb[16].mxu1 %v532_v62 }
 0x121   :  { %906 = vmatprep.mubr.bf16.mxu1 %v535_v1  ;;  %1254 = vmatpush1.bf16.msra.mxu1 %v3087_v61 }
 0x122   :  { %1255 = vmatprep.subr.bf16.mxu1 %v3092_v51  ;;  %v3125_v51 = vld [vmem:[#allocation5 + $0x44] ss:$8 sps:$4 sm:$0xff]  }
 0x125   :  { %1256 = vmatpush1.bf16.msra.mxu1 %v3090_v2 }
 0x126   :  { %1257 = vmatprep.subr.bf16.mxu1 %v3095_v38 }
 0x128   :  { %907 = vmatmul.mubr.bf16.gmra.mrb[20].mxu1 %v534_v12 }
 0x129   :  { %916 = vmatprep.mubr.bf16.mxu1 %v537_v44  ;;  %1258 = vmatpush1.bf16.msra.mxu1 %v3093_v42 }
 0x12a   :  { %1259 = vmatprep.subr.bf16.mxu1 %v3098_v63 }
 0x12d   :  { %1260 = vmatpush1.bf16.msra.mxu1 %v3096_v21 }
 0x12e   :  { %1261 = vmatprep.subr.bf16.mxu1 %v3101_v8 }
 0x130   :  { %917 = vmatmul.mubr.bf16.gmra.mrb[24].mxu1 %v536_v52 }
 0x131   :  { %926 = vmatprep.mubr.bf16.mxu1 %v539_v50  ;;  %1262 = vmatpush1.bf16.msra.mxu1 %v3099_v0  ;;  %v3117_v50 = vld [vmem:[#allocation5 + $0x20] ss:$8 sps:$4 sm:$0xff]  }
 0x132   :  { %1263 = vmatprep.subr.bf16.mxu1 %v3104_v14  ;;  %1735 = vmatpush1.bf16.msra.mxu0 %v3117_v50  ;;  %v3123_v0 = vld [vmem:[#allocation5 + $0x40] ss:$8 sps:$4 sm:$0xff]  }
 0x133   :  { %1736 = vmatprep.subr.bf16.mxu0 %v3122_v48  ;;  %v3137_v48 = vld [vmem:[#allocation5 + $0x84] ss:$8 sps:$4 sm:$0xff]  }
 0x135   :  { %1264 = vmatpush1.bf16.msra.mxu1 %v3102_v11 }
 0x136   :  { %1265 = vmatprep.subr.bf16.mxu1 %v3107_v16  ;;  %1737 = vmatpush1.bf16.msra.mxu0 %v3120_v58  ;;  %v3128_v16 = vld [vmem:[#allocation5 + $0x54] ss:$8 sps:$4 sm:$0xff]  }
 0x137   :  { %1738 = vmatprep.subr.bf16.mxu0 %v3125_v51 }
 0x138   :  { %927 = vmatmul.mubr.bf16.gmra.mrb[28].mxu1 %v538_v22 }
 0x139   :  { %1266 = vmatpush1.bf16.msra.mxu1 %v3105_v7 }
 0x13a   :  { %1267 = vmatprep.subr.bf16.mxu1 %v3110_v18  ;;  %1739 = vmatpush1.bf16.msra.mxu0 %v3123_v0  ;;  %v3140_v0 = vld [vmem:[#allocation5 + $0x94] ss:$8 sps:$4 sm:$0xff]  }
 0x13b   :  { %1740 = vmatprep.subr.bf16.mxu0 %v3128_v16 }
 0x13d   :  { %1268 = vmatpush1.bf16.msra.mxu1 %v3108_v53 }
 0x1b8   :  { %v778_v24 = vpop.f32.mrb[0].mxu0 }
 0x1b9   :  { %v779_v25 = vadd.f32 %v778_v24, %v4555_v20  ;;  %v780_v10 = vpop.f32.mrb[1].mxu0 }
 0x1ba   :  { %v781_v28 = vadd.f32 %v780_v10, %v4558_v23  ;;  %v782_v29 = vpop.f32.mrb[2].mxu0 }
 0x1bb   :  { %3335 = vtanh.f32 %v779_v25  ;;  %v783_v9 = vadd.f32 %v782_v29, %v4555_v20  ;;  %v784_v56 = vpop.f32.mrb[3].mxu0 }
 0x1bc   :  { %3337 = vtanh.f32 %v781_v28  ;;  %v785_v5 = vadd.f32 %v784_v56, %v4558_v23 }
 0x1bd   :  { %3339 = vtanh.f32 %v783_v9  ;;  %v3126_v9 = vld [vmem:[#allocation5 + $0x50] ss:$8 sps:$4 sm:$0xff]  }
 0x1be   :  { %3341 = vtanh.f32 %v785_v5  ;;  %1741 = vmatpush1.bf16.msra.mxu0 %v3126_v9 }
 0x1c0   :  { %v788_v17 = vpop.f32.mrb[4].mxu0 }
 0x1c1   :  { %v789_v26 = vadd.f32 %v788_v17, %v4555_v20  ;;  %v790_v30 = vpop.f32.mrb[5].mxu0 }
 0x1c2   :  { %v791_v32 = vadd.f32 %v790_v30, %v4558_v23  ;;  %v792_v41 = vpop.f32.mrb[6].mxu0  ;;  %v3131_v30 = vld [vmem:[#allocation5 + $0x64] ss:$8 sps:$4 sm:$0xff]  }
 0x1c3   :  { %3343 = vtanh.f32 %v789_v26  ;;  %v793_v31 = vadd.f32 %v792_v41, %v4555_v20  ;;  %v794_v12 = vpop.f32.mrb[7].mxu0  ;;  %1742 = vmatprep.subr.bf16.mxu0 %v3131_v30 }
 0x1c4   :  { %3345 = vtanh.f32 %v791_v32  ;;  %v795_v33 = vadd.f32 %v794_v12, %v4558_v23 }
 0x1c5   :  { %v3336_v36 = vpop.eup %3335  ;;  %3347 = vtanh.f32 %v793_v31 }
 0x1c6   :  { %v3338_v39 = vpop.eup %3337  ;;  %3349 = vtanh.f32 %v795_v33 }
 0x1c7   :  { %v3340_v40 = vpop.eup %3339 }
 0x1c8   :  { %v3342_v52 = vpop.eup %3341  ;;  %v798_v60 = vpop.f32.mrb[8].mxu0  ;;  %v1001_v44 = vpack.c.bf16 %v3340_v40, %v3336_v36  ;;  %v3129_v36 = vld [vmem:[#allocation5 + $0x60] ss:$8 sps:$4 sm:$0xff]   ;;  %v3134_v40 = vld [vmem:[#allocation5 + $0x74] ss:$8 sps:$4 sm:$0xff]  }
 0x1c9   :  { %v799_v46 = vadd.f32 %v798_v60, %v4555_v20  ;;  %v800_v47 = vpop.f32.mrb[9].mxu0  ;;  %v1002_v49 = vpack.c.bf16 %v3342_v52, %v3338_v39  ;;  %1743 = vmatpush1.bf16.msra.mxu0 %v3129_v36 }
 0x1ca   :  { %v801_v27 = vadd.f32 %v800_v47, %v4558_v23  ;;  %v802_v37 = vpop.f32.mrb[10].mxu0  ;;  %1744 = vmatprep.subr.bf16.mxu0 %v3134_v40 }
 0x1cb   :  { %3351 = vtanh.f32 %v799_v46  ;;  %v803_v13 = vadd.f32 %v802_v37, %v4555_v20  ;;  %v804_v22 = vpop.f32.mrb[11].mxu0  ;;  %1269 = vmatprep.mubr.bf16.mxu1 %v1002_v49  ;;  %v3132_v37 = vld [vmem:[#allocation5 + $0x70] ss:$8 sps:$4 sm:$0xff]  }
 0x1cc   :  { %3353 = vtanh.f32 %v801_v27  ;;  %v805_v3 = vadd.f32 %v804_v22, %v4558_v23  ;;  %1270 = vmatmul.mubr.bf16.vlgmr.msra.gmra.mrb[32].mxu1 %v1001_v44 }
 0x1cd   :  { %v3344_v54 = vpop.eup %3343  ;;  %3355 = vtanh.f32 %v803_v13  ;;  %1745 = vmatpush1.bf16.msra.mxu0 %v3132_v37 }
 0x1ce   :  { %v3346_v55 = vpop.eup %3345  ;;  %3357 = vtanh.f32 %v805_v3  ;;  %1746 = vmatprep.subr.bf16.mxu0 %v3137_v48 }
 0x1cf   :  { %v3348_v57 = vpop.eup %3347 }
 0x1d0   :  { %v3350_v59 = vpop.eup %3349  ;;  %v808_v61 = vpop.f32.mrb[12].mxu0  ;;  %v1003_v62 = vpack.c.bf16 %v3348_v57, %v3344_v54 }
 0x1d1   :  { %v809_v1 = vadd.f32 %v808_v61, %v4555_v20  ;;  %v810_v2 = vpop.f32.mrb[13].mxu0  ;;  %v1004_v38 = vpack.c.bf16 %v3350_v59, %v3346_v55 }
 0x1d2   :  { %v811_v42 = vadd.f32 %v810_v2, %v4558_v23  ;;  %v812_v63 = vpop.f32.mrb[14].mxu0 }
 0x1d3   :  { %3359 = vtanh.f32 %v809_v1  ;;  %v813_v21 = vadd.f32 %v812_v63, %v4555_v20  ;;  %v814_v8 = vpop.f32.mrb[15].mxu0  ;;  %1279 = vmatprep.mubr.bf16.mxu1 %v1004_v38  ;;  %v858_v14 = vpop.f32.mrb[0].mxu1  ;;  %v3135_v38 = vld [vmem:[#allocation5 + $0x80] ss:$8 sps:$4 sm:$0xff]  }
 0x1d4   :  { %3361 = vtanh.f32 %v811_v42  ;;  %v815_v11 = vadd.f32 %v814_v8, %v4558_v23  ;;  %1280 = vmatmul.mubr.bf16.gmra.mrb[36].mxu1 %v1003_v62  ;;  %v859_v53 = vadd.f32 %v858_v14, %v4555_v20  ;;  %v860_v18 = vpop.f32.mrb[1].mxu1  ;;  %1747 = vmatpush1.bf16.msra.mxu0 %v3135_v38 }
 0x1d5   :  { %v3352_v7 = vpop.eup %3351  ;;  %3363 = vtanh.f32 %v813_v21  ;;  %v861_v24 = vadd.f32 %v860_v18, %v4558_v23  ;;  %v862_v25 = vpop.f32.mrb[2].mxu1  ;;  %1748 = vmatprep.subr.bf16.mxu0 %v3140_v0 }
 0x1d6   :  { %v3354_v19 = vpop.eup %3353  ;;  %3365 = vtanh.f32 %v815_v11  ;;  %v863_v28 = vadd.f32 %v862_v25, %v4555_v20  ;;  %v864_v29 = vpop.f32.mrb[3].mxu1 }
 0x1d7   :  { %v3356_v10 = vpop.eup %3355  ;;  %3367 = vtanh.f32 %v859_v53  ;;  %v865_v5 = vadd.f32 %v864_v29, %v4558_v23 }
 0x1d8   :  { %v3358_v56 = vpop.eup %3357  ;;  %3369 = vtanh.f32 %v861_v24  ;;  %v818_v17 = vpop.f32.mrb[16].mxu0  ;;  %v1005_v26 = vpack.c.bf16 %v3356_v10, %v3352_v7 }
 0x1d9   :  { %3371 = vtanh.f32 %v863_v28  ;;  %v819_v32 = vadd.f32 %v818_v17, %v4555_v20  ;;  %v820_v41 = vpop.f32.mrb[17].mxu0  ;;  %v1006_v31 = vpack.c.bf16 %v3358_v56, %v3354_v19  ;;  %v3138_v28 = vld [vmem:[#allocation5 + $0x90] ss:$8 sps:$4 sm:$0xff]   ;;  %v3143_v17 = vld [vmem:[#allocation5 + $0xa4] ss:$8 sps:$4 sm:$0xff]  }
 0x1da   :  { %3373 = vtanh.f32 %v865_v5  ;;  %v821_v12 = vadd.f32 %v820_v41, %v4558_v23  ;;  %v822_v33 = vpop.f32.mrb[18].mxu0  ;;  %1749 = vmatpush1.bf16.msra.mxu0 %v3138_v28 }
 0x1db   :  { %3375 = vtanh.f32 %v819_v32  ;;  %v823_v34 = vadd.f32 %v822_v33, %v4555_v20  ;;  %v824_v35 = vpop.f32.mrb[19].mxu0  ;;  %1289 = vmatprep.mubr.bf16.mxu1 %v1006_v31  ;;  %v868_v39 = vpop.f32.mrb[4].mxu1  ;;  %1750 = vmatprep.subr.bf16.mxu0 %v3143_v17 }
 0x1dc   :  { %3377 = vtanh.f32 %v821_v12  ;;  %v825_v15 = vadd.f32 %v824_v35, %v4558_v23  ;;  %1290 = vmatmul.mubr.bf16.gmra.mrb[40].mxu1 %v1005_v26  ;;  %v869_v52 = vadd.f32 %v868_v39, %v4555_v20  ;;  %v870_v60 = vpop.f32.mrb[5].mxu1 }
 0x1dd   :  { %v3360_v43 = vpop.eup %3359  ;;  %3379 = vtanh.f32 %v823_v34  ;;  %v871_v45 = vadd.f32 %v870_v60, %v4558_v23  ;;  %v872_v46 = vpop.f32.mrb[6].mxu1  ;;  %v3146_v60 = vld [vmem:[#allocation5 + $0xb4] ss:$8 sps:$4 sm:$0xff]  }
 0x1de   :  { %v3362_v44 = vpop.eup %3361  ;;  %3381 = vtanh.f32 %v825_v15  ;;  %v873_v49 = vadd.f32 %v872_v46, %v4555_v20  ;;  %v874_v27 = vpop.f32.mrb[7].mxu1  ;;  %v3141_v15 = vld [vmem:[#allocation5 + $0xa0] ss:$8 sps:$4 sm:$0xff]  }
 0x1df   :  { %v3364_v47 = vpop.eup %3363  ;;  %3383 = vtanh.f32 %v869_v52  ;;  %v875_v22 = vadd.f32 %v874_v27, %v4558_v23  ;;  %1751 = vmatpush1.bf16.msra.mxu0 %v3141_v15 }
 0x1e0   :  { %v3366_v13 = vpop.eup %3365  ;;  %3385 = vtanh.f32 %v871_v45  ;;  %v828_v50 = vpop.f32.mrb[20].mxu0  ;;  %v1007_v3 = vpack.c.bf16 %v3364_v47, %v3360_v43  ;;  %1752 = vmatprep.subr.bf16.mxu0 %v3146_v60 }
 0x1e1   :  { %v4588_v54 = vpop.eup %3367  ;;  %3387 = vtanh.f32 %v873_v49  ;;  %v829_v55 = vadd.f32 %v828_v50, %v4555_v20  ;;  %v830_v57 = vpop.f32.mrb[21].mxu0  ;;  %v1008_v58 = vpack.c.bf16 %v3366_v13, %v3362_v44 }
 0x1e2   :  { %v4591_v59 = vpop.eup %3369  ;;  %3389 = vtanh.f32 %v875_v22  ;;  %v831_v61 = vadd.f32 %v830_v57, %v4558_v23  ;;  %v832_v62 = vpop.f32.mrb[22].mxu0 }
 0x1e3   :  { %v4594_v51 = vpop.eup %3371  ;;  %3391 = vtanh.f32 %v829_v55  ;;  %v833_v1 = vadd.f32 %v832_v62, %v4555_v20  ;;  %v834_v2 = vpop.f32.mrb[23].mxu0  ;;  %1299 = vmatprep.mubr.bf16.mxu1 %v1008_v58 }
 0x1e4   :  { %v4597_v42 = vpop.eup %3373  ;;  %3393 = vtanh.f32 %v831_v61  ;;  %v835_v63 = vadd.f32 %v834_v2, %v4558_v23  ;;  %v878_v21 = vpop.f32.mrb[8].mxu1  ;;  %1300 = vmatmul.mubr.bf16.gmra.mrb[44].mxu1 %v1007_v3  ;;  %v1017_v8 = vpack.c.bf16 %v4594_v51, %v4588_v54  ;;  %v3144_v3 = vld [vmem:[#allocation5 + $0xb0] ss:$8 sps:$4 sm:$0xff]  }
 0x1e5   :  { %v3376_v11 = vpop.eup %3375  ;;  %3395 = vtanh.f32 %v833_v1  ;;  %v879_v14 = vadd.f32 %v878_v21, %v4555_v20  ;;  %v880_v16 = vpop.f32.mrb[9].mxu1  ;;  %v1018_v7 = vpack.c.bf16 %v4597_v42, %v4591_v59  ;;  %1753 = vmatpush1.bf16.msra.mxu0 %v3144_v3 }
 0x1e6   :  { %v3378_v53 = vpop.eup %3377  ;;  %3397 = vtanh.f32 %v835_v63  ;;  %v881_v18 = vadd.f32 %v880_v16, %v4558_v23  ;;  %v882_v19 = vpop.f32.mrb[10].mxu1 }
 0x1e7   :  { %v3380_v24 = vpop.eup %3379  ;;  %3399 = vtanh.f32 %v879_v14  ;;  %v883_v25 = vadd.f32 %v882_v19, %v4555_v20  ;;  %v884_v10 = vpop.f32.mrb[11].mxu1 }
 0x1e8   :  { %v3382_v29 = vpop.eup %3381  ;;  %3401 = vtanh.f32 %v881_v18  ;;  %v885_v9 = vadd.f32 %v884_v10, %v4558_v23  ;;  %v838_v56 = vpop.f32.mrb[24].mxu0  ;;  %v1009_v5 = vpack.c.bf16 %v3380_v24, %v3376_v11 }
 0x1e9   :  { %v4608_v26 = vpop.eup %3383  ;;  %3403 = vtanh.f32 %v883_v25  ;;  %v839_v30 = vadd.f32 %v838_v56, %v4555_v20  ;;  %v840_v32 = vpop.f32.mrb[25].mxu0  ;;  %v1010_v41 = vpack.c.bf16 %v3382_v29, %v3378_v53 }
 0x1ea   :  { %v4611_v31 = vpop.eup %3385  ;;  %3405 = vtanh.f32 %v885_v9  ;;  %v841_v12 = vadd.f32 %v840_v32, %v4558_v23  ;;  %v842_v33 = vpop.f32.mrb[26].mxu0 }
 0x1eb   :  { %v4614_v34 = vpop.eup %3387  ;;  %3407 = vtanh.f32 %v839_v30  ;;  %v843_v35 = vadd.f32 %v842_v33, %v4555_v20  ;;  %v844_v36 = vpop.f32.mrb[27].mxu0  ;;  %1309 = vmatprep.mubr.bf16.mxu1 %v1010_v41 }
 0x1ec   :  { %v4617_v39 = vpop.eup %3389  ;;  %3409 = vtanh.f32 %v841_v12  ;;  %v845_v40 = vadd.f32 %v844_v36, %v4558_v23  ;;  %v888_v43 = vpop.f32.mrb[12].mxu1  ;;  %1310 = vmatmul.mubr.bf16.gmra.mrb[48].mxu1 %v1009_v5  ;;  %v1019_v52 = vpack.c.bf16 %v4614_v34, %v4608_v26  ;;  %v3149_v34 = vld [vmem:[#allocation5 + $0xc4] ss:$8 sps:$4 sm:$0xff]  }
 0x1ed   :  { %v3392_v44 = vpop.eup %3391  ;;  %3411 = vtanh.f32 %v843_v35  ;;  %v889_v45 = vadd.f32 %v888_v43, %v4555_v20  ;;  %v890_v46 = vpop.f32.mrb[13].mxu1  ;;  %v1020_v47 = vpack.c.bf16 %v4617_v39, %v4611_v31  ;;  %1754 = vmatprep.subr.bf16.mxu0 %v3149_v34 }
 0x1ee   :  { %v3394_v49 = vpop.eup %3393  ;;  %3413 = vtanh.f32 %v845_v40  ;;  %v891_v27 = vadd.f32 %v890_v46, %v4558_v23  ;;  %v892_v37 = vpop.f32.mrb[14].mxu1 }
 0x1ef   :  { %v3396_v13 = vpop.eup %3395  ;;  %3415 = vtanh.f32 %v889_v45  ;;  %v893_v22 = vadd.f32 %v892_v37, %v4555_v20  ;;  %v894_v50 = vpop.f32.mrb[15].mxu1 }
 0x1f0   :  { %v3398_v48 = vpop.eup %3397  ;;  %3417 = vtanh.f32 %v891_v27  ;;  %v895_v55 = vadd.f32 %v894_v50, %v4558_v23  ;;  %v848_v57 = vpop.f32.mrb[28].mxu0  ;;  %v1011_v58 = vpack.c.bf16 %v3396_v13, %v3392_v44 }
 0x1f1   :  { %v4628_v61 = vpop.eup %3399  ;;  %3419 = vtanh.f32 %v893_v22  ;;  %v849_v62 = vadd.f32 %v848_v57, %v4555_v20  ;;  %v850_v1 = vpop.f32.mrb[29].mxu0  ;;  %v1012_v2 = vpack.c.bf16 %v3398_v48, %v3394_v49 }
 0x1f2   :  { %v4631_v38 = vpop.eup %3401  ;;  %3421 = vtanh.f32 %v895_v55  ;;  %v851_v63 = vadd.f32 %v850_v1, %v4558_v23  ;;  %v852_v21 = vpop.f32.mrb[30].mxu0 }
 0x1f3   :  { %v4634_v0 = vpop.eup %3403  ;;  %3423 = vtanh.f32 %v849_v62  ;;  %v853_v11 = vadd.f32 %v852_v21, %v4555_v20  ;;  %v854_v14 = vpop.f32.mrb[31].mxu0  ;;  %1319 = vmatprep.mubr.bf16.mxu1 %v1012_v2 }
 0x1f4   :  { %v4637_v16 = vpop.eup %3405  ;;  %3425 = vtanh.f32 %v851_v63  ;;  %v855_v53 = vadd.f32 %v854_v14, %v4558_v23  ;;  %v898_v18 = vpop.f32.mrb[16].mxu1  ;;  %1320 = vmatmul.mubr.bf16.gmra.mrb[52].mxu1 %v1011_v58  ;;  %v1021_v19 = vpack.c.bf16 %v4634_v0, %v4628_v61  ;;  %v3155_v61 = vld [vmem:[#allocation5 + $0xe4] ss:$8 sps:$4 sm:$0xff]   ;;  %v3153_v0 = vld [vmem:[#allocation5 + $0xe0] ss:$8 sps:$4 sm:$0xff]  }
 0x1f5   :  { %v3408_v24 = vpop.eup %3407  ;;  %3427 = vtanh.f32 %v853_v11  ;;  %v899_v25 = vadd.f32 %v898_v18, %v4555_v20  ;;  %v900_v10 = vpop.f32.mrb[17].mxu1  ;;  %v1022_v28 = vpack.c.bf16 %v4637_v16, %v4631_v38  ;;  %v3150_v38 = vld [vmem:[#allocation5 + $0xd0] ss:$8 sps:$4 sm:$0xff]   ;;  %v3152_v16 = vld [vmem:[#allocation5 + $0xd4] ss:$8 sps:$4 sm:$0xff]  }
 0x1f6   :  { %v3410_v29 = vpop.eup %3409  ;;  %3429 = vtanh.f32 %v855_v53  ;;  %v901_v9 = vadd.f32 %v900_v10, %v4558_v23  ;;  %v902_v56 = vpop.f32.mrb[18].mxu1 }
 0x1f7   :  { %v3412_v5 = vpop.eup %3411  ;;  %3431 = vtanh.f32 %v899_v25  ;;  %v903_v17 = vadd.f32 %v902_v56, %v4555_v20  ;;  %v904_v30 = vpop.f32.mrb[19].mxu1 }
 0x1f8   :  { %v3414_v32 = vpop.eup %3413  ;;  %3433 = vtanh.f32 %v901_v9  ;;  %v905_v41 = vadd.f32 %v904_v30, %v4558_v23  ;;  %v1013_v12 = vpack.c.bf16 %v3412_v5, %v3408_v24 }
 0x1f9   :  { %v4648_v33 = vpop.eup %3415  ;;  %3435 = vtanh.f32 %v903_v17  ;;  %v1014_v35 = vpack.c.bf16 %v3414_v32, %v3410_v29 }
 0x1fa   :  { %v4650_v36 = vpop.eup %3417  ;;  %3437 = vtanh.f32 %v905_v41 }
 0x1fb   :  { %v4652_v15 = vpop.eup %3419  ;;  %1329 = vmatprep.mubr.bf16.mxu1 %v1014_v35  ;;  %v908_v43 = vpop.f32.mrb[20].mxu1 }
 0x1fc   :  { %v4654_v40 = vpop.eup %3421  ;;  %1330 = vmatmul.mubr.bf16.gmra.mrb[56].mxu1 %v1013_v12  ;;  %v1023_v60 = vpack.c.bf16 %v4652_v15, %v4648_v33  ;;  %v909_v45 = vadd.f32 %v908_v43, %v4555_v20  ;;  %v910_v46 = vpop.f32.mrb[21].mxu1  ;;  %v1065_v33 = vld [vmem:[%s4995_s6] sm:$0x3] }
 0x1fd   :  { %v3424_v44 = vpop.eup %3423  ;;  %v1024_v49 = vpack.c.bf16 %v4654_v40, %v4650_v36  ;;  %v911_v37 = vadd.f32 %v910_v46, %v4558_v23  ;;  %v912_v13 = vpop.f32.mrb[22].mxu1  ;;  %v4706_v36 = vrot.slane %v1065_v33, %v4310_v4  ;;  %v3159_v15 = vld [vmem:[#allocation7] ss:$8 sps:$4 sm:$0xff]   ;;  %v3161_v40 = vld [vmem:[#allocation7 + $0x4] ss:$8 sps:$4 sm:$0xff]  }
 0x1fe   :  { %v3426_v27 = vpop.eup %3425  ;;  %3439 = vtanh.f32 %v909_v45  ;;  %v913_v50 = vadd.f32 %v912_v13, %v4555_v20  ;;  %v914_v3 = vpop.f32.mrb[23].mxu1  ;;  %2223 = vmatprep.subr.bf16.mxu1 %v3161_v40 }
 0x1ff   :  { %v3428_v22 = vpop.eup %3427  ;;  %3441 = vtanh.f32 %v911_v37  ;;  %v915_v55 = vadd.f32 %v914_v3, %v4558_v23  ;;  %2224 = vmatpush1.bf16.msra.mxu1 %v3159_v15  ;;  %v3185_v15 = vld [vmem:[#allocation7 + $0x84] ss:$8 sps:$4 sm:$0xff]  }
 0x200   :  { %v3430_v48 = vpop.eup %3429  ;;  %v1015_v57 = vpack.c.bf16 %v3428_v22, %v3424_v44  ;;  %3443 = vtanh.f32 %v913_v50  ;;  %v3162_v22 = vld [vmem:[#allocation7 + $0x10] ss:$8 sps:$4 sm:$0xff]  }
 0x201   :  { %v4664_v58 = vpop.eup %3431  ;;  %v1016_v62 = vpack.c.bf16 %v3430_v48, %v3426_v27  ;;  %3445 = vtanh.f32 %v915_v55 }
 0x202   :  { %v3434_v1 = vpop.eup %3433 }
 0x203   :  { %v4666_v2 = vpop.eup %3435  ;;  %1339 = vmatprep.mubr.bf16.mxu1 %v1016_v62  ;;  %v918_v21 = vpop.f32.mrb[24].mxu1 }
 0x204   :  { %v3438_v63 = vpop.eup %3437  ;;  %1340 = vmatmul.mubr.bf16.gmra.mrb[60].mxu1 %v1015_v57  ;;  %v1025_v11 = vpack.c.bf16 %v4666_v2, %v4664_v58  ;;  %v919_v14 = vadd.f32 %v918_v21, %v4555_v20  ;;  %v920_v53 = vpop.f32.mrb[25].mxu1  ;;  %v3167_v2 = vld [vmem:[#allocation7 + $0x24] ss:$8 sps:$4 sm:$0xff]  }
 0x205   :  { %1349 = vmatprep.mubr.bf16.mxu1 %v1018_v7  ;;  %v1026_v18 = vpack.c.bf16 %v3438_v63, %v3434_v1  ;;  %v921_v24 = vadd.f32 %v920_v53, %v4558_v23  ;;  %v922_v25 = vpop.f32.mrb[26].mxu1  ;;  %v3165_v1 = vld [vmem:[#allocation7 + $0x20] ss:$8 sps:$4 sm:$0xff]  }
 0x206   :  { %3447 = vtanh.f32 %v919_v14  ;;  %v923_v10 = vadd.f32 %v922_v25, %v4555_v20  ;;  %v924_v29 = vpop.f32.mrb[27].mxu1 }
 0x207   :  { %3449 = vtanh.f32 %v921_v24  ;;  %v925_v9 = vadd.f32 %v924_v29, %v4558_v23  ;;  %v3170_v29 = vld [vmem:[#allocation7 + $0x34] ss:$8 sps:$4 sm:$0xff]  }
 0x208   :  { %v3440_v56 = vpop.eup %3439  ;;  %3451 = vtanh.f32 %v923_v10  ;;  %v3168_v10 = vld [vmem:[#allocation7 + $0x30] ss:$8 sps:$4 sm:$0xff]  }
 0x209   :  { %v3442_v5 = vpop.eup %3441  ;;  %3453 = vtanh.f32 %v925_v9 }
 0x20a   :  { %v3444_v17 = vpop.eup %3443 }
 0x20b   :  { %v3446_v30 = vpop.eup %3445  ;;  %v928_v32 = vpop.f32.mrb[28].mxu1  ;;  %v1027_v59 = vpack.c.bf16 %v3444_v17, %v3440_v56  ;;  %v3173_v56 = vld [vmem:[#allocation7 + $0x44] ss:$8 sps:$4 sm:$0xff]  }
 0x20c   :  { %1350 = vmatmul.mubr.bf16.gmra.mrb[64].mxu1 %v1017_v8  ;;  %v929_v42 = vadd.f32 %v928_v32, %v4555_v20  ;;  %v930_v7 = vpop.f32.mrb[29].mxu1  ;;  %v1028_v41 = vpack.c.bf16 %v3446_v30, %v3442_v5  ;;  %v3171_v30 = vld [vmem:[#allocation7 + $0x40] ss:$8 sps:$4 sm:$0xff]  }
 0x20d   :  { %1359 = vmatprep.mubr.bf16.mxu1 %v1020_v47  ;;  %v931_v12 = vadd.f32 %v930_v7, %v4558_v23  ;;  %v932_v35 = vpop.f32.mrb[30].mxu1  ;;  %v3176_v7 = vld [vmem:[#allocation7 + $0x54] ss:$8 sps:$4 sm:$0xff]  }
 0x20e   :  { %3455 = vtanh.f32 %v929_v42  ;;  %v933_v43 = vadd.f32 %v932_v35, %v4555_v20  ;;  %v934_v44 = vpop.f32.mrb[31].mxu1 }
 0x20f   :  { %3457 = vtanh.f32 %v931_v12  ;;  %v935_v54 = vadd.f32 %v934_v44, %v4558_v23 }
 0x210   :  { %v3448_v51 = vpop.eup %3447  ;;  %3459 = vtanh.f32 %v933_v43 }
 0x211   :  { %v3450_v8 = vpop.eup %3449  ;;  %3461 = vtanh.f32 %v935_v54 }
 0x212   :  { %v3452_v45 = vpop.eup %3451 }
 0x213   :  { %v3454_v46 = vpop.eup %3453  ;;  %v1029_v31 = vpack.c.bf16 %v3452_v45, %v3448_v51 }
 0x214   :  { %1360 = vmatmul.mubr.bf16.gmra.mrb[68].mxu1 %v1019_v52  ;;  %v1030_v20 = vpack.c.bf16 %v3454_v46, %v3450_v8  ;;  %v3147_v52 = vld [vmem:[#allocation5 + $0xc0] ss:$8 sps:$4 sm:$0xff]   ;;  %v3174_v8 = vld [vmem:[#allocation7 + $0x50] ss:$8 sps:$4 sm:$0xff]   ;;  %v3179_v46 = vld [vmem:[#allocation7 + $0x64] ss:$8 sps:$4 sm:$0xff]  }
 0x215   :  { %1369 = vmatprep.mubr.bf16.mxu1 %v1022_v28  ;;  %1755 = vmatpush1.bf16.msra.mxu0 %v3147_v52  ;;  %v3158_v28 = vld [vmem:[#allocation5 + $0xf4] ss:$8 sps:$4 sm:$0xff]  }
 0x216   :  { %1756 = vmatprep.subr.bf16.mxu0 %v3152_v16 }
 0x218   :  { %v3456_v39 = vpop.eup %3455 }
 0x219   :  { %v3458_v47 = vpop.eup %3457  ;;  %1757 = vmatpush1.bf16.msra.mxu0 %v3150_v38 }
 0x21a   :  { %v3460_v27 = vpop.eup %3459  ;;  %1758 = vmatprep.subr.bf16.mxu0 %v3155_v61 }
 0x21b   :  { %v3462_v23 = vpop.eup %3461  ;;  %v1031_v37 = vpack.c.bf16 %v3460_v27, %v3456_v39 }
 0x21c   :  { %1370 = vmatmul.mubr.bf16.gmra.mrb[72].mxu1 %v1021_v19  ;;  %v1032_v26 = vpack.c.bf16 %v3462_v23, %v3458_v47  ;;  %v3156_v19 = vld [vmem:[#allocation5 + $0xf0] ss:$8 sps:$4 sm:$0xff]   ;;  %v3177_v47 = vld [vmem:[#allocation7 + $0x60] ss:$8 sps:$4 sm:$0xff]  }
 0x21d   :  { %1379 = vmatprep.mubr.bf16.mxu1 %v1024_v49  ;;  %1759 = vmatpush1.bf16.msra.mxu0 %v3153_v0  ;;  %v3164_v49 = vld [vmem:[#allocation7 + $0x14] ss:$8 sps:$4 sm:$0xff]  }
 0x21e   :  { %1760 = vmatprep.subr.bf16.mxu0 %v3158_v28  ;;  %2225 = vmatprep.subr.bf16.mxu1 %v3164_v49  ;;  %v3180_v28 = vld [vmem:[#allocation7 + $0x70] ss:$8 sps:$4 sm:$0xff]  }
 0x21f   :  { %2226 = vmatpush1.bf16.msra.mxu1 %v3162_v22  ;;  %v3183_v22 = vld [vmem:[#allocation7 + $0x80] ss:$8 sps:$4 sm:$0xff]  }
 0x220   :  { %2227 = vmatprep.subr.bf16.mxu1 %v3167_v2 }
 0x221   :  { %1761 = vmatpush1.bf16.msra.mxu0 %v3156_v19 }
 0x223   :  { %2228 = vmatpush1.bf16.msra.mxu1 %v3165_v1 }
 0x224   :  { %1380 = vmatmul.mubr.bf16.gmra.mrb[76].mxu1 %v1023_v60  ;;  %v4709_v60 = vrot.slane %v1065_v33, %v4315_v6  ;;  %2229 = vmatprep.subr.bf16.mxu1 %v3170_v29 }
 0x225   :  { %1389 = vmatprep.mubr.bf16.mxu1 %v1026_v18 }
 0x227   :  { %2230 = vmatpush1.bf16.msra.mxu1 %v3168_v10  ;;  %v3189_v10 = vld [vmem:[#allocation7 + $0xa0] ss:$8 sps:$4 sm:$0xff]  }
 0x228   :  { %2231 = vmatprep.subr.bf16.mxu1 %v3173_v56 }
 0x22b   :  { %2232 = vmatpush1.bf16.msra.mxu1 %v3171_v30 }
 0x22c   :  { %1390 = vmatmul.mubr.bf16.gmra.mrb[80].mxu1 %v1025_v11  ;;  %2233 = vmatprep.subr.bf16.mxu1 %v3176_v7 }
 0x22d   :  { %1399 = vmatprep.mubr.bf16.mxu1 %v1028_v41 }
 0x22f   :  { %2234 = vmatpush1.bf16.msra.mxu1 %v3174_v8  ;;  %v3195_v8 = vld [vmem:[#allocation7 + $0xc0] ss:$8 sps:$4 sm:$0xff]  }
 0x230   :  { %2235 = vmatprep.subr.bf16.mxu1 %v3179_v46 }
 0x233   :  { %2236 = vmatpush1.bf16.msra.mxu1 %v3177_v47 }
 0x234   :  { %1400 = vmatmul.mubr.bf16.gmra.mrb[84].mxu1 %v1027_v59 }
 0x235   :  { %1409 = vmatprep.mubr.bf16.mxu1 %v1030_v20 }
 0x23c   :  { %1410 = vmatmul.mubr.bf16.gmra.mrb[88].mxu1 %v1029_v31 }
 0x23d   :  { %1419 = vmatprep.mubr.bf16.mxu1 %v1032_v26  ;;  %v3182_v26 = vld [vmem:[#allocation7 + $0x74] ss:$8 sps:$4 sm:$0xff]  }
 0x23e   :  { %2237 = vmatprep.subr.bf16.mxu1 %v3182_v26 }
 0x23f   :  { %2238 = vmatpush1.bf16.msra.mxu1 %v3180_v28 }
 0x240   :  { %2239 = vmatprep.subr.bf16.mxu1 %v3185_v15 }
 0x243   :  { %2240 = vmatpush1.bf16.msra.mxu1 %v3183_v22 }
 0x244   :  { %1420 = vmatmul.mubr.bf16.gmra.mrb[92].mxu1 %v1031_v37 }
 0x29f   :  { %v1271_v13 = vpop.f32.mrb[32].mxu1 }
 0x2a0   :  { %v1272_v50 = vadd.f32 %v1271_v13, %v4706_v36  ;;  %v1273_v3 = vpop.f32.mrb[33].mxu1 }
 0x2a1   :  { %v1274_v48 = vadd.f32 %v1273_v3, %v4709_v60  ;;  %v1275_v55 = vpop.f32.mrb[34].mxu1 }
 0x2a2   :  { %3463 = vtanh.f32 %v1272_v50  ;;  %v1276_v57 = vadd.f32 %v1275_v55, %v4706_v36  ;;  %v1277_v58 = vpop.f32.mrb[35].mxu1  ;;  %v3188_v55 = vld [vmem:[#allocation7 + $0x94] ss:$8 sps:$4 sm:$0xff]  }
 0x2a3   :  { %3465 = vtanh.f32 %v1274_v48  ;;  %v1278_v62 = vadd.f32 %v1277_v58, %v4709_v60  ;;  %2241 = vmatprep.subr.bf16.mxu1 %v3188_v55 }
 0x2a4   :  { %3467 = vtanh.f32 %v1276_v57 }
 0x2a5   :  { %3469 = vtanh.f32 %v1278_v62 }
 0x2a7   :  { %v1281_v63 = vpop.f32.mrb[36].mxu1 }
 0x2a8   :  { %v1282_v21 = vadd.f32 %v1281_v63, %v4706_v36  ;;  %v1283_v11 = vpop.f32.mrb[37].mxu1 }
 0x2a9   :  { %v1284_v14 = vadd.f32 %v1283_v11, %v4709_v60  ;;  %v1285_v53 = vpop.f32.mrb[38].mxu1  ;;  %v3186_v11 = vld [vmem:[#allocation7 + $0x90] ss:$8 sps:$4 sm:$0xff]  }
 0x2aa   :  { %3471 = vtanh.f32 %v1282_v21  ;;  %v1286_v18 = vadd.f32 %v1285_v53, %v4706_v36  ;;  %v1287_v24 = vpop.f32.mrb[39].mxu1  ;;  %v3191_v53 = vld [vmem:[#allocation7 + $0xa4] ss:$8 sps:$4 sm:$0xff]   ;;  %2242 = vmatpush1.bf16.msra.mxu1 %v3186_v11 }
 0x2ab   :  { %3473 = vtanh.f32 %v1284_v14  ;;  %v1288_v25 = vadd.f32 %v1287_v24, %v4709_v60  ;;  %2243 = vmatprep.subr.bf16.mxu1 %v3191_v53 }
 0x2ac   :  { %v3464_v9 = vpop.eup %3463  ;;  %3475 = vtanh.f32 %v1286_v18 }
 0x2ad   :  { %v3466_v5 = vpop.eup %3465  ;;  %3477 = vtanh.f32 %v1288_v25 }
 0x2ae   :  { %v3468_v17 = vpop.eup %3467  ;;  %2244 = vmatpush1.bf16.msra.mxu1 %v3189_v10 }
 0x2af   :  { %v3470_v32 = vpop.eup %3469  ;;  %v1291_v59 = vpop.f32.mrb[40].mxu1  ;;  %v1494_v42 = vpack.c.bf16 %v3468_v17, %v3464_v9 }
 0x2b0   :  { %v1292_v41 = vadd.f32 %v1291_v59, %v4706_v36  ;;  %v1293_v12 = vpop.f32.mrb[41].mxu1  ;;  %v1495_v35 = vpack.c.bf16 %v3470_v32, %v3466_v5  ;;  %v3194_v5 = vld [vmem:[#allocation7 + $0xb4] ss:$8 sps:$4 sm:$0xff]  }
 0x2b1   :  { %v1294_v43 = vadd.f32 %v1293_v12, %v4709_v60  ;;  %v1295_v44 = vpop.f32.mrb[42].mxu1  ;;  %v3192_v12 = vld [vmem:[#allocation7 + $0xb0] ss:$8 sps:$4 sm:$0xff]   ;;  %2245 = vmatprep.subr.bf16.mxu1 %v3194_v5 }
 0x2b2   :  { %3479 = vtanh.f32 %v1292_v41  ;;  %v1296_v54 = vadd.f32 %v1295_v44, %v4706_v36  ;;  %v1297_v51 = vpop.f32.mrb[43].mxu1  ;;  %1762 = vmatprep.mubr.bf16.mxu0 %v1495_v35  ;;  %2246 = vmatpush1.bf16.msra.mxu1 %v3192_v12 }
 0x2b3   :  { %3481 = vtanh.f32 %v1294_v43  ;;  %v1298_v45 = vadd.f32 %v1297_v51, %v4709_v60  ;;  %1763 = vmatmul.mubr.bf16.vlgmr.msra.gmra.mrb[32].mxu0 %v1494_v42  ;;  %v3197_v43 = vld [vmem:[#allocation7 + $0xc4] ss:$8 sps:$4 sm:$0xff]  }
 0x2b4   :  { %v3472_v31 = vpop.eup %3471  ;;  %3483 = vtanh.f32 %v1296_v54  ;;  %2247 = vmatprep.subr.bf16.mxu1 %v3197_v43 }
 0x2b5   :  { %v3474_v20 = vpop.eup %3473  ;;  %3485 = vtanh.f32 %v1298_v45 }
 0x2b6   :  { %v3476_v39 = vpop.eup %3475  ;;  %2248 = vmatpush1.bf16.msra.mxu1 %v3195_v8 }
 0x2b7   :  { %v3478_v27 = vpop.eup %3477  ;;  %v1301_v23 = vpop.f32.mrb[44].mxu1  ;;  %v1496_v37 = vpack.c.bf16 %v3476_v39, %v3472_v31 }
 0x2b8   :  { %v1302_v34 = vadd.f32 %v1301_v23, %v4706_v36  ;;  %v1303_v52 = vpop.f32.mrb[45].mxu1  ;;  %v1497_v38 = vpack.c.bf16 %v3478_v27, %v3474_v20  ;;  %v3200_v20 = vld [vmem:[#allocation7 + $0xd4] ss:$8 sps:$4 sm:$0xff]  }
 0x2b9   :  { %v1304_v16 = vadd.f32 %v1303_v52, %v4709_v60  ;;  %v1305_v61 = vpop.f32.mrb[46].mxu1  ;;  %v3198_v52 = vld [vmem:[#allocation7 + $0xd0] ss:$8 sps:$4 sm:$0xff]   ;;  %2249 = vmatprep.subr.bf16.mxu1 %v3200_v20 }
 0x2ba   :  { %3487 = vtanh.f32 %v1302_v34  ;;  %v1306_v0 = vadd.f32 %v1305_v61, %v4706_v36  ;;  %v1307_v19 = vpop.f32.mrb[47].mxu1  ;;  %1772 = vmatprep.mubr.bf16.mxu0 %v1497_v38  ;;  %2250 = vmatpush1.bf16.msra.mxu1 %v3198_v52 }
 0x2bb   :  { %3489 = vtanh.f32 %v1304_v16  ;;  %v1308_v33 = vadd.f32 %v1307_v19, %v4709_v60  ;;  %1773 = vmatmul.mubr.bf16.gmra.mrb[36].mxu0 %v1496_v37 }
 0x2bc   :  { %v3480_v40 = vpop.eup %3479  ;;  %3491 = vtanh.f32 %v1306_v0 }
 0x2bd   :  { %v3482_v49 = vpop.eup %3481  ;;  %3493 = vtanh.f32 %v1308_v33 }
 0x2be   :  { %v3484_v13 = vpop.eup %3483 }
 0x2bf   :  { %v3486_v50 = vpop.eup %3485  ;;  %v1311_v3 = vpop.f32.mrb[48].mxu1  ;;  %v1498_v48 = vpack.c.bf16 %v3484_v13, %v3480_v40 }
 0x2c0   :  { %v1312_v57 = vadd.f32 %v1311_v3, %v4706_v36  ;;  %v1313_v58 = vpop.f32.mrb[49].mxu1  ;;  %v1499_v62 = vpack.c.bf16 %v3486_v50, %v3482_v49 }
 0x2c1   :  { %v1314_v1 = vadd.f32 %v1313_v58, %v4709_v60  ;;  %v1315_v2 = vpop.f32.mrb[50].mxu1 }
 0x2c2   :  { %3495 = vtanh.f32 %v1312_v57  ;;  %v1316_v63 = vadd.f32 %v1315_v2, %v4706_v36  ;;  %v1317_v21 = vpop.f32.mrb[51].mxu1  ;;  %1782 = vmatprep.mubr.bf16.mxu0 %v1499_v62 }
 0x2c3   :  { %3497 = vtanh.f32 %v1314_v1  ;;  %v1318_v14 = vadd.f32 %v1317_v21, %v4709_v60  ;;  %1783 = vmatmul.mubr.bf16.gmra.mrb[40].mxu0 %v1498_v48 }
 0x2c4   :  { %v3488_v18 = vpop.eup %3487  ;;  %3499 = vtanh.f32 %v1316_v63 }
 0x2c5   :  { %v3490_v24 = vpop.eup %3489  ;;  %3501 = vtanh.f32 %v1318_v14 }
 0x2c6   :  { %v3492_v25 = vpop.eup %3491 }
 0x2c7   :  { %v3494_v29 = vpop.eup %3493  ;;  %v1321_v9 = vpop.f32.mrb[52].mxu1  ;;  %v1500_v56 = vpack.c.bf16 %v3492_v25, %v3488_v18 }
 0x2c8   :  { %v1322_v17 = vadd.f32 %v1321_v9, %v4706_v36  ;;  %v1323_v30 = vpop.f32.mrb[53].mxu1  ;;  %v1501_v32 = vpack.c.bf16 %v3494_v29, %v3490_v24 }
 0x2c9   :  { %v1324_v59 = vadd.f32 %v1323_v30, %v4709_v60  ;;  %v1325_v42 = vpop.f32.mrb[54].mxu1 }
 0x2ca   :  { %3503 = vtanh.f32 %v1322_v17  ;;  %v1326_v7 = vadd.f32 %v1325_v42, %v4706_v36  ;;  %v1327_v41 = vpop.f32.mrb[55].mxu1  ;;  %1792 = vmatprep.mubr.bf16.mxu0 %v1501_v32 }
 0x2cb   :  { %3505 = vtanh.f32 %v1324_v59  ;;  %v1328_v35 = vadd.f32 %v1327_v41, %v4709_v60  ;;  %1793 = vmatmul.mubr.bf16.gmra.mrb[44].mxu0 %v1500_v56 }
 0x2cc   :  { %v3496_v44 = vpop.eup %3495  ;;  %3507 = vtanh.f32 %v1326_v7 }
 0x2cd   :  { %v3498_v54 = vpop.eup %3497  ;;  %3509 = vtanh.f32 %v1328_v35 }
 0x2ce   :  { %v3500_v51 = vpop.eup %3499 }
 0x2cf   :  { %v3502_v45 = vpop.eup %3501  ;;  %v1331_v46 = vpop.f32.mrb[56].mxu1  ;;  %v1502_v31 = vpack.c.bf16 %v3500_v51, %v3496_v44 }
 0x2d0   :  { %v1332_v39 = vadd.f32 %v1331_v46, %v4706_v36  ;;  %v1333_v47 = vpop.f32.mrb[57].mxu1  ;;  %v1503_v27 = vpack.c.bf16 %v3502_v45, %v3498_v54 }
 0x2d1   :  { %v1334_v23 = vadd.f32 %v1333_v47, %v4709_v60  ;;  %v1335_v37 = vpop.f32.mrb[58].mxu1 }
 0x2d2   :  { %3511 = vtanh.f32 %v1332_v39  ;;  %v1336_v26 = vadd.f32 %v1335_v37, %v4706_v36  ;;  %v1337_v34 = vpop.f32.mrb[59].mxu1  ;;  %1802 = vmatprep.mubr.bf16.mxu0 %v1503_v27 }
 0x2d3   :  { %3513 = vtanh.f32 %v1334_v23  ;;  %v1338_v38 = vadd.f32 %v1337_v34, %v4709_v60  ;;  %1803 = vmatmul.mubr.bf16.gmra.mrb[48].mxu0 %v1502_v31 }
 0x2d4   :  { %v3504_v16 = vpop.eup %3503  ;;  %3515 = vtanh.f32 %v1336_v26 }
 0x2d5   :  { %v3506_v61 = vpop.eup %3505  ;;  %3517 = vtanh.f32 %v1338_v38 }
 0x2d6   :  { %v3508_v0 = vpop.eup %3507 }
 0x2d7   :  { %v3510_v19 = vpop.eup %3509  ;;  %v1341_v28 = vpop.f32.mrb[60].mxu1  ;;  %v1504_v33 = vpack.c.bf16 %v3508_v0, %v3504_v16 }
 0x2d8   :  { %v1342_v15 = vadd.f32 %v1341_v28, %v4706_v36  ;;  %v1343_v40 = vpop.f32.mrb[61].mxu1  ;;  %v1505_v49 = vpack.c.bf16 %v3510_v19, %v3506_v61 }
 0x2d9   :  { %v1344_v13 = vadd.f32 %v1343_v40, %v4709_v60  ;;  %v1345_v22 = vpop.f32.mrb[62].mxu1 }
 0x2da   :  { %3519 = vtanh.f32 %v1342_v15  ;;  %v1346_v50 = vadd.f32 %v1345_v22, %v4706_v36  ;;  %v1347_v3 = vpop.f32.mrb[63].mxu1  ;;  %1812 = vmatprep.mubr.bf16.mxu0 %v1505_v49 }
 0x2db   :  { %3521 = vtanh.f32 %v1344_v13  ;;  %v1348_v48 = vadd.f32 %v1347_v3, %v4709_v60  ;;  %1813 = vmatmul.mubr.bf16.gmra.mrb[52].mxu0 %v1504_v33 }
 0x2dc   :  { %v3512_v55 = vpop.eup %3511  ;;  %3523 = vtanh.f32 %v1346_v50 }
 0x2dd   :  { %v3514_v57 = vpop.eup %3513  ;;  %3525 = vtanh.f32 %v1348_v48 }
 0x2de   :  { %v3516_v58 = vpop.eup %3515 }
 0x2df   :  { %v3518_v62 = vpop.eup %3517  ;;  %v1351_v1 = vpop.f32.mrb[64].mxu1  ;;  %v1506_v2 = vpack.c.bf16 %v3516_v58, %v3512_v55 }
 0x2e0   :  { %v1352_v63 = vadd.f32 %v1351_v1, %v4706_v36  ;;  %v1353_v21 = vpop.f32.mrb[65].mxu1  ;;  %v1507_v11 = vpack.c.bf16 %v3518_v62, %v3514_v57 }
 0x2e1   :  { %v1354_v14 = vadd.f32 %v1353_v21, %v4709_v60  ;;  %v1355_v53 = vpop.f32.mrb[66].mxu1 }
 0x2e2   :  { %3527 = vtanh.f32 %v1352_v63  ;;  %v1356_v18 = vadd.f32 %v1355_v53, %v4706_v36  ;;  %v1357_v24 = vpop.f32.mrb[67].mxu1  ;;  %1822 = vmatprep.mubr.bf16.mxu0 %v1507_v11 }
 0x2e3   :  { %3529 = vtanh.f32 %v1354_v14  ;;  %v1358_v25 = vadd.f32 %v1357_v24, %v4709_v60  ;;  %1823 = vmatmul.mubr.bf16.gmra.mrb[56].mxu0 %v1506_v2 }
 0x2e4   :  { %v3520_v10 = vpop.eup %3519  ;;  %3531 = vtanh.f32 %v1356_v18 }
 0x2e5   :  { %v3522_v29 = vpop.eup %3521  ;;  %3533 = vtanh.f32 %v1358_v25 }
 0x2e6   :  { %v3524_v9 = vpop.eup %3523 }
 0x2e7   :  { %v3526_v56 = vpop.eup %3525  ;;  %v1361_v5 = vpop.f32.mrb[68].mxu1  ;;  %v1508_v17 = vpack.c.bf16 %v3524_v9, %v3520_v10 }
 0x2e8   :  { %v1362_v30 = vadd.f32 %v1361_v5, %v4706_v36  ;;  %v1363_v32 = vpop.f32.mrb[69].mxu1  ;;  %v1509_v59 = vpack.c.bf16 %v3526_v56, %v3522_v29 }
 0x2e9   :  { %v1364_v42 = vadd.f32 %v1363_v32, %v4709_v60  ;;  %v1365_v7 = vpop.f32.mrb[70].mxu1 }
 0x2ea   :  { %3535 = vtanh.f32 %v1362_v30  ;;  %v1366_v41 = vadd.f32 %v1365_v7, %v4706_v36  ;;  %v1367_v12 = vpop.f32.mrb[71].mxu1  ;;  %1832 = vmatprep.mubr.bf16.mxu0 %v1509_v59 }
 0x2eb   :  { %3537 = vtanh.f32 %v1364_v42  ;;  %v1368_v35 = vadd.f32 %v1367_v12, %v4709_v60  ;;  %1833 = vmatmul.mubr.bf16.gmra.mrb[60].mxu0 %v1508_v17  ;;  %v3203_v12 = vld [vmem:[#allocation7 + $0xe4] ss:$8 sps:$4 sm:$0xff]  }
 0x2ec   :  { %v3528_v43 = vpop.eup %3527  ;;  %3539 = vtanh.f32 %v1366_v41  ;;  %v3201_v41 = vld [vmem:[#allocation7 + $0xe0] ss:$8 sps:$4 sm:$0xff]   ;;  %2251 = vmatprep.subr.bf16.mxu1 %v3203_v12 }
 0x2ed   :  { %v3530_v44 = vpop.eup %3529  ;;  %3541 = vtanh.f32 %v1368_v35  ;;  %2252 = vmatpush1.bf16.msra.mxu1 %v3201_v41  ;;  %v2485_v41 = vld [vmem:[#allocation8 + $0x28] sm:$0xff] }
 0x2ee   :  { %v3532_v54 = vpop.eup %3531 }
 0x2ef   :  { %v3534_v51 = vpop.eup %3533  ;;  %v1371_v8 = vpop.f32.mrb[72].mxu1  ;;  %v1510_v45 = vpack.c.bf16 %v3532_v54, %v3528_v43 }
 0x2f0   :  { %v1372_v46 = vadd.f32 %v1371_v8, %v4706_v36  ;;  %v1373_v31 = vpop.f32.mrb[73].mxu1  ;;  %v1511_v20 = vpack.c.bf16 %v3534_v51, %v3530_v44 }
 0x2f1   :  { %v1374_v39 = vadd.f32 %v1373_v31, %v4709_v60  ;;  %v1375_v47 = vpop.f32.mrb[74].mxu1 }
 0x2f2   :  { %3543 = vtanh.f32 %v1372_v46  ;;  %v1376_v27 = vadd.f32 %v1375_v47, %v4706_v36  ;;  %v1377_v23 = vpop.f32.mrb[75].mxu1  ;;  %1842 = vmatprep.mubr.bf16.mxu0 %v1511_v20 }
 0x2f3   :  { %3545 = vtanh.f32 %v1374_v39  ;;  %v1378_v37 = vadd.f32 %v1377_v23, %v4709_v60  ;;  %1843 = vmatmul.mubr.bf16.gmra.mrb[64].mxu0 %v1510_v45 }
 0x2f4   :  { %v3536_v26 = vpop.eup %3535  ;;  %3547 = vtanh.f32 %v1376_v27 }
 0x2f5   :  { %v3538_v34 = vpop.eup %3537  ;;  %3549 = vtanh.f32 %v1378_v37  ;;  %v3204_v37 = vld [vmem:[#allocation7 + $0xf0] ss:$8 sps:$4 sm:$0xff]  }
 0x2f6   :  { %v3540_v52 = vpop.eup %3539 }
 0x2f7   :  { %v3542_v38 = vpop.eup %3541  ;;  %v1381_v16 = vpop.f32.mrb[76].mxu1  ;;  %v1512_v61 = vpack.c.bf16 %v3540_v52, %v3536_v26  ;;  %v3206_v26 = vld [vmem:[#allocation7 + $0xf4] ss:$8 sps:$4 sm:$0xff]  }
 0x2f8   :  { %v1382_v0 = vadd.f32 %v1381_v16, %v4706_v36  ;;  %v1383_v19 = vpop.f32.mrb[77].mxu1  ;;  %v1513_v28 = vpack.c.bf16 %v3542_v38, %v3538_v34  ;;  %2253 = vmatprep.subr.bf16.mxu1 %v3206_v26 }
 0x2f9   :  { %v1384_v33 = vadd.f32 %v1383_v19, %v4709_v60  ;;  %v1385_v15 = vpop.f32.mrb[78].mxu1  ;;  %2254 = vmatpush1.bf16.msra.mxu1 %v3204_v37 }
 0x2fa   :  { %3551 = vtanh.f32 %v1382_v0  ;;  %v1386_v40 = vadd.f32 %v1385_v15, %v4706_v36  ;;  %v1387_v49 = vpop.f32.mrb[79].mxu1  ;;  %1852 = vmatprep.mubr.bf16.mxu0 %v1513_v28 }
 0x2fb   :  { %3553 = vtanh.f32 %v1384_v33  ;;  %v1388_v13 = vadd.f32 %v1387_v49, %v4709_v60  ;;  %1853 = vmatmul.mubr.bf16.gmra.mrb[68].mxu0 %v1512_v61 }
 0x2fc   :  { %v3544_v22 = vpop.eup %3543  ;;  %3555 = vtanh.f32 %v1386_v40 }
 0x2fd   :  { %v3546_v50 = vpop.eup %3545  ;;  %3557 = vtanh.f32 %v1388_v13 }
 0x2fe   :  { %v3548_v3 = vpop.eup %3547 }
 0x2ff   :  { %v3550_v48 = vpop.eup %3549  ;;  %v1391_v55 = vpop.f32.mrb[80].mxu1  ;;  %v1514_v57 = vpack.c.bf16 %v3548_v3, %v3544_v22 }
 0x300   :  { %v1392_v58 = vadd.f32 %v1391_v55, %v4706_v36  ;;  %v1393_v62 = vpop.f32.mrb[81].mxu1  ;;  %v1515_v1 = vpack.c.bf16 %v3550_v48, %v3546_v50 }
 0x301   :  { %v1394_v2 = vadd.f32 %v1393_v62, %v4709_v60  ;;  %v1395_v63 = vpop.f32.mrb[82].mxu1 }
 0x302   :  { %3559 = vtanh.f32 %v1392_v58  ;;  %v1396_v21 = vadd.f32 %v1395_v63, %v4706_v36  ;;  %v1397_v11 = vpop.f32.mrb[83].mxu1  ;;  %1862 = vmatprep.mubr.bf16.mxu0 %v1515_v1 }
 0x303   :  { %3561 = vtanh.f32 %v1394_v2  ;;  %v1398_v14 = vadd.f32 %v1397_v11, %v4709_v60  ;;  %1863 = vmatmul.mubr.bf16.gmra.mrb[72].mxu0 %v1514_v57  ;;  %v3972_v11 = vmov 0.0|0.0  }
 0x304   :  { %v3552_v53 = vpop.eup %3551  ;;  %3563 = vtanh.f32 %v1396_v21  ;;  %v2481_v21 = vld [vmem:[#allocation8 + $0x8] sm:$0xff]  ;;  %2924 = vmatprep.subr.bf16.mxu0 %v3972_v11 }
 0x305   :  { %v3554_v18 = vpop.eup %3553  ;;  %3565 = vtanh.f32 %v1398_v14 }
 0x306   :  { %v3556_v24 = vpop.eup %3555 }
 0x307   :  { %v3558_v25 = vpop.eup %3557  ;;  %v1401_v10 = vpop.f32.mrb[84].mxu1  ;;  %v1516_v29 = vpack.c.bf16 %v3556_v24, %v3552_v53  ;;  %v1558_v53 = vld [vmem:[%s4997_s8] sm:$0x3] }
 0x308   :  { %v1402_v9 = vadd.f32 %v1401_v10, %v4706_v36  ;;  %v1403_v56 = vpop.f32.mrb[85].mxu1  ;;  %v1517_v5 = vpack.c.bf16 %v3558_v25, %v3554_v18  ;;  %v4781_v18 = vrot.slane %v1558_v53, %v4310_v4  ;;  %v4784_v24 = vrot.slane %v1558_v53, %v4315_v6  ;;  %v2482_v25 = vld [vmem:[#allocation8 + $0x10] sm:$0xff]  ;;  %v2483_v10 = vld [vmem:[#allocation8 + $0x18] sm:$0xff] }
 0x309   :  { %v1404_v17 = vadd.f32 %v1403_v56, %v4709_v60  ;;  %v1405_v30 = vpop.f32.mrb[86].mxu1 }
 0x30a   :  { %3567 = vtanh.f32 %v1402_v9  ;;  %v1406_v32 = vadd.f32 %v1405_v30, %v4706_v36  ;;  %v1407_v59 = vpop.f32.mrb[87].mxu1  ;;  %1872 = vmatprep.mubr.bf16.mxu0 %v1517_v5 }
 0x30b   :  { %3569 = vtanh.f32 %v1404_v17  ;;  %v1408_v42 = vadd.f32 %v1407_v59, %v4709_v60  ;;  %1873 = vmatmul.mubr.bf16.gmra.mrb[76].mxu0 %v1516_v29  ;;  %v2928_v29 = vpack.c.bf16 %v2483_v10, %v2482_v25 }
 0x30c   :  { %v3560_v7 = vpop.eup %3559  ;;  %3571 = vtanh.f32 %v1406_v32 }
 0x30d   :  { %v3562_v35 = vpop.eup %3561  ;;  %3573 = vtanh.f32 %v1408_v42 }
 0x30e   :  { %v3564_v43 = vpop.eup %3563 }
 0x30f   :  { %v3566_v44 = vpop.eup %3565  ;;  %v1411_v54 = vpop.f32.mrb[88].mxu1  ;;  %v1518_v51 = vpack.c.bf16 %v3564_v43, %v3560_v7  ;;  %v2484_v7 = vld [vmem:[#allocation8 + $0x20] sm:$0xff] }
 0x310   :  { %v1412_v8 = vadd.f32 %v1411_v54, %v4706_v36  ;;  %v1413_v45 = vpop.f32.mrb[89].mxu1  ;;  %v1519_v46 = vpack.c.bf16 %v3566_v44, %v3562_v35  ;;  %v2931_v12 = vpack.c.bf16 %v2485_v41, %v2484_v7 }
 0x311   :  { %v1414_v31 = vadd.f32 %v1413_v45, %v4709_v60  ;;  %v1415_v20 = vpop.f32.mrb[90].mxu1 }
 0x312   :  { %3575 = vtanh.f32 %v1412_v8  ;;  %v1416_v39 = vadd.f32 %v1415_v20, %v4706_v36  ;;  %v1417_v47 = vpop.f32.mrb[91].mxu1  ;;  %1882 = vmatprep.mubr.bf16.mxu0 %v1519_v46  ;;  %v2487_v20 = vld [vmem:[#allocation8 + $0x38] sm:$0xff] }
 0x313   :  { %3577 = vtanh.f32 %v1414_v31  ;;  %v1418_v27 = vadd.f32 %v1417_v47, %v4709_v60  ;;  %1883 = vmatmul.mubr.bf16.gmra.mrb[80].mxu0 %v1518_v51  ;;  %v2486_v31 = vld [vmem:[#allocation8 + $0x30] sm:$0xff] }
 0x314   :  { %v3568_v23 = vpop.eup %3567  ;;  %3579 = vtanh.f32 %v1416_v39  ;;  %v2488_v39 = vld [vmem:[#allocation8 + $0x40] sm:$0xff] }
 0x315   :  { %v3570_v34 = vpop.eup %3569  ;;  %3581 = vtanh.f32 %v1418_v27  ;;  %v2934_v27 = vpack.c.bf16 %v2487_v20, %v2486_v31 }
 0x316   :  { %v3572_v52 = vpop.eup %3571 }
 0x317   :  { %v3574_v38 = vpop.eup %3573  ;;  %v1421_v16 = vpop.f32.mrb[92].mxu1  ;;  %v1520_v61 = vpack.c.bf16 %v3572_v52, %v3568_v23  ;;  %v2489_v23 = vld [vmem:[#allocation8 + $0x48] sm:$0xff] }
 0x318   :  { %v1422_v0 = vadd.f32 %v1421_v16, %v4706_v36  ;;  %v1423_v19 = vpop.f32.mrb[93].mxu1  ;;  %v1521_v28 = vpack.c.bf16 %v3574_v38, %v3570_v34  ;;  %v2937_v34 = vpack.c.bf16 %v2489_v23, %v2488_v39  ;;  %v2501_v23 = vld [vmem:[#allocation8 + $0xa8] sm:$0xff] }
 0x319   :  { %v1424_v33 = vadd.f32 %v1423_v19, %v4709_v60  ;;  %v1425_v15 = vpop.f32.mrb[94].mxu1 }
 0x31a   :  { %3583 = vtanh.f32 %v1422_v0  ;;  %v1426_v40 = vadd.f32 %v1425_v15, %v4706_v36  ;;  %v1427_v49 = vpop.f32.mrb[95].mxu1  ;;  %1892 = vmatprep.mubr.bf16.mxu0 %v1521_v28  ;;  %v2491_v0 = vld [vmem:[#allocation8 + $0x58] sm:$0xff] }
 0x31b   :  { %3585 = vtanh.f32 %v1424_v33  ;;  %v1428_v13 = vadd.f32 %v1427_v49, %v4709_v60  ;;  %1893 = vmatmul.mubr.bf16.gmra.mrb[84].mxu0 %v1520_v61  ;;  %v2480_v60 = vld [vmem:[#allocation8] sm:$0xff]  ;;  %v2490_v61 = vld [vmem:[#allocation8 + $0x50] sm:$0xff] }
 0x31c   :  { %v3576_v22 = vpop.eup %3575  ;;  %3587 = vtanh.f32 %v1426_v40  ;;  %v2925_v14 = vpack.c.bf16 %v2481_v21, %v2480_v60  ;;  %v2495_v60 = vld [vmem:[#allocation8 + $0x78] sm:$0xff] }
 0x31d   :  { %v3578_v50 = vpop.eup %3577  ;;  %3589 = vtanh.f32 %v1428_v13 }
 0x31e   :  { %v3580_v3 = vpop.eup %3579  ;;  %2926 = vmatpush1.bf16.msra.mxu0 %v2925_v14 }
 0x31f   :  { %v3582_v48 = vpop.eup %3581  ;;  %v1522_v55 = vpack.c.bf16 %v3580_v3, %v3576_v22  ;;  %2927 = vmatprep.subr.bf16.mxu0 %v3972_v11  ;;  %v2940_v22 = vpack.c.bf16 %v2491_v0, %v2490_v61  ;;  %v2492_v3 = vld [vmem:[#allocation8 + $0x60] sm:$0xff]  ;;  %v2502_v0 = vld [vmem:[#allocation8 + $0xb0] sm:$0xff] }
 0x320   :  { %v1523_v57 = vpack.c.bf16 %v3582_v48, %v3578_v50  ;;  %v2493_v48 = vld [vmem:[#allocation8 + $0x68] sm:$0xff] }
 0x322   :  { %1902 = vmatprep.mubr.bf16.mxu0 %v1523_v57  ;;  %2929 = vmatpush1.bf16.msra.mxu0 %v2928_v29 }
 0x323   :  { %1903 = vmatmul.mubr.bf16.gmra.mrb[88].mxu0 %v1522_v55  ;;  %2930 = vmatprep.subr.bf16.mxu0 %v3972_v11 }
 0x324   :  { %v3584_v58 = vpop.eup %3583 }
 0x325   :  { %v3586_v62 = vpop.eup %3585 }
 0x326   :  { %v3588_v1 = vpop.eup %3587  ;;  %2932 = vmatpush1.bf16.msra.mxu0 %v2931_v12 }
 0x327   :  { %v3590_v36 = vpop.eup %3589  ;;  %v1524_v2 = vpack.c.bf16 %v3588_v1, %v3584_v58  ;;  %2933 = vmatprep.subr.bf16.mxu0 %v3972_v11 }
 0x328   :  { %v1525_v63 = vpack.c.bf16 %v3590_v36, %v3586_v62  ;;  %v2943_v62 = vpack.c.bf16 %v2493_v48, %v2492_v3  ;;  %v2504_v48 = vld [vmem:[#allocation8 + $0xc0] sm:$0xff] }
 0x32a   :  { %1912 = vmatprep.mubr.bf16.mxu0 %v1525_v63  ;;  %2935 = vmatpush1.bf16.msra.mxu0 %v2934_v27  ;;  %v2494_v63 = vld [vmem:[#allocation8 + $0x70] sm:$0xff]  ;;  %v2500_v27 = vld [vmem:[#allocation8 + $0xa0] sm:$0xff] }
 0x32b   :  { %1913 = vmatmul.mubr.bf16.gmra.mrb[92].mxu0 %v1524_v2  ;;  %2936 = vmatprep.subr.bf16.mxu0 %v3972_v11 }
 0x32e   :  { %2938 = vmatpush1.bf16.msra.mxu0 %v2937_v34 }
 0x32f   :  { %2939 = vmatprep.subr.bf16.mxu0 %v3972_v11 }
 0x332   :  { %2941 = vmatpush1.bf16.msra.mxu0 %v2940_v22 }
 0x333   :  { %2942 = vmatprep.subr.bf16.mxu0 %v3972_v11 }
 0x336   :  { %2944 = vmatpush1.bf16.msra.mxu0 %v2943_v62 }
 0x337   :  { %2945 = vmatprep.subr.bf16.mxu0 %v3972_v11 }
 0x386   :  { %v1764_v9 = vpop.f32.mrb[32].mxu0 }
 0x387   :  { %v1765_v56 = vadd.f32 %v1764_v9, %v4781_v18  ;;  %v1766_v5 = vpop.f32.mrb[33].mxu0 }
 0x388   :  { %v1767_v17 = vadd.f32 %v1766_v5, %v4784_v24  ;;  %v1768_v30 = vpop.f32.mrb[34].mxu0 }
 0x389   :  { %3591 = vtanh.f32 %v1765_v56  ;;  %v1769_v32 = vadd.f32 %v1768_v30, %v4781_v18  ;;  %v1770_v59 = vpop.f32.mrb[35].mxu0  ;;  %v2946_v56 = vpack.c.bf16 %v2495_v60, %v2494_v63  ;;  %v2497_v30 = vld [vmem:[#allocation8 + $0x88] sm:$0xff]  ;;  %v2506_v60 = vld [vmem:[#allocation8 + $0xd0] sm:$0xff] }
 0x38a   :  { %3593 = vtanh.f32 %v1767_v17  ;;  %v1771_v42 = vadd.f32 %v1770_v59, %v4784_v24  ;;  %v2496_v17 = vld [vmem:[#allocation8 + $0x80] sm:$0xff] }
 0x38b   :  { %3595 = vtanh.f32 %v1769_v32  ;;  %2947 = vmatpush1.bf16.msra.mxu0 %v2946_v56  ;;  %v2949_v7 = vpack.c.bf16 %v2497_v30, %v2496_v17 }
 0x38c   :  { %3597 = vtanh.f32 %v1771_v42  ;;  %2948 = vmatprep.subr.bf16.mxu0 %v3972_v11 }
 0x38e   :  { %v1774_v35 = vpop.f32.mrb[36].mxu0 }
 0x38f   :  { %v1775_v43 = vadd.f32 %v1774_v35, %v4781_v18  ;;  %v1776_v44 = vpop.f32.mrb[37].mxu0  ;;  %2950 = vmatpush1.bf16.msra.mxu0 %v2949_v7 }
 0x390   :  { %v1777_v54 = vadd.f32 %v1776_v44, %v4784_v24  ;;  %v1778_v51 = vpop.f32.mrb[38].mxu0  ;;  %v2499_v44 = vld [vmem:[#allocation8 + $0x98] sm:$0xff]  ;;  %2951 = vmatprep.subr.bf16.mxu0 %v3972_v11 }
 0x391   :  { %3599 = vtanh.f32 %v1775_v43  ;;  %v1779_v8 = vadd.f32 %v1778_v51, %v4781_v18  ;;  %v1780_v45 = vpop.f32.mrb[39].mxu0  ;;  %v2498_v43 = vld [vmem:[#allocation8 + $0x90] sm:$0xff] }
 0x392   :  { %3601 = vtanh.f32 %v1777_v54  ;;  %v1781_v46 = vadd.f32 %v1780_v45, %v4784_v24  ;;  %v2952_v39 = vpack.c.bf16 %v2499_v44, %v2498_v43 }
 0x393   :  { %v3592_v47 = vpop.eup %3591  ;;  %3603 = vtanh.f32 %v1779_v8 }
 0x394   :  { %v3594_v37 = vpop.eup %3593  ;;  %3605 = vtanh.f32 %v1781_v46  ;;  %2953 = vmatpush1.bf16.msra.mxu0 %v2952_v39 }
 0x395   :  { %v3596_v26 = vpop.eup %3595  ;;  %2954 = vmatprep.subr.bf16.mxu0 %v3972_v11 }
 0x396   :  { %v3598_v52 = vpop.eup %3597  ;;  %v1784_v38 = vpop.f32.mrb[40].mxu0  ;;  %v1987_v16 = vpack.c.bf16 %v3596_v26, %v3592_v47 }
 0x397   :  { %v1785_v19 = vadd.f32 %v1784_v38, %v4781_v18  ;;  %v1786_v28 = vpop.f32.mrb[41].mxu0  ;;  %v1988_v33 = vpack.c.bf16 %v3598_v52, %v3594_v37  ;;  %v2955_v52 = vpack.c.bf16 %v2501_v23, %v2500_v27 }
 0x398   :  { %v1787_v15 = vadd.f32 %v1786_v28, %v4784_v24  ;;  %v1788_v40 = vpop.f32.mrb[42].mxu0 }
 0x399   :  { %3607 = vtanh.f32 %v1785_v19  ;;  %v1789_v49 = vadd.f32 %v1788_v40, %v4781_v18  ;;  %v1790_v13 = vpop.f32.mrb[43].mxu0  ;;  %2255 = vmatprep.mubr.bf16.mxu1 %v1988_v33  ;;  %v2503_v19 = vld [vmem:[#allocation8 + $0xb8] sm:$0xff]  ;;  %2956 = vmatpush1.bf16.msra.mxu0 %v2955_v52 }
 0x39a   :  { %3609 = vtanh.f32 %v1787_v15  ;;  %v1791_v50 = vadd.f32 %v1790_v13, %v4784_v24  ;;  %2256 = vmatmul.mubr.bf16.vlgmr.msra.gmra.mrb[96].mxu1 %v1987_v16  ;;  %2957 = vmatprep.subr.bf16.mxu0 %v3972_v11 }
 0x39b   :  { %v3600_v55 = vpop.eup %3599  ;;  %3611 = vtanh.f32 %v1789_v49 }
 0x39c   :  { %v3602_v57 = vpop.eup %3601  ;;  %3613 = vtanh.f32 %v1791_v50  ;;  %v2958_v50 = vpack.c.bf16 %v2503_v19, %v2502_v0 }
 0x39d   :  { %v3604_v58 = vpop.eup %3603 }
 0x39e   :  { %v3606_v1 = vpop.eup %3605  ;;  %v1794_v36 = vpop.f32.mrb[44].mxu0  ;;  %v1989_v2 = vpack.c.bf16 %v3604_v58, %v3600_v55  ;;  %v2505_v55 = vld [vmem:[#allocation8 + $0xc8] sm:$0xff]  ;;  %2959 = vmatpush1.bf16.msra.mxu0 %v2958_v50 }
 0x39f   :  { %v1795_v21 = vadd.f32 %v1794_v36, %v4781_v18  ;;  %v1796_v14 = vpop.f32.mrb[45].mxu0  ;;  %v1990_v53 = vpack.c.bf16 %v3606_v1, %v3602_v57  ;;  %v2961_v1 = vpack.c.bf16 %v2505_v55, %v2504_v48  ;;  %2960 = vmatprep.subr.bf16.mxu0 %v3972_v11 }
 0x3a0   :  { %v1797_v25 = vadd.f32 %v1796_v14, %v4784_v24  ;;  %v1798_v10 = vpop.f32.mrb[46].mxu0 }
 0x3a1   :  { %3615 = vtanh.f32 %v1795_v21  ;;  %v1799_v29 = vadd.f32 %v1798_v10, %v4781_v18  ;;  %v1800_v9 = vpop.f32.mrb[47].mxu0  ;;  %2265 = vmatprep.mubr.bf16.mxu1 %v1990_v53  ;;  %v2507_v21 = vld [vmem:[#allocation8 + $0xd8] sm:$0xff] }
 0x3a2   :  { %3617 = vtanh.f32 %v1797_v25  ;;  %v1801_v5 = vadd.f32 %v1800_v9, %v4784_v24  ;;  %2266 = vmatmul.mubr.bf16.gmra.mrb[100].mxu1 %v1989_v2  ;;  %2962 = vmatpush1.bf16.msra.mxu0 %v2961_v1 }
 0x3a3   :  { %v3608_v32 = vpop.eup %3607  ;;  %3619 = vtanh.f32 %v1799_v29  ;;  %2963 = vmatprep.subr.bf16.mxu0 %v3972_v11 }
 0x3a4   :  { %v3610_v59 = vpop.eup %3609  ;;  %3621 = vtanh.f32 %v1801_v5  ;;  %v2964_v5 = vpack.c.bf16 %v2507_v21, %v2506_v60 }
 0x3a5   :  { %v3612_v42 = vpop.eup %3611 }
 0x3a6   :  { %v3614_v41 = vpop.eup %3613  ;;  %v1804_v12 = vpop.f32.mrb[48].mxu0  ;;  %v1991_v35 = vpack.c.bf16 %v3612_v42, %v3608_v32  ;;  %2965 = vmatpush1.bf16.msra.mxu0 %v2964_v5 }
 0x3a7   :  { %v1805_v54 = vadd.f32 %v1804_v12, %v4781_v18  ;;  %v1806_v51 = vpop.f32.mrb[49].mxu0  ;;  %v1992_v8 = vpack.c.bf16 %v3614_v41, %v3610_v59  ;;  %2966 = vmatprep.subr.bf16.mxu0 %v3972_v11 }
 0x3a8   :  { %v1807_v45 = vadd.f32 %v1806_v51, %v4784_v24  ;;  %v1808_v46 = vpop.f32.mrb[50].mxu0 }
 0x3a9   :  { %3623 = vtanh.f32 %v1805_v54  ;;  %v1809_v31 = vadd.f32 %v1808_v46, %v4781_v18  ;;  %v1810_v20 = vpop.f32.mrb[51].mxu0  ;;  %2275 = vmatprep.mubr.bf16.mxu1 %v1992_v8 }
 0x3aa   :  { %3625 = vtanh.f32 %v1807_v45  ;;  %v1811_v47 = vadd.f32 %v1810_v20, %v4784_v24  ;;  %2276 = vmatmul.mubr.bf16.gmra.mrb[104].mxu1 %v1991_v35 }
 0x3ab   :  { %v3616_v37 = vpop.eup %3615  ;;  %3627 = vtanh.f32 %v1809_v31 }
 0x3ac   :  { %v3618_v26 = vpop.eup %3617  ;;  %3629 = vtanh.f32 %v1811_v47 }
 0x3ad   :  { %v3620_v34 = vpop.eup %3619 }
 0x3ae   :  { %v3622_v38 = vpop.eup %3621  ;;  %v1814_v16 = vpop.f32.mrb[52].mxu0  ;;  %v1993_v61 = vpack.c.bf16 %v3620_v34, %v3616_v37 }
 0x3af   :  { %v1815_v28 = vadd.f32 %v1814_v16, %v4781_v18  ;;  %v1816_v33 = vpop.f32.mrb[53].mxu0  ;;  %v1994_v15 = vpack.c.bf16 %v3622_v38, %v3618_v26 }
 0x3b0   :  { %v1817_v40 = vadd.f32 %v1816_v33, %v4784_v24  ;;  %v1818_v49 = vpop.f32.mrb[54].mxu0 }
 0x3b1   :  { %3631 = vtanh.f32 %v1815_v28  ;;  %v1819_v13 = vadd.f32 %v1818_v49, %v4781_v18  ;;  %v1820_v22 = vpop.f32.mrb[55].mxu0  ;;  %2285 = vmatprep.mubr.bf16.mxu1 %v1994_v15 }
 0x3b2   :  { %3633 = vtanh.f32 %v1817_v40  ;;  %v1821_v3 = vadd.f32 %v1820_v22, %v4784_v24  ;;  %2286 = vmatmul.mubr.bf16.gmra.mrb[108].mxu1 %v1993_v61 }
 0x3b3   :  { %v3624_v57 = vpop.eup %3623  ;;  %3635 = vtanh.f32 %v1819_v13 }
 0x3b4   :  { %v3626_v58 = vpop.eup %3625  ;;  %3637 = vtanh.f32 %v1821_v3 }
 0x3b5   :  { %v3628_v62 = vpop.eup %3627 }
 0x3b6   :  { %v3630_v36 = vpop.eup %3629  ;;  %v1824_v2 = vpop.f32.mrb[56].mxu0  ;;  %v1995_v63 = vpack.c.bf16 %v3628_v62, %v3624_v57 }
 0x3b7   :  { %v1825_v14 = vadd.f32 %v1824_v2, %v4781_v18  ;;  %v1826_v53 = vpop.f32.mrb[57].mxu0  ;;  %v1996_v25 = vpack.c.bf16 %v3630_v36, %v3626_v58 }
 0x3b8   :  { %v1827_v10 = vadd.f32 %v1826_v53, %v4784_v24  ;;  %v1828_v29 = vpop.f32.mrb[58].mxu0 }
 0x3b9   :  { %3639 = vtanh.f32 %v1825_v14  ;;  %v1829_v9 = vadd.f32 %v1828_v29, %v4781_v18  ;;  %v1830_v56 = vpop.f32.mrb[59].mxu0  ;;  %2295 = vmatprep.mubr.bf16.mxu1 %v1996_v25 }
 0x3ba   :  { %3641 = vtanh.f32 %v1827_v10  ;;  %v1831_v17 = vadd.f32 %v1830_v56, %v4784_v24  ;;  %2296 = vmatmul.mubr.bf16.gmra.mrb[112].mxu1 %v1995_v63 }
 0x3bb   :  { %v3632_v30 = vpop.eup %3631  ;;  %3643 = vtanh.f32 %v1829_v9 }
 0x3bc   :  { %v3634_v32 = vpop.eup %3633  ;;  %3645 = vtanh.f32 %v1831_v17 }
 0x3bd   :  { %v3636_v59 = vpop.eup %3635 }
 0x3be   :  { %v3638_v42 = vpop.eup %3637  ;;  %v1834_v7 = vpop.f32.mrb[60].mxu0  ;;  %v1997_v41 = vpack.c.bf16 %v3636_v59, %v3632_v30 }
 0x3bf   :  { %v1835_v12 = vadd.f32 %v1834_v7, %v4781_v18  ;;  %v1836_v35 = vpop.f32.mrb[61].mxu0  ;;  %v1998_v43 = vpack.c.bf16 %v3638_v42, %v3634_v32 }
 0x3c0   :  { %v1837_v44 = vadd.f32 %v1836_v35, %v4784_v24  ;;  %v1838_v54 = vpop.f32.mrb[62].mxu0 }
 0x3c1   :  { %3647 = vtanh.f32 %v1835_v12  ;;  %v1839_v51 = vadd.f32 %v1838_v54, %v4781_v18  ;;  %v1840_v8 = vpop.f32.mrb[63].mxu0  ;;  %2305 = vmatprep.mubr.bf16.mxu1 %v1998_v43 }
 0x3c2   :  { %3649 = vtanh.f32 %v1837_v44  ;;  %v1841_v45 = vadd.f32 %v1840_v8, %v4784_v24  ;;  %2306 = vmatmul.mubr.bf16.gmra.mrb[116].mxu1 %v1997_v41 }
 0x3c3   :  { %v3640_v46 = vpop.eup %3639  ;;  %3651 = vtanh.f32 %v1839_v51 }
 0x3c4   :  { %v3642_v31 = vpop.eup %3641  ;;  %3653 = vtanh.f32 %v1841_v45 }
 0x3c5   :  { %v3644_v20 = vpop.eup %3643 }
 0x3c6   :  { %v3646_v39 = vpop.eup %3645  ;;  %v1844_v47 = vpop.f32.mrb[64].mxu0  ;;  %v1999_v27 = vpack.c.bf16 %v3644_v20, %v3640_v46 }
 0x3c7   :  { %v1845_v23 = vadd.f32 %v1844_v47, %v4781_v18  ;;  %v1846_v37 = vpop.f32.mrb[65].mxu0  ;;  %v2000_v26 = vpack.c.bf16 %v3646_v39, %v3642_v31 }
 0x3c8   :  { %v1847_v34 = vadd.f32 %v1846_v37, %v4784_v24  ;;  %v1848_v52 = vpop.f32.mrb[66].mxu0 }
 0x3c9   :  { %3655 = vtanh.f32 %v1845_v23  ;;  %v1849_v38 = vadd.f32 %v1848_v52, %v4781_v18  ;;  %v1850_v16 = vpop.f32.mrb[67].mxu0  ;;  %2315 = vmatprep.mubr.bf16.mxu1 %v2000_v26 }
 0x3ca   :  { %3657 = vtanh.f32 %v1847_v34  ;;  %v1851_v61 = vadd.f32 %v1850_v16, %v4784_v24  ;;  %2316 = vmatmul.mubr.bf16.gmra.mrb[120].mxu1 %v1999_v27 }
 0x3cb   :  { %v3648_v0 = vpop.eup %3647  ;;  %3659 = vtanh.f32 %v1849_v38 }
 0x3cc   :  { %v3650_v19 = vpop.eup %3649  ;;  %3661 = vtanh.f32 %v1851_v61 }
 0x3cd   :  { %v3652_v28 = vpop.eup %3651 }
 0x3ce   :  { %v3654_v33 = vpop.eup %3653  ;;  %v1854_v15 = vpop.f32.mrb[68].mxu0  ;;  %v2001_v40 = vpack.c.bf16 %v3652_v28, %v3648_v0 }
 0x3cf   :  { %v1855_v49 = vadd.f32 %v1854_v15, %v4781_v18  ;;  %v1856_v13 = vpop.f32.mrb[69].mxu0  ;;  %v2002_v22 = vpack.c.bf16 %v3654_v33, %v3650_v19 }
 0x3d0   :  { %v1857_v50 = vadd.f32 %v1856_v13, %v4784_v24  ;;  %v1858_v3 = vpop.f32.mrb[70].mxu0 }
 0x3d1   :  { %3663 = vtanh.f32 %v1855_v49  ;;  %v1859_v48 = vadd.f32 %v1858_v3, %v4781_v18  ;;  %v1860_v55 = vpop.f32.mrb[71].mxu0  ;;  %2325 = vmatprep.mubr.bf16.mxu1 %v2002_v22  ;;  %v2508_v22 = vld [vmem:[#allocation8 + $0xe0] sm:$0xff] }
 0x3d2   :  { %3665 = vtanh.f32 %v1857_v50  ;;  %v1861_v57 = vadd.f32 %v1860_v55, %v4784_v24  ;;  %2326 = vmatmul.mubr.bf16.gmra.mrb[124].mxu1 %v2001_v40  ;;  %v2509_v50 = vld [vmem:[#allocation8 + $0xe8] sm:$0xff] }
 0x3d3   :  { %v3656_v58 = vpop.eup %3655  ;;  %3667 = vtanh.f32 %v1859_v48  ;;  %v2967_v55 = vpack.c.bf16 %v2509_v50, %v2508_v22 }
 0x3d4   :  { %v3658_v62 = vpop.eup %3657  ;;  %3669 = vtanh.f32 %v1861_v57 }
 0x3d5   :  { %v3660_v1 = vpop.eup %3659  ;;  %2968 = vmatpush1.bf16.msra.mxu0 %v2967_v55 }
 0x3d6   :  { %v3662_v36 = vpop.eup %3661  ;;  %v1864_v2 = vpop.f32.mrb[72].mxu0  ;;  %v2003_v63 = vpack.c.bf16 %v3660_v1, %v3656_v58  ;;  %2969 = vmatprep.subr.bf16.mxu0 %v3972_v11 }
 0x3d7   :  { %v1865_v60 = vadd.f32 %v1864_v2, %v4781_v18  ;;  %v1866_v21 = vpop.f32.mrb[73].mxu0  ;;  %v2004_v14 = vpack.c.bf16 %v3662_v36, %v3658_v62 }
 0x3d8   :  { %v1867_v53 = vadd.f32 %v1866_v21, %v4784_v24  ;;  %v1868_v25 = vpop.f32.mrb[74].mxu0 }
 0x3d9   :  { %3671 = vtanh.f32 %v1865_v60  ;;  %v1869_v10 = vadd.f32 %v1868_v25, %v4781_v18  ;;  %v1870_v29 = vpop.f32.mrb[75].mxu0  ;;  %2335 = vmatprep.mubr.bf16.mxu1 %v2004_v14  ;;  %v2511_v25 = vld [vmem:[#allocation8 + $0xf8] sm:$0xff] }
 0x3da   :  { %3673 = vtanh.f32 %v1867_v53  ;;  %v1871_v9 = vadd.f32 %v1870_v29, %v4784_v24  ;;  %2336 = vmatmul.mubr.bf16.gmra.mrb[128].mxu1 %v2003_v63  ;;  %v2510_v53 = vld [vmem:[#allocation8 + $0xf0] sm:$0xff] }
 0x3db   :  { %v3664_v56 = vpop.eup %3663  ;;  %3675 = vtanh.f32 %v1869_v10 }
 0x3dc   :  { %v3666_v5 = vpop.eup %3665  ;;  %3677 = vtanh.f32 %v1871_v9  ;;  %v2970_v9 = vpack.c.bf16 %v2511_v25, %v2510_v53 }
 0x3dd   :  { %v3668_v17 = vpop.eup %3667 }
 0x3de   :  { %v3670_v30 = vpop.eup %3669  ;;  %v1874_v32 = vpop.f32.mrb[76].mxu0  ;;  %v2005_v59 = vpack.c.bf16 %v3668_v17, %v3664_v56  ;;  %2971 = vmatpush1.bf16.msra.mxu0 %v2970_v9 }
 0x3df   :  { %v1875_v42 = vadd.f32 %v1874_v32, %v4781_v18  ;;  %v1876_v7 = vpop.f32.mrb[77].mxu0  ;;  %v2006_v41 = vpack.c.bf16 %v3670_v30, %v3666_v5 }
 0x3e0   :  { %v1877_v12 = vadd.f32 %v1876_v7, %v4784_v24  ;;  %v1878_v35 = vpop.f32.mrb[78].mxu0 }
 0x3e1   :  { %3679 = vtanh.f32 %v1875_v42  ;;  %v1879_v43 = vadd.f32 %v1878_v35, %v4781_v18  ;;  %v1880_v44 = vpop.f32.mrb[79].mxu0  ;;  %2345 = vmatprep.mubr.bf16.mxu1 %v2006_v41 }
 0x3e2   :  { %3681 = vtanh.f32 %v1877_v12  ;;  %v1881_v54 = vadd.f32 %v1880_v44, %v4784_v24  ;;  %2346 = vmatmul.mubr.bf16.gmra.mrb[132].mxu1 %v2005_v59 }
 0x3e3   :  { %v3672_v51 = vpop.eup %3671  ;;  %3683 = vtanh.f32 %v1879_v43 }
 0x3e4   :  { %v3674_v8 = vpop.eup %3673  ;;  %3685 = vtanh.f32 %v1881_v54 }
 0x3e5   :  { %v3676_v45 = vpop.eup %3675 }
 0x3e6   :  { %v3678_v46 = vpop.eup %3677  ;;  %v1884_v31 = vpop.f32.mrb[80].mxu0  ;;  %v2007_v20 = vpack.c.bf16 %v3676_v45, %v3672_v51 }
 0x3e7   :  { %v1885_v39 = vadd.f32 %v1884_v31, %v4781_v18  ;;  %v1886_v47 = vpop.f32.mrb[81].mxu0  ;;  %v2008_v27 = vpack.c.bf16 %v3678_v46, %v3674_v8 }
 0x3e8   :  { %v1887_v23 = vadd.f32 %v1886_v47, %v4784_v24  ;;  %v1888_v37 = vpop.f32.mrb[82].mxu0 }
 0x3e9   :  { %3687 = vtanh.f32 %v1885_v39  ;;  %v1889_v26 = vadd.f32 %v1888_v37, %v4781_v18  ;;  %v1890_v34 = vpop.f32.mrb[83].mxu0  ;;  %2355 = vmatprep.mubr.bf16.mxu1 %v2008_v27 }
 0x3ea   :  { %3689 = vtanh.f32 %v1887_v23  ;;  %v1891_v52 = vadd.f32 %v1890_v34, %v4784_v24  ;;  %2356 = vmatmul.mubr.bf16.gmra.mrb[136].mxu1 %v2007_v20 }
 0x3eb   :  { %v3680_v38 = vpop.eup %3679  ;;  %3691 = vtanh.f32 %v1889_v26 }
 0x3ec   :  { %v3682_v16 = vpop.eup %3681  ;;  %3693 = vtanh.f32 %v1891_v52 }
 0x3ed   :  { %v3684_v61 = vpop.eup %3683 }
 0x3ee   :  { %v3686_v0 = vpop.eup %3685  ;;  %v1894_v19 = vpop.f32.mrb[84].mxu0  ;;  %v2009_v28 = vpack.c.bf16 %v3684_v61, %v3680_v38 }
 0x3ef   :  { %v1895_v33 = vadd.f32 %v1894_v19, %v4781_v18  ;;  %v1896_v15 = vpop.f32.mrb[85].mxu0  ;;  %v2010_v40 = vpack.c.bf16 %v3686_v0, %v3682_v16 }
 0x3f0   :  { %v1897_v49 = vadd.f32 %v1896_v15, %v4784_v24  ;;  %v1898_v13 = vpop.f32.mrb[86].mxu0 }
 0x3f1   :  { %3695 = vtanh.f32 %v1895_v33  ;;  %v1899_v3 = vadd.f32 %v1898_v13, %v4781_v18  ;;  %v1900_v48 = vpop.f32.mrb[87].mxu0  ;;  %2365 = vmatprep.mubr.bf16.mxu1 %v2010_v40 }
 0x3f2   :  { %3697 = vtanh.f32 %v1897_v49  ;;  %v1901_v57 = vadd.f32 %v1900_v48, %v4784_v24  ;;  %2366 = vmatmul.mubr.bf16.gmra.mrb[140].mxu1 %v2009_v28 }
 0x3f3   :  { %v3688_v58 = vpop.eup %3687  ;;  %3699 = vtanh.f32 %v1899_v3 }
 0x3f4   :  { %v3690_v62 = vpop.eup %3689  ;;  %3701 = vtanh.f32 %v1901_v57 }
 0x3f5   :  { %v3692_v1 = vpop.eup %3691 }
 0x3f6   :  { %v3694_v36 = vpop.eup %3693  ;;  %v1904_v2 = vpop.f32.mrb[88].mxu0  ;;  %v2011_v63 = vpack.c.bf16 %v3692_v1, %v3688_v58 }
 0x3f7   :  { %v1905_v60 = vadd.f32 %v1904_v2, %v4781_v18  ;;  %v1906_v21 = vpop.f32.mrb[89].mxu0  ;;  %v2012_v14 = vpack.c.bf16 %v3694_v36, %v3690_v62 }
 0x3f8   :  { %v1907_v10 = vadd.f32 %v1906_v21, %v4784_v24  ;;  %v1908_v29 = vpop.f32.mrb[90].mxu0 }
 0x3f9   :  { %3703 = vtanh.f32 %v1905_v60  ;;  %v1909_v56 = vadd.f32 %v1908_v29, %v4781_v18  ;;  %v1910_v5 = vpop.f32.mrb[91].mxu0  ;;  %2375 = vmatprep.mubr.bf16.mxu1 %v2012_v14 }
 0x3fa   :  { %3705 = vtanh.f32 %v1907_v10  ;;  %v1911_v11 = vadd.f32 %v1910_v5, %v4784_v24  ;;  %2376 = vmatmul.mubr.bf16.gmra.mrb[144].mxu1 %v2011_v63 }
 0x3fb   :  { %v3696_v17 = vpop.eup %3695  ;;  %3707 = vtanh.f32 %v1909_v56 }
 0x3fc   :  { %v3698_v30 = vpop.eup %3697  ;;  %3709 = vtanh.f32 %v1911_v11 }
 0x3fd   :  { %v3700_v32 = vpop.eup %3699 }
 0x3fe   :  { %v3702_v59 = vpop.eup %3701  ;;  %v1914_v42 = vpop.f32.mrb[92].mxu0  ;;  %v2013_v7 = vpack.c.bf16 %v3700_v32, %v3696_v17 }
 0x3ff   :  { %v1915_v41 = vadd.f32 %v1914_v42, %v4781_v18  ;;  %v1916_v12 = vpop.f32.mrb[93].mxu0  ;;  %v2014_v35 = vpack.c.bf16 %v3702_v59, %v3698_v30 }
 0x400   :  { %v1917_v43 = vadd.f32 %v1916_v12, %v4784_v24  ;;  %v1918_v44 = vpop.f32.mrb[94].mxu0 }
 0x401   :  { %3711 = vtanh.f32 %v1915_v41  ;;  %v1919_v54 = vadd.f32 %v1918_v44, %v4781_v18  ;;  %v1920_v51 = vpop.f32.mrb[95].mxu0  ;;  %2385 = vmatprep.mubr.bf16.mxu1 %v2014_v35 }
 0x402   :  { %3713 = vtanh.f32 %v1917_v43  ;;  %v1921_v8 = vadd.f32 %v1920_v51, %v4784_v24  ;;  %2386 = vmatmul.mubr.bf16.gmra.mrb[148].mxu1 %v2013_v7  ;;  %v2051_v24 = vld [vmem:[%s4999_s10] sm:$0x3] }
 0x403   :  { %v3704_v45 = vpop.eup %3703  ;;  %3715 = vtanh.f32 %v1919_v54  ;;  %v4868_v52 = vrot.slane %v2051_v24, %v4310_v4  ;;  %v4871_v38 = vrot.slane %v2051_v24, %v4315_v6 }
 0x404   :  { %v3706_v46 = vpop.eup %3705  ;;  %3717 = vtanh.f32 %v1921_v8 }
 0x405   :  { %v3708_v31 = vpop.eup %3707 }
 0x406   :  { %v3710_v20 = vpop.eup %3709  ;;  %v2015_v39 = vpack.c.bf16 %v3708_v31, %v3704_v45 }
 0x407   :  { %v2016_v47 = vpack.c.bf16 %v3710_v20, %v3706_v46 }
 0x409   :  { %2395 = vmatprep.mubr.bf16.mxu1 %v2016_v47 }
 0x40a   :  { %2396 = vmatmul.mubr.bf16.gmra.mrb[152].mxu1 %v2015_v39 }
 0x40b   :  { %v3712_v27 = vpop.eup %3711 }
 0x40c   :  { %v3714_v23 = vpop.eup %3713 }
 0x40d   :  { %v3716_v37 = vpop.eup %3715 }
 0x40e   :  { %v3718_v18 = vpop.eup %3717  ;;  %v2017_v26 = vpack.c.bf16 %v3716_v37, %v3712_v27 }
 0x40f   :  { %v2018_v34 = vpack.c.bf16 %v3718_v18, %v3714_v23 }
 0x411   :  { %2405 = vmatprep.mubr.bf16.mxu1 %v2018_v34 }
 0x412   :  { %2406 = vmatmul.mubr.bf16.gmra.mrb[156].mxu1 %v2017_v26 }
 0x46d   :  { %v2257_v16 = vpop.f32.mrb[96].mxu1 }
 0x46e   :  { %v2258_v61 = vadd.f32 %v2257_v16, %v4868_v52  ;;  %v2259_v0 = vpop.f32.mrb[97].mxu1 }
 0x46f   :  { %v2260_v19 = vadd.f32 %v2259_v0, %v4871_v38  ;;  %v2261_v28 = vpop.f32.mrb[98].mxu1 }
 0x470   :  { %v2263_v33 = vpop.f32.mrb[99].mxu1  ;;  %v2262_v40 = vadd.f32 %v2261_v28, %v4868_v52 }
 0x471   :  { %3719 = vtanh.f32 %v2260_v19  ;;  %v2264_v15 = vadd.f32 %v2263_v33, %v4871_v38 }
 0x472   :  { %3721 = vtanh.f32 %v2258_v61 }
 0x473   :  { %3723 = vtanh.f32 %v2264_v15 }
 0x474   :  { %3725 = vtanh.f32 %v2262_v40 }
 0x475   :  { %v2267_v4 = vpop.f32.mrb[100].mxu1 }
 0x476   :  { %v2268_v6 = vadd.f32 %v2267_v4, %v4868_v52  ;;  %v2269_v49 = vpop.f32.mrb[101].mxu1 }
 0x477   :  { %v2270_v13 = vadd.f32 %v2269_v49, %v4871_v38  ;;  %v2271_v22 = vpop.f32.mrb[102].mxu1 }
 0x478   :  { %v2273_v50 = vpop.f32.mrb[103].mxu1  ;;  %v2272_v48 = vadd.f32 %v2271_v22, %v4868_v52 }
 0x479   :  { %3727 = vtanh.f32 %v2270_v13  ;;  %v2274_v3 = vadd.f32 %v2273_v50, %v4871_v38 }
 0x47a   :  { %3729 = vtanh.f32 %v2268_v6 }
 0x47b   :  { %v3720_v55 = vpop.eup %3719  ;;  %3731 = vtanh.f32 %v2274_v3 }
 0x47c   :  { %v3722_v57 = vpop.eup %3721  ;;  %2583 = vmatprep.mubr.f32.mxu0 %v3720_v55  ;;  %3733 = vtanh.f32 %v2272_v48 }
 0x47d   :  { %v3724_v58 = vpop.eup %3723  ;;  %v2277_v62 = vpop.f32.mrb[104].mxu1  ;;  %2584 = vmatmul.mubr.f32.vlgmr.msra.gmra.mrb[96].mxu0 %v3722_v57 }
 0x47e   :  { %v2278_v1 = vadd.f32 %v2277_v62, %v4868_v52  ;;  %v2279_v36 = vpop.f32.mrb[105].mxu1  ;;  %2588 = vmatprep.mubr.f32.mxu0 %v3724_v58  ;;  %v3726_v60 = vpop.eup %3725 }
 0x47f   :  { %v2280_v2 = vadd.f32 %v2279_v36, %v4871_v38  ;;  %v2281_v63 = vpop.f32.mrb[106].mxu1 }
 0x480   :  { %v2283_v21 = vpop.f32.mrb[107].mxu1  ;;  %v2282_v53 = vadd.f32 %v2281_v63, %v4868_v52 }
 0x481   :  { %3735 = vtanh.f32 %v2280_v2  ;;  %v2284_v14 = vadd.f32 %v2283_v21, %v4871_v38  ;;  %2589 = vmatmul.mubr.f32.gmra.mrb[98].mxu0 %v3726_v60 }
 0x482   :  { %3737 = vtanh.f32 %v2278_v1 }
 0x483   :  { %v3728_v25 = vpop.eup %3727  ;;  %3739 = vtanh.f32 %v2284_v14 }
 0x484   :  { %v3730_v10 = vpop.eup %3729  ;;  %2593 = vmatprep.mubr.f32.mxu0 %v3728_v25  ;;  %3741 = vtanh.f32 %v2282_v53 }
 0x485   :  { %v3732_v29 = vpop.eup %3731  ;;  %v2287_v9 = vpop.f32.mrb[108].mxu1  ;;  %2594 = vmatmul.mubr.f32.gmra.mrb[100].mxu0 %v3730_v10 }
 0x486   :  { %v2288_v56 = vadd.f32 %v2287_v9, %v4868_v52  ;;  %v2289_v5 = vpop.f32.mrb[109].mxu1  ;;  %2598 = vmatprep.mubr.f32.mxu0 %v3732_v29  ;;  %v3734_v30 = vpop.eup %3733 }
 0x487   :  { %v2290_v11 = vadd.f32 %v2289_v5, %v4871_v38  ;;  %v2291_v17 = vpop.f32.mrb[110].mxu1 }
 0x488   :  { %v2293_v32 = vpop.f32.mrb[111].mxu1  ;;  %v2292_v42 = vadd.f32 %v2291_v17, %v4868_v52 }
 0x489   :  { %3743 = vtanh.f32 %v2290_v11  ;;  %v2294_v59 = vadd.f32 %v2293_v32, %v4871_v38  ;;  %2599 = vmatmul.mubr.f32.gmra.mrb[102].mxu0 %v3734_v30 }
 0x48a   :  { %3745 = vtanh.f32 %v2288_v56 }
 0x48b   :  { %v3736_v7 = vpop.eup %3735  ;;  %3747 = vtanh.f32 %v2294_v59 }
 0x48c   :  { %v3738_v41 = vpop.eup %3737  ;;  %2603 = vmatprep.mubr.f32.mxu0 %v3736_v7  ;;  %3749 = vtanh.f32 %v2292_v42 }
 0x48d   :  { %v3740_v12 = vpop.eup %3739  ;;  %v2297_v35 = vpop.f32.mrb[112].mxu1  ;;  %2604 = vmatmul.mubr.f32.gmra.mrb[104].mxu0 %v3738_v41 }
 0x48e   :  { %v2298_v43 = vadd.f32 %v2297_v35, %v4868_v52  ;;  %v2299_v44 = vpop.f32.mrb[113].mxu1  ;;  %2608 = vmatprep.mubr.f32.mxu0 %v3740_v12  ;;  %v3742_v8 = vpop.eup %3741 }
 0x48f   :  { %v2300_v54 = vadd.f32 %v2299_v44, %v4871_v38  ;;  %v2301_v51 = vpop.f32.mrb[114].mxu1 }
 0x490   :  { %v2303_v45 = vpop.f32.mrb[115].mxu1  ;;  %v2302_v31 = vadd.f32 %v2301_v51, %v4868_v52 }
 0x491   :  { %3751 = vtanh.f32 %v2300_v54  ;;  %v2304_v46 = vadd.f32 %v2303_v45, %v4871_v38  ;;  %2609 = vmatmul.mubr.f32.gmra.mrb[106].mxu0 %v3742_v8 }
 0x492   :  { %3753 = vtanh.f32 %v2298_v43 }
 0x493   :  { %v3744_v20 = vpop.eup %3743  ;;  %3755 = vtanh.f32 %v2304_v46 }
 0x494   :  { %v3746_v39 = vpop.eup %3745  ;;  %2613 = vmatprep.mubr.f32.mxu0 %v3744_v20  ;;  %3757 = vtanh.f32 %v2302_v31 }
 0x495   :  { %v3748_v47 = vpop.eup %3747  ;;  %v2307_v27 = vpop.f32.mrb[116].mxu1  ;;  %2614 = vmatmul.mubr.f32.gmra.mrb[108].mxu0 %v3746_v39 }
 0x496   :  { %v2308_v23 = vadd.f32 %v2307_v27, %v4868_v52  ;;  %v2309_v37 = vpop.f32.mrb[117].mxu1  ;;  %2618 = vmatprep.mubr.f32.mxu0 %v3748_v47  ;;  %v3750_v34 = vpop.eup %3749 }
 0x497   :  { %v2310_v18 = vadd.f32 %v2309_v37, %v4871_v38  ;;  %v2311_v26 = vpop.f32.mrb[118].mxu1 }
 0x498   :  { %v2313_v24 = vpop.f32.mrb[119].mxu1  ;;  %v2312_v61 = vadd.f32 %v2311_v26, %v4868_v52 }
 0x499   :  { %3759 = vtanh.f32 %v2310_v18  ;;  %v2314_v16 = vadd.f32 %v2313_v24, %v4871_v38  ;;  %2619 = vmatmul.mubr.f32.gmra.mrb[110].mxu0 %v3750_v34 }
 0x49a   :  { %3761 = vtanh.f32 %v2308_v23 }
 0x49b   :  { %v3752_v0 = vpop.eup %3751  ;;  %3763 = vtanh.f32 %v2314_v16 }
 0x49c   :  { %v3754_v19 = vpop.eup %3753  ;;  %2623 = vmatprep.mubr.f32.mxu0 %v3752_v0  ;;  %3765 = vtanh.f32 %v2312_v61 }
 0x49d   :  { %v3756_v28 = vpop.eup %3755  ;;  %v2317_v33 = vpop.f32.mrb[120].mxu1  ;;  %2624 = vmatmul.mubr.f32.gmra.mrb[112].mxu0 %v3754_v19 }
 0x49e   :  { %v2318_v15 = vadd.f32 %v2317_v33, %v4868_v52  ;;  %v2319_v40 = vpop.f32.mrb[121].mxu1  ;;  %2628 = vmatprep.mubr.f32.mxu0 %v3756_v28  ;;  %v3758_v49 = vpop.eup %3757 }
 0x49f   :  { %v2320_v4 = vadd.f32 %v2319_v40, %v4871_v38  ;;  %v2321_v6 = vpop.f32.mrb[122].mxu1 }
 0x4a0   :  { %v2323_v13 = vpop.f32.mrb[123].mxu1  ;;  %v2322_v50 = vadd.f32 %v2321_v6, %v4868_v52 }
 0x4a1   :  { %3767 = vtanh.f32 %v2320_v4  ;;  %v2324_v22 = vadd.f32 %v2323_v13, %v4871_v38  ;;  %2629 = vmatmul.mubr.f32.gmra.mrb[114].mxu0 %v3758_v49 }
 0x4a2   :  { %3769 = vtanh.f32 %v2318_v15 }
 0x4a3   :  { %v3760_v3 = vpop.eup %3759  ;;  %3771 = vtanh.f32 %v2324_v22 }
 0x4a4   :  { %v3762_v48 = vpop.eup %3761  ;;  %2633 = vmatprep.mubr.f32.mxu0 %v3760_v3  ;;  %3773 = vtanh.f32 %v2322_v50 }
 0x4a5   :  { %v3764_v55 = vpop.eup %3763  ;;  %v2327_v57 = vpop.f32.mrb[124].mxu1  ;;  %2634 = vmatmul.mubr.f32.gmra.mrb[116].mxu0 %v3762_v48 }
 0x4a6   :  { %v2328_v58 = vadd.f32 %v2327_v57, %v4868_v52  ;;  %v2329_v62 = vpop.f32.mrb[125].mxu1  ;;  %2638 = vmatprep.mubr.f32.mxu0 %v3764_v55  ;;  %v3766_v2 = vpop.eup %3765 }
 0x4a7   :  { %v2330_v1 = vadd.f32 %v2329_v62, %v4871_v38  ;;  %v2331_v36 = vpop.f32.mrb[126].mxu1 }
 0x4a8   :  { %v2333_v63 = vpop.f32.mrb[127].mxu1  ;;  %v2332_v21 = vadd.f32 %v2331_v36, %v4868_v52 }
 0x4a9   :  { %3775 = vtanh.f32 %v2330_v1  ;;  %v2334_v60 = vadd.f32 %v2333_v63, %v4871_v38  ;;  %2639 = vmatmul.mubr.f32.gmra.mrb[118].mxu0 %v3766_v2 }
 0x4aa   :  { %3777 = vtanh.f32 %v2328_v58 }
 0x4ab   :  { %v3768_v14 = vpop.eup %3767  ;;  %3779 = vtanh.f32 %v2334_v60 }
 0x4ac   :  { %v3770_v53 = vpop.eup %3769  ;;  %2643 = vmatprep.mubr.f32.mxu0 %v3768_v14  ;;  %3781 = vtanh.f32 %v2332_v21 }
 0x4ad   :  { %v3772_v25 = vpop.eup %3771  ;;  %v2337_v10 = vpop.f32.mrb[128].mxu1  ;;  %2644 = vmatmul.mubr.f32.gmra.mrb[120].mxu0 %v3770_v53 }
 0x4ae   :  { %v2338_v29 = vadd.f32 %v2337_v10, %v4868_v52  ;;  %v2339_v9 = vpop.f32.mrb[129].mxu1  ;;  %2648 = vmatprep.mubr.f32.mxu0 %v3772_v25  ;;  %v3774_v11 = vpop.eup %3773 }
 0x4af   :  { %v2340_v56 = vadd.f32 %v2339_v9, %v4871_v38  ;;  %v2341_v5 = vpop.f32.mrb[130].mxu1 }
 0x4b0   :  { %v2343_v17 = vpop.f32.mrb[131].mxu1  ;;  %v2342_v32 = vadd.f32 %v2341_v5, %v4868_v52 }
 0x4b1   :  { %3783 = vtanh.f32 %v2340_v56  ;;  %v2344_v30 = vadd.f32 %v2343_v17, %v4871_v38  ;;  %2649 = vmatmul.mubr.f32.gmra.mrb[122].mxu0 %v3774_v11 }
 0x4b2   :  { %3785 = vtanh.f32 %v2338_v29 }
 0x4b3   :  { %v3776_v59 = vpop.eup %3775  ;;  %3787 = vtanh.f32 %v2344_v30 }
 0x4b4   :  { %v3778_v42 = vpop.eup %3777  ;;  %2653 = vmatprep.mubr.f32.mxu0 %v3776_v59  ;;  %3789 = vtanh.f32 %v2342_v32 }
 0x4b5   :  { %v3780_v7 = vpop.eup %3779  ;;  %v2347_v41 = vpop.f32.mrb[132].mxu1  ;;  %2654 = vmatmul.mubr.f32.gmra.mrb[124].mxu0 %v3778_v42 }
 0x4b6   :  { %v2348_v12 = vadd.f32 %v2347_v41, %v4868_v52  ;;  %v2349_v35 = vpop.f32.mrb[133].mxu1  ;;  %2658 = vmatprep.mubr.f32.mxu0 %v3780_v7  ;;  %v3782_v54 = vpop.eup %3781 }
 0x4b7   :  { %v2350_v43 = vadd.f32 %v2349_v35, %v4871_v38  ;;  %v2351_v44 = vpop.f32.mrb[134].mxu1 }
 0x4b8   :  { %v2353_v51 = vpop.f32.mrb[135].mxu1  ;;  %v2352_v45 = vadd.f32 %v2351_v44, %v4868_v52 }
 0x4b9   :  { %3791 = vtanh.f32 %v2350_v43  ;;  %v2354_v8 = vadd.f32 %v2353_v51, %v4871_v38  ;;  %2659 = vmatmul.mubr.f32.gmra.mrb[126].mxu0 %v3782_v54 }
 0x4ba   :  { %3793 = vtanh.f32 %v2348_v12 }
 0x4bb   :  { %v3784_v46 = vpop.eup %3783  ;;  %3795 = vtanh.f32 %v2354_v8 }
 0x4bc   :  { %v3786_v31 = vpop.eup %3785  ;;  %2663 = vmatprep.mubr.f32.mxu0 %v3784_v46  ;;  %3797 = vtanh.f32 %v2352_v45 }
 0x4bd   :  { %v3788_v20 = vpop.eup %3787  ;;  %v2357_v39 = vpop.f32.mrb[136].mxu1  ;;  %2664 = vmatmul.mubr.f32.gmra.mrb[128].mxu0 %v3786_v31 }
 0x4be   :  { %v2358_v47 = vadd.f32 %v2357_v39, %v4868_v52  ;;  %v2359_v27 = vpop.f32.mrb[137].mxu1  ;;  %2668 = vmatprep.mubr.f32.mxu0 %v3788_v20  ;;  %v3790_v18 = vpop.eup %3789 }
 0x4bf   :  { %v2360_v23 = vadd.f32 %v2359_v27, %v4871_v38  ;;  %v2361_v37 = vpop.f32.mrb[138].mxu1 }
 0x4c0   :  { %v2363_v26 = vpop.f32.mrb[139].mxu1  ;;  %v2362_v24 = vadd.f32 %v2361_v37, %v4868_v52 }
 0x4c1   :  { %3799 = vtanh.f32 %v2360_v23  ;;  %v2364_v34 = vadd.f32 %v2363_v26, %v4871_v38  ;;  %2669 = vmatmul.mubr.f32.gmra.mrb[130].mxu0 %v3790_v18 }
 0x4c2   :  { %3801 = vtanh.f32 %v2358_v47 }
 0x4c3   :  { %v3792_v16 = vpop.eup %3791  ;;  %3803 = vtanh.f32 %v2364_v34 }
 0x4c4   :  { %v3794_v61 = vpop.eup %3793  ;;  %2673 = vmatprep.mubr.f32.mxu0 %v3792_v16  ;;  %3805 = vtanh.f32 %v2362_v24 }
 0x4c5   :  { %v3796_v0 = vpop.eup %3795  ;;  %v2367_v19 = vpop.f32.mrb[140].mxu1  ;;  %2674 = vmatmul.mubr.f32.gmra.mrb[132].mxu0 %v3794_v61 }
 0x4c6   :  { %v2368_v28 = vadd.f32 %v2367_v19, %v4868_v52  ;;  %v2369_v33 = vpop.f32.mrb[141].mxu1  ;;  %2678 = vmatprep.mubr.f32.mxu0 %v3796_v0  ;;  %v3798_v4 = vpop.eup %3797 }
 0x4c7   :  { %v2370_v15 = vadd.f32 %v2369_v33, %v4871_v38  ;;  %v2371_v40 = vpop.f32.mrb[142].mxu1 }
 0x4c8   :  { %v2373_v6 = vpop.f32.mrb[143].mxu1  ;;  %v2372_v13 = vadd.f32 %v2371_v40, %v4868_v52 }
 0x4c9   :  { %3807 = vtanh.f32 %v2370_v15  ;;  %v2374_v49 = vadd.f32 %v2373_v6, %v4871_v38  ;;  %2679 = vmatmul.mubr.f32.gmra.mrb[134].mxu0 %v3798_v4 }
 0x4ca   :  { %3809 = vtanh.f32 %v2368_v28 }
 0x4cb   :  { %v3800_v22 = vpop.eup %3799  ;;  %3811 = vtanh.f32 %v2374_v49 }
 0x4cc   :  { %v3802_v50 = vpop.eup %3801  ;;  %2683 = vmatprep.mubr.f32.mxu0 %v3800_v22  ;;  %3813 = vtanh.f32 %v2372_v13 }
 0x4cd   :  { %v3804_v3 = vpop.eup %3803  ;;  %v2377_v48 = vpop.f32.mrb[144].mxu1  ;;  %2684 = vmatmul.mubr.f32.gmra.mrb[136].mxu0 %v3802_v50 }
 0x4ce   :  { %v2378_v55 = vadd.f32 %v2377_v48, %v4868_v52  ;;  %v2379_v57 = vpop.f32.mrb[145].mxu1  ;;  %2688 = vmatprep.mubr.f32.mxu0 %v3804_v3  ;;  %v3806_v1 = vpop.eup %3805 }
 0x4cf   :  { %v2380_v58 = vadd.f32 %v2379_v57, %v4871_v38  ;;  %v2381_v62 = vpop.f32.mrb[146].mxu1 }
 0x4d0   :  { %v2383_v36 = vpop.f32.mrb[147].mxu1  ;;  %v2382_v63 = vadd.f32 %v2381_v62, %v4868_v52 }
 0x4d1   :  { %3815 = vtanh.f32 %v2380_v58  ;;  %v2384_v2 = vadd.f32 %v2383_v36, %v4871_v38  ;;  %2689 = vmatmul.mubr.f32.gmra.mrb[138].mxu0 %v3806_v1 }
 0x4d2   :  { %3817 = vtanh.f32 %v2378_v55 }
 0x4d3   :  { %v3808_v60 = vpop.eup %3807  ;;  %3819 = vtanh.f32 %v2384_v2 }
 0x4d4   :  { %v3810_v21 = vpop.eup %3809  ;;  %2693 = vmatprep.mubr.f32.mxu0 %v3808_v60  ;;  %3821 = vtanh.f32 %v2382_v63 }
 0x4d5   :  { %v3812_v14 = vpop.eup %3811  ;;  %v2387_v53 = vpop.f32.mrb[148].mxu1  ;;  %2694 = vmatmul.mubr.f32.gmra.mrb[140].mxu0 %v3810_v21 }
 0x4d6   :  { %v2388_v25 = vadd.f32 %v2387_v53, %v4868_v52  ;;  %v2389_v10 = vpop.f32.mrb[149].mxu1  ;;  %2698 = vmatprep.mubr.f32.mxu0 %v3812_v14  ;;  %v3814_v56 = vpop.eup %3813 }
 0x4d7   :  { %v2390_v29 = vadd.f32 %v2389_v10, %v4871_v38  ;;  %v2391_v9 = vpop.f32.mrb[150].mxu1 }
 0x4d8   :  { %v2393_v5 = vpop.f32.mrb[151].mxu1  ;;  %v2392_v17 = vadd.f32 %v2391_v9, %v4868_v52 }
 0x4d9   :  { %3823 = vtanh.f32 %v2390_v29  ;;  %v2394_v11 = vadd.f32 %v2393_v5, %v4871_v38  ;;  %2699 = vmatmul.mubr.f32.gmra.mrb[142].mxu0 %v3814_v56 }
 0x4da   :  { %3825 = vtanh.f32 %v2388_v25 }
 0x4db   :  { %v3816_v30 = vpop.eup %3815  ;;  %3827 = vtanh.f32 %v2394_v11 }
 0x4dc   :  { %v3818_v32 = vpop.eup %3817  ;;  %2703 = vmatprep.mubr.f32.mxu0 %v3816_v30  ;;  %3829 = vtanh.f32 %v2392_v17 }
 0x4dd   :  { %v3820_v59 = vpop.eup %3819  ;;  %v2397_v42 = vpop.f32.mrb[152].mxu1  ;;  %2704 = vmatmul.mubr.f32.gmra.mrb[144].mxu0 %v3818_v32 }
 0x4de   :  { %v2398_v7 = vadd.f32 %v2397_v42, %v4868_v52  ;;  %v2399_v41 = vpop.f32.mrb[153].mxu1  ;;  %2708 = vmatprep.mubr.f32.mxu0 %v3820_v59  ;;  %v3822_v43 = vpop.eup %3821 }
 0x4df   :  { %v2400_v12 = vadd.f32 %v2399_v41, %v4871_v38  ;;  %v2401_v35 = vpop.f32.mrb[154].mxu1 }
 0x4e0   :  { %v2403_v44 = vpop.f32.mrb[155].mxu1  ;;  %v2402_v51 = vadd.f32 %v2401_v35, %v4868_v52 }
 0x4e1   :  { %3831 = vtanh.f32 %v2400_v12  ;;  %v2404_v54 = vadd.f32 %v2403_v44, %v4871_v38  ;;  %2709 = vmatmul.mubr.f32.gmra.mrb[146].mxu0 %v3822_v43 }
 0x4e2   :  { %3833 = vtanh.f32 %v2398_v7 }
 0x4e3   :  { %v3824_v8 = vpop.eup %3823  ;;  %3835 = vtanh.f32 %v2404_v54 }
 0x4e4   :  { %v3826_v45 = vpop.eup %3825  ;;  %2713 = vmatprep.mubr.f32.mxu0 %v3824_v8  ;;  %3837 = vtanh.f32 %v2402_v51 }
 0x4e5   :  { %v3828_v46 = vpop.eup %3827  ;;  %v2407_v31 = vpop.f32.mrb[156].mxu1  ;;  %2714 = vmatmul.mubr.f32.gmra.mrb[148].mxu0 %v3826_v45 }
 0x4e6   :  { %v2408_v20 = vadd.f32 %v2407_v31, %v4868_v52  ;;  %v2409_v39 = vpop.f32.mrb[157].mxu1  ;;  %2718 = vmatprep.mubr.f32.mxu0 %v3828_v46  ;;  %v3830_v23 = vpop.eup %3829 }
 0x4e7   :  { %v2410_v47 = vadd.f32 %v2409_v39, %v4871_v38  ;;  %v2411_v27 = vpop.f32.mrb[158].mxu1 }
 0x4e8   :  { %v2413_v37 = vpop.f32.mrb[159].mxu1  ;;  %v2412_v26 = vadd.f32 %v2411_v27, %v4868_v52  ;;  %v4940_v52 = vld [vmem:[%s5001_s12] ss:$0 sm:$0xff]  ;;  %s3973_s12 = smov [#allocation10]  }
 0x4e9   :  { %3839 = vtanh.f32 %v2410_v47  ;;  %v2414_v18 = vadd.f32 %v2413_v37, %v4871_v38  ;;  %2719 = vmatmul.mubr.f32.gmra.mrb[150].mxu0 %v3830_v23  ;;  %s2781_s29 = sshll.u32 %s3973_s12, 4  ;;  %s2782_s29 = int_to_ptr.vmem [resolvable:$true] %s2781_s29 }
 0x4ea   :  { %3841 = vtanh.f32 %v2408_v20  ;;  %s3935_s30 = scalar_lea.vmem %s2782_s29, 4096  ;;  %p3940_p5 = scmp.lt.s32.totalorder %s2782_s29, %s2782_s29 }
 0x4eb   :  { %v3832_v34 = vpop.eup %3831  ;;  %3843 = vtanh.f32 %v2414_v18  ;;  %p3936_p4 = scmp.ne.s32.totalorder %s2782_s29, %s3935_s30  ;;  %p3941_p6 = scmp.lt.s32.totalorder %s3935_s30, %s3935_s30 }
 0x4ec   :  { %v3834_v24 = vpop.eup %3833  ;;  %2723 = vmatprep.mubr.f32.mxu0 %v3832_v34  ;;  %3845 = vtanh.f32 %v2412_v26 }
 0x4ed   :  { %v3836_v16 = vpop.eup %3835  ;;  %2724 = vmatmul.mubr.f32.gmra.mrb[152].mxu0 %v3834_v24  ;;  %p3942_p7 = por %p3941_p6, %p3940_p5 }
 0x4ee   :  { %2728 = vmatprep.mubr.f32.mxu0 %v3836_v16  ;;  %v3838_v61 = vpop.eup %3837 }
 0x4ef   :  { %p3943_p8 = pnand %p3942_p7, %p3936_p4 }
 0x4f1   :  { %2729 = vmatmul.mubr.f32.gmra.mrb[154].mxu0 %v3838_v61 }
 0x4f3   :  { %v3840_v0 = vpop.eup %3839 }
 0x4f4   :  { %v3842_v19 = vpop.eup %3841  ;;  %2733 = vmatprep.mubr.f32.mxu0 %v3840_v0 }
 0x4f5   :  { %v3844_v28 = vpop.eup %3843  ;;  %2734 = vmatmul.mubr.f32.gmra.mrb[156].mxu0 %v3842_v19 }
 0x4f6   :  { %2738 = vmatprep.mubr.f32.mxu0 %v3844_v28  ;;  %v3846_v38 = vpop.eup %3845 }
 0x4f9   :  { %2739 = vmatmul.mubr.f32.gmra.mrb[158].mxu0 %v3846_v38 }
 0x550   :  { %v2585_v33 = vpop.f32.mrb[96].mxu0 }
 0x551   :  { %v2586_v15 = vadd.f32 %v4940_v52, %v2585_v33  ;;  %v2587_v40 = vpop.f32.mrb[97].mxu0 }
 0x553   :  { %2744 = vst [vmem:[#allocation10] sm:$0xff] %v2586_v15 }
 0x554   :  { %v2590_v4 = vpop.f32.mrb[98].mxu0 }
 0x555   :  { %v2591_v6 = vadd.f32 %v4940_v52, %v2590_v4  ;;  %v2592_v49 = vpop.f32.mrb[99].mxu0 }
 0x557   :  { %2745 = vst [vmem:[#allocation10 + $0x8] sm:$0xff] %v2591_v6 }
 0x558   :  { %v2595_v13 = vpop.f32.mrb[100].mxu0 }
 0x559   :  { %v2596_v22 = vadd.f32 %v4940_v52, %v2595_v13  ;;  %v2597_v50 = vpop.f32.mrb[101].mxu0 }
 0x55b   :  { %2746 = vst [vmem:[#allocation10 + $0x10] sm:$0xff] %v2596_v22 }
 0x55c   :  { %v2600_v3 = vpop.f32.mrb[102].mxu0 }
 0x55d   :  { %v2601_v48 = vadd.f32 %v4940_v52, %v2600_v3  ;;  %v2602_v55 = vpop.f32.mrb[103].mxu0 }
 0x55f   :  { %2747 = vst [vmem:[#allocation10 + $0x18] sm:$0xff] %v2601_v48 }
 0x560   :  { %v2605_v57 = vpop.f32.mrb[104].mxu0 }
 0x561   :  { %v2606_v58 = vadd.f32 %v4940_v52, %v2605_v57  ;;  %v2607_v62 = vpop.f32.mrb[105].mxu0 }
 0x563   :  { %2748 = vst [vmem:[#allocation10 + $0x20] sm:$0xff] %v2606_v58 }
 0x564   :  { %v2610_v1 = vpop.f32.mrb[106].mxu0 }
 0x565   :  { %v2611_v36 = vadd.f32 %v4940_v52, %v2610_v1  ;;  %v2612_v2 = vpop.f32.mrb[107].mxu0 }
 0x567   :  { %2749 = vst [vmem:[#allocation10 + $0x28] sm:$0xff] %v2611_v36 }
 0x568   :  { %v2615_v63 = vpop.f32.mrb[108].mxu0 }
 0x569   :  { %v2616_v60 = vadd.f32 %v4940_v52, %v2615_v63  ;;  %v2617_v21 = vpop.f32.mrb[109].mxu0 }
 0x56b   :  { %2750 = vst [vmem:[#allocation10 + $0x30] sm:$0xff] %v2616_v60 }
 0x56c   :  { %v2620_v14 = vpop.f32.mrb[110].mxu0 }
 0x56d   :  { %v2621_v53 = vadd.f32 %v4940_v52, %v2620_v14  ;;  %v2622_v25 = vpop.f32.mrb[111].mxu0 }
 0x56f   :  { %2751 = vst [vmem:[#allocation10 + $0x38] sm:$0xff] %v2621_v53 }
 0x570   :  { %v2625_v10 = vpop.f32.mrb[112].mxu0 }
 0x571   :  { %v2626_v29 = vadd.f32 %v4940_v52, %v2625_v10  ;;  %v2627_v9 = vpop.f32.mrb[113].mxu0 }
 0x573   :  { %2752 = vst [vmem:[#allocation10 + $0x40] sm:$0xff] %v2626_v29 }
 0x574   :  { %v2630_v56 = vpop.f32.mrb[114].mxu0 }
 0x575   :  { %v2631_v5 = vadd.f32 %v4940_v52, %v2630_v56  ;;  %v2632_v11 = vpop.f32.mrb[115].mxu0 }
 0x577   :  { %2753 = vst [vmem:[#allocation10 + $0x48] sm:$0xff] %v2631_v5 }
 0x578   :  { %v2635_v17 = vpop.f32.mrb[116].mxu0 }
 0x579   :  { %v2636_v30 = vadd.f32 %v4940_v52, %v2635_v17  ;;  %v2637_v32 = vpop.f32.mrb[117].mxu0 }
 0x57b   :  { %2754 = vst [vmem:[#allocation10 + $0x50] sm:$0xff] %v2636_v30 }
 0x57c   :  { %v2640_v59 = vpop.f32.mrb[118].mxu0 }
 0x57d   :  { %v2641_v42 = vadd.f32 %v4940_v52, %v2640_v59  ;;  %v2642_v7 = vpop.f32.mrb[119].mxu0 }
 0x57f   :  { %2755 = vst [vmem:[#allocation10 + $0x58] sm:$0xff] %v2641_v42 }
 0x580   :  { %v2645_v41 = vpop.f32.mrb[120].mxu0 }
 0x581   :  { %v2646_v12 = vadd.f32 %v4940_v52, %v2645_v41  ;;  %v2647_v35 = vpop.f32.mrb[121].mxu0 }
 0x583   :  { %2756 = vst [vmem:[#allocation10 + $0x60] sm:$0xff] %v2646_v12 }
 0x584   :  { %v2650_v43 = vpop.f32.mrb[122].mxu0 }
 0x585   :  { %v2651_v44 = vadd.f32 %v4940_v52, %v2650_v43  ;;  %v2652_v54 = vpop.f32.mrb[123].mxu0 }
 0x587   :  { %2757 = vst [vmem:[#allocation10 + $0x68] sm:$0xff] %v2651_v44 }
 0x588   :  { %v2655_v51 = vpop.f32.mrb[124].mxu0 }
 0x589   :  { %v2656_v8 = vadd.f32 %v4940_v52, %v2655_v51  ;;  %v2657_v45 = vpop.f32.mrb[125].mxu0 }
 0x58b   :  { %2758 = vst [vmem:[#allocation10 + $0x70] sm:$0xff] %v2656_v8 }
 0x58c   :  { %v2660_v46 = vpop.f32.mrb[126].mxu0 }
 0x58d   :  { %v2661_v31 = vadd.f32 %v4940_v52, %v2660_v46  ;;  %v2662_v20 = vpop.f32.mrb[127].mxu0 }
 0x58f   :  { %2759 = vst [vmem:[#allocation10 + $0x78] sm:$0xff] %v2661_v31 }
 0x590   :  { %v2665_v39 = vpop.f32.mrb[128].mxu0 }
 0x591   :  { %v2666_v47 = vadd.f32 %v4940_v52, %v2665_v39  ;;  %v2667_v27 = vpop.f32.mrb[129].mxu0 }
 0x593   :  { %2760 = vst [vmem:[#allocation10 + $0x80] sm:$0xff] %v2666_v47 }
 0x594   :  { %v2670_v23 = vpop.f32.mrb[130].mxu0 }
 0x595   :  { %v2671_v37 = vadd.f32 %v4940_v52, %v2670_v23  ;;  %v2672_v18 = vpop.f32.mrb[131].mxu0 }
 0x597   :  { %2761 = vst [vmem:[#allocation10 + $0x88] sm:$0xff] %v2671_v37 }
 0x598   :  { %v2675_v26 = vpop.f32.mrb[132].mxu0 }
 0x599   :  { %v2676_v34 = vadd.f32 %v4940_v52, %v2675_v26  ;;  %v2677_v24 = vpop.f32.mrb[133].mxu0 }
 0x59b   :  { %2762 = vst [vmem:[#allocation10 + $0x90] sm:$0xff] %v2676_v34 }
 0x59c   :  { %v2680_v16 = vpop.f32.mrb[134].mxu0 }
 0x59d   :  { %v2681_v61 = vadd.f32 %v4940_v52, %v2680_v16  ;;  %v2682_v0 = vpop.f32.mrb[135].mxu0 }
 0x59f   :  { %2763 = vst [vmem:[#allocation10 + $0x98] sm:$0xff] %v2681_v61 }
 0x5a0   :  { %v2685_v19 = vpop.f32.mrb[136].mxu0 }
 0x5a1   :  { %v2686_v28 = vadd.f32 %v4940_v52, %v2685_v19  ;;  %v2687_v38 = vpop.f32.mrb[137].mxu0 }
 0x5a3   :  { %2764 = vst [vmem:[#allocation10 + $0xa0] sm:$0xff] %v2686_v28 }
 0x5a4   :  { %v2690_v33 = vpop.f32.mrb[138].mxu0 }
 0x5a5   :  { %v2691_v15 = vadd.f32 %v4940_v52, %v2690_v33  ;;  %v2692_v40 = vpop.f32.mrb[139].mxu0 }
 0x5a7   :  { %2765 = vst [vmem:[#allocation10 + $0xa8] sm:$0xff] %v2691_v15 }
 0x5a8   :  { %v2695_v4 = vpop.f32.mrb[140].mxu0 }
 0x5a9   :  { %v2696_v6 = vadd.f32 %v4940_v52, %v2695_v4  ;;  %v2697_v49 = vpop.f32.mrb[141].mxu0 }
 0x5ab   :  { %2766 = vst [vmem:[#allocation10 + $0xb0] sm:$0xff] %v2696_v6 }
 0x5ac   :  { %v2700_v13 = vpop.f32.mrb[142].mxu0 }
 0x5ad   :  { %v2701_v22 = vadd.f32 %v4940_v52, %v2700_v13  ;;  %v2702_v50 = vpop.f32.mrb[143].mxu0 }
 0x5af   :  { %2767 = vst [vmem:[#allocation10 + $0xb8] sm:$0xff] %v2701_v22 }
 0x5b0   :  { %v2705_v3 = vpop.f32.mrb[144].mxu0 }
 0x5b1   :  { %v2706_v48 = vadd.f32 %v4940_v52, %v2705_v3  ;;  %v2707_v55 = vpop.f32.mrb[145].mxu0 }
 0x5b3   :  { %2768 = vst [vmem:[#allocation10 + $0xc0] sm:$0xff] %v2706_v48 }
 0x5b4   :  { %v2710_v57 = vpop.f32.mrb[146].mxu0 }
 0x5b5   :  { %v2711_v58 = vadd.f32 %v4940_v52, %v2710_v57  ;;  %v2712_v62 = vpop.f32.mrb[147].mxu0 }
 0x5b7   :  { %2769 = vst [vmem:[#allocation10 + $0xc8] sm:$0xff] %v2711_v58 }
 0x5b8   :  { %v2715_v1 = vpop.f32.mrb[148].mxu0 }
 0x5b9   :  { %v2716_v36 = vadd.f32 %v4940_v52, %v2715_v1  ;;  %v2717_v2 = vpop.f32.mrb[149].mxu0 }
 0x5bb   :  { %2770 = vst [vmem:[#allocation10 + $0xd0] sm:$0xff] %v2716_v36 }
 0x5bc   :  { %v2720_v63 = vpop.f32.mrb[150].mxu0 }
 0x5bd   :  { %v2721_v60 = vadd.f32 %v4940_v52, %v2720_v63  ;;  %v2722_v21 = vpop.f32.mrb[151].mxu0 }
 0x5bf   :  { %2771 = vst [vmem:[#allocation10 + $0xd8] sm:$0xff] %v2721_v60 }
 0x5c0   :  { %v2725_v14 = vpop.f32.mrb[152].mxu0 }
 0x5c1   :  { %v2726_v53 = vadd.f32 %v4940_v52, %v2725_v14  ;;  %v2727_v25 = vpop.f32.mrb[153].mxu0 }
 0x5c3   :  { %2772 = vst [vmem:[#allocation10 + $0xe0] sm:$0xff] %v2726_v53 }
 0x5c4   :  { %v2730_v10 = vpop.f32.mrb[154].mxu0 }
 0x5c5   :  { %v2731_v29 = vadd.f32 %v4940_v52, %v2730_v10  ;;  %v2732_v9 = vpop.f32.mrb[155].mxu0 }
 0x5c7   :  { %2773 = vst [vmem:[#allocation10 + $0xe8] sm:$0xff] %v2731_v29 }
 0x5c8   :  { %v2735_v56 = vpop.f32.mrb[156].mxu0 }
 0x5c9   :  { %v2736_v5 = vadd.f32 %v4940_v52, %v2735_v56  ;;  %v2737_v11 = vpop.f32.mrb[157].mxu0 }
 0x5cb   :  { %2774 = vst [vmem:[#allocation10 + $0xf0] sm:$0xff] %v2736_v5 }
 0x5cc   :  { %v2740_v17 = vpop.f32.mrb[158].mxu0 }
 0x5cd   :  { %v2741_v30 = vadd.f32 %v4940_v52, %v2740_v17  ;;  %v2742_v32 = vpop.f32.mrb[159].mxu0 }
 0x5cf   :  { %2775 = vst [vmem:[#allocation10 + $0xf8] sm:$0xff] %v2741_v30 }
 0x5d0   :  { %3946 = shalt.err (!%p3943_p8)
}
 0x5d1   :  { %s3947_s0 = scalar_lea.hbm %s5002_s13, 4096 }
 0x5d2   :  { %p3948_p9 = scmp.ne.s32.totalorder %s5002_s13, %s3947_s0  ;;  %p3951_p10 = scmp.lt.u32.totalorder %s3947_s0, %s5002_s13 }
 0x5d4   :  { %p3953_p11 = pnand %p3951_p10, %p3948_p9 }
 0x5d6   :  { %3956 = shalt.err (!%p3953_p11)
}
 0x5d7   :  { %2787 = dma.vmem_to_hbm [thread:$0]  %s2782_s29, 4096, %s5002_s13, [#allocation4], %s3967_s20, %s3967_s20, %s3968_s21  }
 0x5d8   :  { %3963 = dma.done.wait [#allocation4], 4096  }
 0x5d9   :  { %3964 = vsyncadd [#allocation4], 4294963200 }
 0x5da   :  { %2791 = vsyncpa [#allocation3], 1 }
 0x5db   :  { %2792 = vsyncpa [#allocation6], 1 }
 0x5dc   :  { %2793 = vsyncpa [#allocation9], 1 }
 0x5dd   :  { %2794 = vsyncpa [#allocation4], 1 }

</bundles_post_ra>
